<compile_context>
chip_gen: v5e
topology: v5e:2x2
jax: 0.10.0
libtpu: 0.0.40
codegen_flags: <defaults>
</compile_context>

<pallas_src>
import functools

import jax
import jax.numpy as jnp
from jax.experimental import pallas as pl
from jax.experimental.pallas import tpu as pltpu


# ----------------------------------------------------------------------------
# Model dimensions ('mnist' variant of the PyTorch Generator)
# ----------------------------------------------------------------------------
Z_DIM = 100
IMAGE_SHAPE = (1, 28, 28)
OUT_DIM = 28 * 28 * 1                               # 784
LAYER_DIMS = [Z_DIM, 128, 256, 512, 1024, OUT_DIM]  # 5 Linear layers
LANE = 128
SUBLANE = 8


def _round_up(x, m):
    return (x + m - 1) // m * m


Z_PAD = _round_up(Z_DIM, LANE)       # 128 (lane-dense first matmul)
OUT_PAD = _round_up(OUT_DIM, LANE)   # 896 (lane-dense final matmul; cropped in-kernel)
PADDED_DIMS = [Z_PAD] + LAYER_DIMS[1:-1] + [OUT_PAD]


# ----------------------------------------------------------------------------
# Fused kernel body: 5 x (Linear + activation) on one batch tile of BM rows.
# Weight/bias refs are full arrays (VMEM-resident across the whole grid).
# ----------------------------------------------------------------------------
def _generator_fused_kernel(z_ref,
                            w0_ref, b0_ref,
                            w1_ref, b1_ref,
                            w2_ref, b2_ref,
                            w3_ref, b3_ref,
                            w4_ref, b4_ref,
                            o_ref):
    def linear(h_bf16, w_ref, b_ref):
        # bf16 x bf16 on the MXU, f32 accumulation; bias add in f32.
        y = jnp.dot(h_bf16, w_ref[...], preferred_element_type=jnp.float32)
        return y + b_ref[...]

    def leaky_relu_bf16(y_f32):
        # LeakyReLU(0.2): max(y, 0.2*y); carry inter-layer activations in bf16.
        return jnp.maximum(y_f32, 0.2 * y_f32).astype(jnp.bfloat16)

    h = z_ref[...].astype(jnp.bfloat16)                # (BM, 128)
    h = leaky_relu_bf16(linear(h, w0_ref, b0_ref))     # (BM, 128)
    h = leaky_relu_bf16(linear(h, w1_ref, b1_ref))     # (BM, 256)
    h = leaky_relu_bf16(linear(h, w2_ref, b2_ref))     # (BM, 512)
    h = leaky_relu_bf16(linear(h, w3_ref, b3_ref))     # (BM, 1024)
    y = jnp.tanh(linear(h, w4_ref, b4_ref))            # (BM, 896) f32
    # Crop padded output columns in VMEM; store the dense (BM, 784) tile.
    o_ref[...] = y[:, :OUT_DIM].astype(o_ref.dtype)


# ----------------------------------------------------------------------------
# Parameter init (PyTorch nn.Linear-style uniform +-1/sqrt(fan_in)) + packing
# ----------------------------------------------------------------------------
def init_generator_params(key, dims=tuple(LAYER_DIMS)):
    params = []
    for i in range(len(dims) - 1):
        fan_in, fan_out = dims[i], dims[i + 1]
        key, kw, kb = jax.random.split(key, 3)
        bound = 1.0 / (fan_in ** 0.5)
        w = jax.random.uniform(kw, (fan_in, fan_out), jnp.float32, -bound, bound)
        b = jax.random.uniform(kb, (fan_out,), jnp.float32, -bound, bound)
        params.append((w, b))
    return params


def pack_params(params):
    """One-time preprocessing: pad to lane multiples, weights->bf16, biases->(1,out) f32."""
    packed = []
    for i, (w, b) in enumerate(params):
        in_pad = PADDED_DIMS[i] - w.shape[0]
        out_pad = PADDED_DIMS[i + 1] - w.shape[1]
        w_p = jnp.pad(w, ((0, in_pad), (0, out_pad))).astype(jnp.bfloat16)
        b_p = jnp.pad(b, (0, out_pad)).reshape(1, -1).astype(jnp.float32)
        packed.append((w_p, b_p))
    return packed


# ----------------------------------------------------------------------------
# Forward pass: z (B, 100) -> fused batch-tiled MLP kernel -> (B, 1, 28, 28)
# ----------------------------------------------------------------------------
@functools.partial(jax.jit, static_argnames=("block_m",))
def generator_forward(z, packed_params, block_m=None):
    B = z.shape[0]
    if block_m is None:
        # MXU-friendly default: up to 256 rows/tile (v6e/v7x MXU is 2x256x256).
        block_m = min(_round_up(B, SUBLANE), 256)
    bm = int(block_m)
    b_pad = _round_up(max(B, bm), bm)

    # Pad z once: features 100 -> 128, rows B -> multiple of BM (zeros).
    zp = jnp.pad(z.astype(jnp.float32),
                 ((0, b_pad - B), (0, Z_PAD - z.shape[1])))

    flat_inputs = [zp]
    in_specs = [pl.BlockSpec((bm, Z_PAD), lambda i: (i, 0))]
    weight_bytes = 0
    for w, b in packed_params:
        flat_inputs.extend([w, b])
        # Constant block index across the batch grid -> weights/biases are
        # fetched once and stay VMEM-resident for every batch tile.
        in_specs.append(pl.BlockSpec(w.shape, lambda i: (0, 0)))
        in_specs.append(pl.BlockSpec(b.shape, lambda i: (0, 0)))
        weight_bytes += w.size * w.dtype.itemsize + b.size * b.dtype.itemsize

    flops = 2 * b_pad * sum(PADDED_DIMS[i] * PADDED_DIMS[i + 1]
                            for i in range(len(PADDED_DIMS) - 1))
    bytes_accessed = (weight_bytes
                      + b_pad * Z_PAD * 4          # z in
                      + b_pad * OUT_DIM * 4)       # image out

    out = pl.pallas_call(
        _generator_fused_kernel,
        out_shape=jax.ShapeDtypeStruct((b_pad, OUT_DIM), jnp.float32),
        grid=(b_pad // bm,),
        in_specs=in_specs,
        out_specs=pl.BlockSpec((bm, OUT_DIM), lambda i: (i, 0)),
        compiler_params=pltpu.CompilerParams(
            # Batch axis is embarrassingly parallel -> lets v7x use both TCs.
            dimension_semantics=("parallel",),
            # ~3.2 MB bf16 weights (x2 buffers) + small activation tiles; 32 MB
            # leaves ample headroom and fits v7x's 64 MiB physical VMEM.
            vmem_limit_bytes=32 * 1024 * 1024,
        ),
        cost_estimate=pl.CostEstimate(
            flops=flops,
            transcendentals=b_pad * OUT_PAD,       # tanh
            bytes_accessed=bytes_accessed,
        ),
    )(*flat_inputs)

    img = out if b_pad == B else out[:B]
    return img.reshape(B, *IMAGE_SHAPE)


# Pure-JAX reference (f32, unpadded) for correctness checking.
def generator_reference(z, params):
    h = z
    n = len(params)
    for i, (w, b) in enumerate(params):
        h = h @ w + b
        h = jnp.tanh(h) if i == n - 1 else jnp.where(h > 0, h, 0.2 * h)
    return h.reshape(z.shape[0], *IMAGE_SHAPE)


if __name__ == "__main__":
    key = jax.random.PRNGKey(0)
    k_params, k_z = jax.random.split(key)

    params = init_generator_params(k_params)
    packed = pack_params(params)

    batch = 16
    z = jax.random.normal(k_z, (batch, Z_DIM), dtype=jnp.float32)

    # Small block_m so the test actually exercises the batch grid (2 tiles).
    img = generator_forward(z, packed, block_m=8)
    jax.block_until_ready(img)

    assert img.shape == (batch, *IMAGE_SHAPE), img.shape
    assert img.dtype == jnp.float32
    # tanh output must lie in [-1, 1]
    assert bool(jnp.all(jnp.abs(img) <= 1.0 + 1e-6))

    # Numerical check vs f32 reference (bf16 weights/activations -> small error).
    ref = generator_reference(z, params)
    max_err = float(jnp.max(jnp.abs(img - ref)))
    assert max_err < 0.1, f"max abs error vs reference: {max_err}"

    # Default tiling path (single tile at this batch) must also work.
    img2 = generator_forward(z, packed)
    jax.block_until_ready(img2)
    assert img2.shape == (batch, *IMAGE_SHAPE)

    print("KERNEL_OK")
</pallas_src>

<mosaic_0001>
module attributes {stable_mosaic.version = 11 : i64} {
  func.func @_generator_fused_kernel(%arg0: i32, %arg1: memref<8x128xf32, #tpu.memory_space<vmem>>, %arg2: memref<128x128xbf16, #tpu.memory_space<vmem>>, %arg3: memref<1x128xf32, #tpu.memory_space<vmem>>, %arg4: memref<128x256xbf16, #tpu.memory_space<vmem>>, %arg5: memref<1x256xf32, #tpu.memory_space<vmem>>, %arg6: memref<256x512xbf16, #tpu.memory_space<vmem>>, %arg7: memref<1x512xf32, #tpu.memory_space<vmem>>, %arg8: memref<512x1024xbf16, #tpu.memory_space<vmem>>, %arg9: memref<1x1024xf32, #tpu.memory_space<vmem>>, %arg10: memref<1024x896xbf16, #tpu.memory_space<vmem>>, %arg11: memref<1x896xf32, #tpu.memory_space<vmem>>, %arg12: memref<8x784xf32, #tpu.memory_space<vmem>>) attributes {dimension_semantics = [#tpu.dimension_semantics<parallel>], iteration_bounds = array<i64: 2>, scalar_prefetch = 0 : i64, scratch_operands = 0 : i64, tpu.core_type = #tpu.core_type<tc>, window_params = [{transform_indices = @transform_0, window_bounds = array<i64: 8, 128>}, {pipeline_mode = #tpu.pipeline_mode<synchronous>, transform_indices = @transform_1, window_bounds = array<i64: 128, 128>}, {pipeline_mode = #tpu.pipeline_mode<synchronous>, transform_indices = @transform_2, window_bounds = array<i64: 1, 128>}, {pipeline_mode = #tpu.pipeline_mode<synchronous>, transform_indices = @transform_3, window_bounds = array<i64: 128, 256>}, {pipeline_mode = #tpu.pipeline_mode<synchronous>, transform_indices = @transform_4, window_bounds = array<i64: 1, 256>}, {pipeline_mode = #tpu.pipeline_mode<synchronous>, transform_indices = @transform_5, window_bounds = array<i64: 256, 512>}, {pipeline_mode = #tpu.pipeline_mode<synchronous>, transform_indices = @transform_6, window_bounds = array<i64: 1, 512>}, {pipeline_mode = #tpu.pipeline_mode<synchronous>, transform_indices = @transform_7, window_bounds = array<i64: 512, 1024>}, {pipeline_mode = #tpu.pipeline_mode<synchronous>, transform_indices = @transform_8, window_bounds = array<i64: 1, 1024>}, {pipeline_mode = #tpu.pipeline_mode<synchronous>, transform_indices = @transform_9, window_bounds = array<i64: 1024, 896>}, {pipeline_mode = #tpu.pipeline_mode<synchronous>, transform_indices = @transform_10, window_bounds = array<i64: 1, 896>}, {transform_indices = @transform_11, window_bounds = array<i64: 8, 784>}]} {
    %c0 = arith.constant 0 : index
    %c0_0 = arith.constant 0 : index
    %0 = vector.load %arg1[%c0, %c0_0] : memref<8x128xf32, #tpu.memory_space<vmem>>, vector<8x128xf32>
    %1 = arith.truncf %0 : vector<8x128xf32> to vector<8x128xbf16>
    %c0_1 = arith.constant 0 : index
    %c0_2 = arith.constant 0 : index
    %2 = vector.load %arg2[%c0_1, %c0_2] : memref<128x128xbf16, #tpu.memory_space<vmem>>, vector<128x128xbf16>
    %cst = arith.constant dense<0.000000e+00> : vector<8x128xf32>
    %3 = tpu.matmul %1, %2, %cst {dimension_numbers = #tpu.dot_dimension_numbers<[1], [0], [0], [1], [0, 0, 1, 1], [], []>} : vector<8x128xbf16>, vector<128x128xbf16>, vector<8x128xf32> -> vector<8x128xf32>
    %c0_3 = arith.constant 0 : index
    %c0_4 = arith.constant 0 : index
    %4 = vector.load %arg3[%c0_3, %c0_4] : memref<1x128xf32, #tpu.memory_space<vmem>>, vector<1x128xf32>
    %5 = vector.broadcast %4 : vector<1x128xf32> to vector<8x128xf32>
    %6 = arith.addf %3, %5 : vector<8x128xf32>
    %cst_5 = arith.constant 2.000000e-01 : f32
    %7 = vector.broadcast %cst_5 : f32 to vector<8x128xf32>
    %8 = arith.mulf %7, %6 : vector<8x128xf32>
    %9 = arith.maximumf %6, %8 : vector<8x128xf32>
    %10 = arith.truncf %9 : vector<8x128xf32> to vector<8x128xbf16>
    %c0_6 = arith.constant 0 : index
    %c0_7 = arith.constant 0 : index
    %11 = vector.load %arg4[%c0_6, %c0_7] : memref<128x256xbf16, #tpu.memory_space<vmem>>, vector<128x256xbf16>
    %cst_8 = arith.constant dense<0.000000e+00> : vector<8x256xf32>
    %12 = tpu.matmul %10, %11, %cst_8 {dimension_numbers = #tpu.dot_dimension_numbers<[1], [0], [0], [1], [0, 0, 1, 1], [], []>} : vector<8x128xbf16>, vector<128x256xbf16>, vector<8x256xf32> -> vector<8x256xf32>
    %c0_9 = arith.constant 0 : index
    %c0_10 = arith.constant 0 : index
    %13 = vector.load %arg5[%c0_9, %c0_10] : memref<1x256xf32, #tpu.memory_space<vmem>>, vector<1x256xf32>
    %14 = vector.broadcast %13 : vector<1x256xf32> to vector<8x256xf32>
    %15 = arith.addf %12, %14 : vector<8x256xf32>
    %cst_11 = arith.constant 2.000000e-01 : f32
    %16 = vector.broadcast %cst_11 : f32 to vector<8x256xf32>
    %17 = arith.mulf %16, %15 : vector<8x256xf32>
    %18 = arith.maximumf %15, %17 : vector<8x256xf32>
    %19 = arith.truncf %18 : vector<8x256xf32> to vector<8x256xbf16>
    %c0_12 = arith.constant 0 : index
    %c0_13 = arith.constant 0 : index
    %20 = vector.load %arg6[%c0_12, %c0_13] : memref<256x512xbf16, #tpu.memory_space<vmem>>, vector<256x512xbf16>
    %cst_14 = arith.constant dense<0.000000e+00> : vector<8x512xf32>
    %21 = tpu.matmul %19, %20, %cst_14 {dimension_numbers = #tpu.dot_dimension_numbers<[1], [0], [0], [1], [0, 0, 1, 1], [], []>} : vector<8x256xbf16>, vector<256x512xbf16>, vector<8x512xf32> -> vector<8x512xf32>
    %c0_15 = arith.constant 0 : index
    %c0_16 = arith.constant 0 : index
    %22 = vector.load %arg7[%c0_15, %c0_16] : memref<1x512xf32, #tpu.memory_space<vmem>>, vector<1x512xf32>
    %23 = vector.broadcast %22 : vector<1x512xf32> to vector<8x512xf32>
    %24 = arith.addf %21, %23 : vector<8x512xf32>
    %cst_17 = arith.constant 2.000000e-01 : f32
    %25 = vector.broadcast %cst_17 : f32 to vector<8x512xf32>
    %26 = arith.mulf %25, %24 : vector<8x512xf32>
    %27 = arith.maximumf %24, %26 : vector<8x512xf32>
    %28 = arith.truncf %27 : vector<8x512xf32> to vector<8x512xbf16>
    %c0_18 = arith.constant 0 : index
    %c0_19 = arith.constant 0 : index
    %29 = vector.load %arg8[%c0_18, %c0_19] : memref<512x1024xbf16, #tpu.memory_space<vmem>>, vector<512x1024xbf16>
    %cst_20 = arith.constant dense<0.000000e+00> : vector<8x1024xf32>
    %30 = tpu.matmul %28, %29, %cst_20 {dimension_numbers = #tpu.dot_dimension_numbers<[1], [0], [0], [1], [0, 0, 1, 1], [], []>} : vector<8x512xbf16>, vector<512x1024xbf16>, vector<8x1024xf32> -> vector<8x1024xf32>
    %c0_21 = arith.constant 0 : index
    %c0_22 = arith.constant 0 : index
    %31 = vector.load %arg9[%c0_21, %c0_22] : memref<1x1024xf32, #tpu.memory_space<vmem>>, vector<1x1024xf32>
    %32 = vector.broadcast %31 : vector<1x1024xf32> to vector<8x1024xf32>
    %33 = arith.addf %30, %32 : vector<8x1024xf32>
    %cst_23 = arith.constant 2.000000e-01 : f32
    %34 = vector.broadcast %cst_23 : f32 to vector<8x1024xf32>
    %35 = arith.mulf %34, %33 : vector<8x1024xf32>
    %36 = arith.maximumf %33, %35 : vector<8x1024xf32>
    %37 = arith.truncf %36 : vector<8x1024xf32> to vector<8x1024xbf16>
    %c0_24 = arith.constant 0 : index
    %c0_25 = arith.constant 0 : index
    %38 = vector.load %arg10[%c0_24, %c0_25] : memref<1024x896xbf16, #tpu.memory_space<vmem>>, vector<1024x896xbf16>
    %cst_26 = arith.constant dense<0.000000e+00> : vector<8x896xf32>
    %39 = tpu.matmul %37, %38, %cst_26 {dimension_numbers = #tpu.dot_dimension_numbers<[1], [0], [0], [1], [0, 0, 1, 1], [], []>} : vector<8x1024xbf16>, vector<1024x896xbf16>, vector<8x896xf32> -> vector<8x896xf32>
    %c0_27 = arith.constant 0 : index
    %c0_28 = arith.constant 0 : index
    %40 = vector.load %arg11[%c0_27, %c0_28] : memref<1x896xf32, #tpu.memory_space<vmem>>, vector<1x896xf32>
    %41 = vector.broadcast %40 : vector<1x896xf32> to vector<8x896xf32>
    %42 = arith.addf %39, %41 : vector<8x896xf32>
    %43 = math.tanh %42 : vector<8x896xf32>
    %44 = vector.extract_strided_slice %43 {offsets = [0, 0], sizes = [8, 784], strides = [1, 1]} : vector<8x896xf32> to vector<8x784xf32>
    %c0_29 = arith.constant 0 : index
    %c0_30 = arith.constant 0 : index
    %45 = vector.load %arg12[%c0_29, %c0_30] : memref<8x784xf32, #tpu.memory_space<vmem>>, vector<8x784xf32>
    tpu.vector_store %arg12[%c0_29, %c0_30], %44 {strides = array<i32>} : memref<8x784xf32, #tpu.memory_space<vmem>>, vector<8x784xf32>,
    return
  }
  func.func @transform_0(%arg0: i32) -> (i32, i32) {
    %c0_i32 = arith.constant 0 : i32
    %c0_i32_0 = arith.constant 0 : i32
    return %arg0, %c0_i32 : i32, i32
  }
  func.func @transform_1(%arg0: i32) -> (i32, i32) {
    %c0_i32 = arith.constant 0 : i32
    %c0_i32_0 = arith.constant 0 : i32
    %c0_i32_1 = arith.constant 0 : i32
    return %c0_i32, %c0_i32_0 : i32, i32
  }
  func.func @transform_2(%arg0: i32) -> (i32, i32) {
    %c0_i32 = arith.constant 0 : i32
    %c0_i32_0 = arith.constant 0 : i32
    %c0_i32_1 = arith.constant 0 : i32
    return %c0_i32, %c0_i32_0 : i32, i32
  }
  func.func @transform_3(%arg0: i32) -> (i32, i32) {
    %c0_i32 = arith.constant 0 : i32
    %c0_i32_0 = arith.constant 0 : i32
    %c0_i32_1 = arith.constant 0 : i32
    return %c0_i32, %c0_i32_0 : i32, i32
  }
  func.func @transform_4(%arg0: i32) -> (i32, i32) {
    %c0_i32 = arith.constant 0 : i32
    %c0_i32_0 = arith.constant 0 : i32
    %c0_i32_1 = arith.constant 0 : i32
    return %c0_i32, %c0_i32_0 : i32, i32
  }
  func.func @transform_5(%arg0: i32) -> (i32, i32) {
    %c0_i32 = arith.constant 0 : i32
    %c0_i32_0 = arith.constant 0 : i32
    %c0_i32_1 = arith.constant 0 : i32
    return %c0_i32, %c0_i32_0 : i32, i32
  }
  func.func @transform_6(%arg0: i32) -> (i32, i32) {
    %c0_i32 = arith.constant 0 : i32
    %c0_i32_0 = arith.constant 0 : i32
    %c0_i32_1 = arith.constant 0 : i32
    return %c0_i32, %c0_i32_0 : i32, i32
  }
  func.func @transform_7(%arg0: i32) -> (i32, i32) {
    %c0_i32 = arith.constant 0 : i32
    %c0_i32_0 = arith.constant 0 : i32
    %c0_i32_1 = arith.constant 0 : i32
    return %c0_i32, %c0_i32_0 : i32, i32
  }
  func.func @transform_8(%arg0: i32) -> (i32, i32) {
    %c0_i32 = arith.constant 0 : i32
    %c0_i32_0 = arith.constant 0 : i32
    %c0_i32_1 = arith.constant 0 : i32
    return %c0_i32, %c0_i32_0 : i32, i32
  }
  func.func @transform_9(%arg0: i32) -> (i32, i32) {
    %c0_i32 = arith.constant 0 : i32
    %c0_i32_0 = arith.constant 0 : i32
    %c0_i32_1 = arith.constant 0 : i32
    return %c0_i32, %c0_i32_0 : i32, i32
  }
  func.func @transform_10(%arg0: i32) -> (i32, i32) {
    %c0_i32 = arith.constant 0 : i32
    %c0_i32_0 = arith.constant 0 : i32
    %c0_i32_1 = arith.constant 0 : i32
    return %c0_i32, %c0_i32_0 : i32, i32
  }
  func.func @transform_11(%arg0: i32) -> (i32, i32) {
    %c0_i32 = arith.constant 0 : i32
    %c0_i32_0 = arith.constant 0 : i32
    return %arg0, %c0_i32 : i32, i32
  }
}

</mosaic_0001>

<bundles_post_ra>
// kernel: generator_forward.1
= control target key start
LH: loop header
LB: loop body
LE: loop exit
PB: predicated region body
PF: predicated region fallthrough
CT: control target
= control target key end

     0   :  { %16 = vsyncpa [#allocation3], 0  ;;  %s11944_s0 = inlined_call_operand.vmem [shape: f32[16,128], index: 0, kind: input, shape index: {}]   ;;  %s11945_s1 = inlined_call_operand.hbm [shape: bf16[128,128], index: 1, kind: input, shape index: {}]   ;;  %s11946_s2 = inlined_call_operand.hbm [shape: f32[1,128], index: 2, kind: input, shape index: {}]   ;;  %s11947_s3 = inlined_call_operand.hbm [shape: bf16[128,256], index: 3, kind: input, shape index: {}]   ;;  %s11948_s4 = inlined_call_operand.hbm [shape: f32[1,256], index: 4, kind: input, shape index: {}]   ;;  %s11949_s5 = inlined_call_operand.hbm [shape: bf16[256,512], index: 5, kind: input, shape index: {}]   ;;  %s11950_s6 = inlined_call_operand.hbm [shape: f32[1,512], index: 6, kind: input, shape index: {}]   ;;  %s11951_s7 = inlined_call_operand.hbm [shape: bf16[512,1024], index: 7, kind: input, shape index: {}]   ;;  %s11952_s8 = inlined_call_operand.hbm [shape: f32[1,1024], index: 8, kind: input, shape index: {}]   ;;  %s11953_s9 = inlined_call_operand.hbm [shape: bf16[1024,896], index: 9, kind: input, shape index: {}]   ;;  %s11954_s10 = inlined_call_operand.hbm [shape: f32[1,896], index: 10, kind: input, shape index: {}]   ;;  %s11955_s11 = inlined_call_operand.vmem [shape: f32[16,784], index: 11, kind: output, shape index: {}]  }
   0x1   :  { %17 = vsyncpa [#allocation5], 0 }
   0x2   :  { %18 = vsyncpa [#allocation8], 0 }
   0x3   :  { %19 = vsyncpa [#allocation11], 0 }
   0x4   :  { %20 = vsyncpa [#allocation14], 0 }
   0x5   :  { %21 = vsyncpa [#allocation17], 0  ;;  %s11531_s17 = smov 0  }
   0x6 LB: > { %s320_s20 = sshll.u32 %s11946_s2, 4  ;;  %s11540_s21 = sadd.s32 4294967295, %s11449_s17   ;;  %s11449_s17 = sphi %s11531_s17, %s27_s17   ;;  %s321_s20 = int_to_ptr.hbm [resolvable:$true] %s320_s20 }
   0x7   : > { %p6994_p0 = scmp.ge.s32.totalorder %s11449_s17, 1  ;;  %p294_p1 = scmp.lt.s32.totalorder %s11449_s17, 3 }
   0x8   : > { %p11053_p2 = scmp.eq.s32.totalorder %s11540_s21, 0  ;;  %s11451_s23 = smov [#allocation4]  }
   0x9   : > { %p11545_p3 = pnand %p6994_p0, %p294_p1  ;;  %s322_s24 = sshll.u32 %s11451_s23, 4  ;;  %s323_s24 = int_to_ptr.vmem [resolvable:$true] %s322_s24 }
   0xa   : > { %s346_s27 = sshll.u32 %s11948_s4, 4  ;;  %s372_s30 = sshll.u32 %s11950_s6, 4  ;;  %s347_s27 = int_to_ptr.hbm [resolvable:$true] %s346_s27  ;;  %s373_s30 = int_to_ptr.hbm [resolvable:$true] %s372_s30 }
   0xb   : > { %p11022_p4 = pneg %p11545_p3  ;;  %s11452_s13 = smov [#allocation7]  }
   0xc   : > { %s348_s14 = sshll.u32 %s11452_s13, 4  ;;  %s11453_s15 = smov [#allocation10]   ;;  %s349_s14 = int_to_ptr.vmem [resolvable:$true] %s348_s14 }
   0xd   : > { %p11559_p5 = pnand %p11053_p2, %p11022_p4  ;;  %s374_s16 = sshll.u32 %s11453_s15, 4  ;;  %s375_s16 = int_to_ptr.vmem [resolvable:$true] %s374_s16 }
   0xe   : > { %s398_s23 = sshll.u32 %s11952_s8, 4  ;;  %s305_s28 = sshll.u32 %s11945_s1, 4  ;;  %s399_s23 = int_to_ptr.hbm [resolvable:$true] %s398_s23  ;;  %s306_s28 = int_to_ptr.hbm [resolvable:$true] %s305_s28 }
   0xf   : > { %11028 = dma.hbm_to_vmem [thread:$0]  (!%p11559_p5), %s321_s20, 16, %s323_s24, [#allocation5]  }
  0x10   : > { %11034 = dma.hbm_to_vmem [thread:$0]  (!%p11559_p5), %s347_s27, 32, %s349_s14, [#allocation8]  }
  0x11   : > { %11040 = dma.hbm_to_vmem [thread:$0]  (!%p11559_p5), %s373_s30, 64, %s375_s16, [#allocation11]  }
  0x12   : > { %s11454_s29 = smov [#allocation13]   ;;  %s11455_s20 = smov [#allocation2]  }
  0x13   : > { %s400_s13 = sshll.u32 %s11454_s29, 4  ;;  %s307_s24 = sshll.u32 %s11455_s20, 4  ;;  %s401_s13 = int_to_ptr.vmem [resolvable:$true] %s400_s13  ;;  %s308_s24 = int_to_ptr.vmem [resolvable:$true] %s307_s24 }
  0x14   : > { %11046 = dma.hbm_to_vmem [thread:$0]  (!%p11559_p5), %s399_s23, 128, %s401_s13, [#allocation14]  }
  0x15   : > { %s11456_s27 = smov 64   ;;  %s11457_s14 = smov 4  }
  0x16   : > { %11025 = dma.hbm_to_vmem [thread:$0]  (!%p11559_p5), %s306_s28, 1024, %s308_s24, [#allocation3], %s11456_s27, %s11456_s27, %s11457_s14  }
  0x17   : > { %s331_s16 = sshll.u32 %s11947_s3, 4  ;;  %s11458_s18 = smov [#allocation6]   ;;  %s332_s16 = int_to_ptr.hbm [resolvable:$true] %s331_s16 }
  0x18   : > { %s333_s19 = sshll.u32 %s11458_s18, 4  ;;  %s357_s23 = sshll.u32 %s11949_s5, 4  ;;  %s334_s19 = int_to_ptr.vmem [resolvable:$true] %s333_s19  ;;  %s358_s23 = int_to_ptr.hbm [resolvable:$true] %s357_s23 }
  0x19   : > { %s11459_s29 = smov 128   ;;  %s11460_s13 = smov 8  }
  0x1a   : > { %11031 = dma.hbm_to_vmem [thread:$0]  (!%p11559_p5), %s332_s16, 2048, %s334_s19, [#allocation5], %s11459_s29, %s11459_s29, %s11460_s13  }
  0x1b   : > { %s11461_s28 = smov [#allocation9]   ;;  %s11462_s24 = smov 256  }
  0x1c   : > { %s359_s20 = sshll.u32 %s11461_s28, 4  ;;  %s11463_s27 = smov 16   ;;  %s360_s20 = int_to_ptr.vmem [resolvable:$true] %s359_s20 }
  0x1d   : > { %11037 = dma.hbm_to_vmem [thread:$0]  (!%p11559_p5), %s358_s23, 8192, %s360_s20, [#allocation8], %s11462_s24, %s11462_s24, %s11463_s27  }
  0x1e   : > { %s383_s30 = sshll.u32 %s11951_s7, 4  ;;  %s11464_s18 = smov [#allocation12]   ;;  %s384_s30 = int_to_ptr.hbm [resolvable:$true] %s383_s30 }
  0x1f   : > { %s385_s25 = sshll.u32 %s11464_s18, 4  ;;  %s409_s19 = sshll.u32 %s11953_s9, 4  ;;  %s386_s25 = int_to_ptr.vmem [resolvable:$true] %s385_s25  ;;  %s410_s19 = int_to_ptr.hbm [resolvable:$true] %s409_s19 }
  0x20   : > { %s11465_s29 = smov 512   ;;  %s11466_s13 = smov 32  }
  0x21   : > { %11043 = dma.hbm_to_vmem [thread:$0]  (!%p11559_p5), %s384_s30, 32768, %s386_s25, [#allocation11], %s11465_s29, %s11465_s29, %s11466_s13  }
  0x22   : > { %s11467_s23 = smov [#allocation15]   ;;  %s11468_s20 = smov 448  }
  0x23   : > { %s411_s28 = sshll.u32 %s11467_s23, 4  ;;  %s11469_s24 = smov 28   ;;  %s412_s28 = int_to_ptr.vmem [resolvable:$true] %s411_s28 }
  0x24   : > { %11049 = dma.hbm_to_vmem [thread:$0]  (!%p11559_p5), %s410_s19, 57344, %s412_s28, [#allocation14], %s11468_s20, %s11468_s20, %s11469_s24  }
  0x25   : > { %s424_s15 = sshll.u32 %s11954_s10, 4  ;;  %s11470_s18 = smov [#allocation16]   ;;  %s425_s15 = int_to_ptr.hbm [resolvable:$true] %s424_s15 }
  0x26   : > { %s426_s26 = sshll.u32 %s11470_s18, 4  ;;  %446 = sbr.rel (%p11545_p3) target bundleno = 1351 (0x547), region = 64  ;;  %s427_s26 = int_to_ptr.vmem [resolvable:$true] %s426_s26 }
  0x27   : > { %11052 = dma.hbm_to_vmem [thread:$0]  (!%p11559_p5), %s425_s15, 112, %s427_s26, [#allocation17]  }
  0x2b   : > { %11424 = dma.done.wait (%p11053_p2), [#allocation3], 1024  }
  0x2c   : > { %11426 = vsyncadd (%p11053_p2), [#allocation3], 4294966272 }
  0x2d   : > { %11428 = dma.done.wait (%p11053_p2), [#allocation5], 2064  }
  0x2e   : > { %11430 = vsyncadd (%p11053_p2), [#allocation5], 4294965232 }
  0x2f   : > { %11432 = dma.done.wait (%p11053_p2), [#allocation8], 8224  }
  0x30   : > { %11434 = vsyncadd (%p11053_p2), [#allocation8], 4294959072 }
  0x31   : > { %11436 = dma.done.wait (%p11053_p2), [#allocation11], 32832  }
  0x32   : > { %11438 = vsyncadd (%p11053_p2), [#allocation11], 4294934464 }
  0x33   : > { %11440 = dma.done.wait (%p11053_p2), [#allocation14], 57472  }
  0x34   : > { %11442 = vsyncadd (%p11053_p2), [#allocation14], 4294909824 }
  0x35   : > { %11444 = dma.done.wait (%p11053_p2), [#allocation17], 112  }
  0x36   : > { %11446 = vsyncadd (%p11053_p2), [#allocation17], 4294967184  ;;  %v10196_v0 = vld [vmem:[#allocation2 + $0x38] sm:$0xff]  ;;  %v10195_v1 = vld [vmem:[#allocation2 + $0x30] sm:$0xff]  ;;  %p531_p6 = scmp.lt.s32.totalorder %s11540_s21, 1  ;;  %vm6837_vm0 = vcmask 130048  }
  0x37   : > { %610 = vmatpush.bf16.msra.mxu0 %v10196_v0  ;;  %v7109_v2 = vld [vmem:[#allocation6 + $0x70] sm:$0xf]  ;;  %v10212_v3 = vld [vmem:[#allocation6 + $0x74] sm:$0xf0]  ;;  %v10211_v4 = vld [vmem:[#allocation6 + $0x74] sm:$0xf] }
  0x38   : > { %v7110_v5 = vor.u32 %v10212_v3, %v7109_v2  ;;  %v7111_v6 = vld [vmem:[#allocation6 + $0x78] sm:$0xf0]  ;;  %v7101_v7 = vld [vmem:[#allocation6 + $0x60] sm:$0xf]  ;;  %v10210_v8 = vld [vmem:[#allocation6 + $0x64] sm:$0xf0] }
  0x39   : > { %v7114_v9 = vor.u32 %v10211_v4, %v7111_v6  ;;  %v10209_v10 = vld [vmem:[#allocation6 + $0x64] sm:$0xf]  ;;  %v7103_v11 = vld [vmem:[#allocation6 + $0x68] sm:$0xf0]  ;;  %v7102_v13 = vor.u32 %v10210_v8, %v7101_v7  ;;  %v7093_v15 = vld [vmem:[#allocation6 + $0x50] sm:$0xf] }
  0x3a   : > { %v10194_v12 = vld [vmem:[#allocation2 + $0x28] sm:$0xff]  ;;  %728 = vmatpush.bf16.msra.mxu1 %v7110_v5  ;;  %v7106_v14 = vor.u32 %v10209_v10, %v7103_v11  ;;  %v10208_v16 = vld [vmem:[#allocation6 + $0x54] sm:$0xf0]  ;;  %v10207_v17 = vld [vmem:[#allocation6 + $0x54] sm:$0xf]  ;;  %s11959_s21 = smov (!%p531_p6, %s11540_s21), 1 }
  0x3b   : > { %611 = vmatpush.bf16.msra.mxu0 %v10195_v1  ;;  %741 = vmatpush.bf16.msra.mxu2 %v7114_v9  ;;  %v7095_v18 = vld [vmem:[#allocation6 + $0x58] sm:$0xf0]  ;;  %v7094_v20 = vor.u32 %v10208_v16, %v7093_v15  ;;  %v7085_v22 = vld [vmem:[#allocation6 + $0x40] sm:$0xf]  ;;  %v10206_v23 = vld [vmem:[#allocation6 + $0x44] sm:$0xf0] }
  0x3c   : > { %v10193_v19 = vld [vmem:[#allocation2 + $0x20] sm:$0xff]  ;;  %v7098_v21 = vor.u32 %v10207_v17, %v7095_v18  ;;  %v7087_v25 = vld [vmem:[#allocation6 + $0x48] sm:$0xf0]  ;;  %v10192_v26 = vld [vmem:[#allocation2 + $0x18] sm:$0xff]  ;;  %v7086_v27 = vor.u32 %v10206_v23, %v7085_v22  ;;  %s7017_s22 = sshll.u32 %s11959_s21, 3  ;;  %s10981_s16 = smul.u32 56, %s11959_s21 }
  0x3d   : > { %v10205_v24 = vld [vmem:[#allocation6 + $0x44] sm:$0xf]  ;;  %v7077_v29 = vld [vmem:[#allocation6 + $0x30] sm:$0xf]  ;;  %v10204_v30 = vld [vmem:[#allocation6 + $0x34] sm:$0xf0]  ;;  %s534_s25 = scalar_lea.vmem %s11944_s0, %s7017_s22 }
  0x3e   : > { %729 = vmatpush.bf16.msra.mxu1 %v7102_v13  ;;  %v7090_v28 = vor.u32 %v10205_v24, %v7087_v25  ;;  %v10203_v31 = vld [vmem:[#allocation6 + $0x34] sm:$0xf]  ;;  %v7079_v32 = vld [vmem:[#allocation6 + $0x38] sm:$0xf0]  ;;  %v7078_v34 = vor.u32 %v10204_v30, %v7077_v29  ;;  %v7069_v36 = vld [vmem:[#allocation6 + $0x20] sm:$0xf]  ;;  %s11853_s29 = scalar_lea.vmem %s11955_s11, %s10981_s16 }
  0x3f   : > { %612 = vmatpush.bf16.msra.mxu0 %v10194_v12  ;;  %742 = vmatpush.bf16.msra.mxu2 %v7106_v14  ;;  %v10191_v33 = vld [vmem:[#allocation2 + $0x10] sm:$0xff]  ;;  %v7082_v35 = vor.u32 %v10203_v31, %v7079_v32  ;;  %v10202_v37 = vld [vmem:[#allocation6 + $0x24] sm:$0xf0]  ;;  %v10201_v38 = vld [vmem:[#allocation6 + $0x24] sm:$0xf] }
  0x40   : > { %v7071_v39 = vld [vmem:[#allocation6 + $0x28] sm:$0xf0]  ;;  %v7070_v41 = vor.u32 %v10202_v37, %v7069_v36  ;;  %v10189_v43 = vld [vmem:[#allocation2] sm:$0xff]  ;;  %v7061_v46 = vld [vmem:[#allocation6 + $0x10] sm:$0xf] }
  0x41   : > { %v10190_v40 = vld [vmem:[#allocation2 + $0x8] sm:$0xff]  ;;  %v7074_v42 = vor.u32 %v10201_v38, %v7071_v39  ;;  %v540_v44 = vld [vmem:[%s534_s25] sm:$0xff]  ;;  %v10200_v47 = vld [vmem:[#allocation6 + $0x14] sm:$0xf0] }
  0x42   : > { %730 = vmatpush.bf16.msra.mxu1 %v7094_v20  ;;  %v541_v45 = vpack.c.bf16 %v540_v44, %v540_v44  ;;  %v10199_v48 = vld [vmem:[#allocation6 + $0x14] sm:$0xf]  ;;  %v7062_v49 = vor.u32 %v10200_v47, %v7061_v46  ;;  %v7063_v50 = vld [vmem:[#allocation6 + $0x18] sm:$0xf0]  ;;  %v7053_v52 = vld [vmem:[#allocation6] sm:$0xf] }
  0x43   : > { %613 = vmatpush.bf16.msra.mxu0 %v10193_v19  ;;  %743 = vmatpush.bf16.msra.mxu2 %v7098_v21  ;;  %v7066_v51 = vor.u32 %v10199_v48, %v7063_v50  ;;  %v10198_v53 = vld [vmem:[#allocation6 + $0x4] sm:$0xf0]  ;;  %v10197_v54 = vld [vmem:[#allocation6 + $0x4] sm:$0xf]  ;;  %v7055_v56 = vld [vmem:[#allocation6 + $0x8] sm:$0xf0] }
  0x44   : > { %v7054_v55 = vor.u32 %v10198_v53, %v7053_v52  ;;  %v7058_v57 = vor.u32 %v10197_v54, %v7055_v56  ;;  %v7229_v58 = vld [vmem:[#allocation9 + $0xe0] sm:$0xf]  ;;  %v10243_v59 = vld [vmem:[#allocation9 + $0xec] sm:$0xf0]  ;;  %v10241_v60 = vld [vmem:[#allocation9 + $0xe4] sm:$0xf] }
  0x45   : > { %v7230_v61 = vor.u32 %v10243_v59, %v7229_v58  ;;  %v7231_v62 = vld [vmem:[#allocation9 + $0xf0] sm:$0xf0]  ;;  %v7213_v63 = vld [vmem:[#allocation9 + $0xc0] sm:$0xf]  ;;  %v10239_v0 = vld [vmem:[#allocation9 + $0xcc] sm:$0xf0] }
  0x46   : > { %731 = vmatpush.bf16.msra.mxu1 %v7086_v27  ;;  %v7234_v1 = vor.u32 %v10241_v60, %v7231_v62  ;;  %v10237_v2 = vld [vmem:[#allocation9 + $0xc4] sm:$0xf]  ;;  %v7215_v3 = vld [vmem:[#allocation9 + $0xd0] sm:$0xf0]  ;;  %v7357_v4 = vld [vmem:[#allocation9 + $0x1e0] sm:$0xf]  ;;  %v7214_v5 = vor.u32 %v10239_v0, %v7213_v63 }
  0x47   : > { %614 = vmatpush.bf16.msra.mxu0 %v10192_v26  ;;  %744 = vmatpush.bf16.msra.mxu2 %v7090_v28  ;;  %v10275_v6 = vld [vmem:[#allocation9 + $0x1ec] sm:$0xf0]  ;;  %v10273_v7 = vld [vmem:[#allocation9 + $0x1e4] sm:$0xf]  ;;  %v7359_v8 = vld [vmem:[#allocation9 + $0x1f0] sm:$0xf0]  ;;  %v7218_v9 = vor.u32 %v10237_v2, %v7215_v3 }
  0x48   : > { %1154 = vmatpush.bf16.msra.mxu3 %v7230_v61  ;;  %v7358_v10 = vor.u32 %v10275_v6, %v7357_v4  ;;  %v7362_v11 = vor.u32 %v10273_v7, %v7359_v8  ;;  %v7197_v12 = vld [vmem:[#allocation9 + $0xa0] sm:$0xf]  ;;  %v10235_v13 = vld [vmem:[#allocation9 + $0xac] sm:$0xf0]  ;;  %v10233_v14 = vld [vmem:[#allocation9 + $0xa4] sm:$0xf] }
  0x49   : > { %v7199_v15 = vld [vmem:[#allocation9 + $0xb0] sm:$0xf0]  ;;  %v7341_v16 = vld [vmem:[#allocation9 + $0x1c0] sm:$0xf]  ;;  %v10271_v17 = vld [vmem:[#allocation9 + $0x1cc] sm:$0xf0]  ;;  %v7198_v21 = vor.u32 %v10235_v13, %v7197_v12 }
  0x4a   : > { %732 = vmatpush.bf16.msra.mxu1 %v7078_v34  ;;  %v7342_v18 = vor.u32 %v10271_v17, %v7341_v16  ;;  %v10269_v19 = vld [vmem:[#allocation9 + $0x1c4] sm:$0xf]  ;;  %v7343_v20 = vld [vmem:[#allocation9 + $0x1d0] sm:$0xf0]  ;;  %v7181_v23 = vld [vmem:[#allocation9 + $0x80] sm:$0xf]  ;;  %v7202_v25 = vor.u32 %v10233_v14, %v7199_v15 }
  0x4b   : > { %615 = vmatpush.bf16.msra.mxu0 %v10191_v33  ;;  %745 = vmatpush.bf16.msra.mxu2 %v7082_v35  ;;  %v7346_v22 = vor.u32 %v10269_v19, %v7343_v20  ;;  %v10231_v24 = vld [vmem:[#allocation9 + $0x8c] sm:$0xf0]  ;;  %v7325_v26 = vld [vmem:[#allocation9 + $0x1a0] sm:$0xf]  ;;  %v10265_v28 = vld [vmem:[#allocation9 + $0x1a4] sm:$0xf] }
  0x4c   : > { %1155 = vmatpush.bf16.msra.mxu3 %v7214_v5  ;;  %v10267_v27 = vld [vmem:[#allocation9 + $0x1ac] sm:$0xf0]  ;;  %v10229_v29 = vld [vmem:[#allocation9 + $0x84] sm:$0xf]  ;;  %v7183_v30 = vld [vmem:[#allocation9 + $0x90] sm:$0xf0]  ;;  %v7182_v35 = vor.u32 %v10231_v24, %v7181_v23 }
  0x4d   : > { %v7327_v31 = vld [vmem:[#allocation9 + $0x1b0] sm:$0xf0]  ;;  %v7326_v32 = vor.u32 %v10267_v27, %v7325_v26  ;;  %v7309_v34 = vld [vmem:[#allocation9 + $0x180] sm:$0xf]  ;;  %v10263_v36 = vld [vmem:[#allocation9 + $0x18c] sm:$0xf0]  ;;  %v7186_v39 = vor.u32 %v10229_v29, %v7183_v30 }
  0x4e   : > { %733 = vmatpush.bf16.msra.mxu1 %v7070_v41  ;;  %v7330_v33 = vor.u32 %v10265_v28, %v7327_v31  ;;  %v10261_v37 = vld [vmem:[#allocation9 + $0x184] sm:$0xf]  ;;  %v7311_v38 = vld [vmem:[#allocation9 + $0x190] sm:$0xf0]  ;;  %v10227_v41 = vld [vmem:[#allocation9 + $0x6c] sm:$0xf0]  ;;  %v7310_v44 = vor.u32 %v10263_v36, %v7309_v34 }
  0x4f   : > { %616 = vmatpush.bf16.msra.mxu0 %v10190_v40  ;;  %746 = vmatpush.bf16.msra.mxu2 %v7074_v42  ;;  %v7165_v40 = vld [vmem:[#allocation9 + $0x60] sm:$0xf]  ;;  %v10225_v42 = vld [vmem:[#allocation9 + $0x64] sm:$0xf]  ;;  %v10259_v48 = vld [vmem:[#allocation9 + $0x16c] sm:$0xf0] }
  0x50   : > { %1156 = vmatpush.bf16.msra.mxu3 %v7198_v21  ;;  %v7293_v46 = vld [vmem:[#allocation9 + $0x160] sm:$0xf]  ;;  %v7166_v47 = vor.u32 %v10227_v41, %v7165_v40  ;;  %v7295_v50 = vld [vmem:[#allocation9 + $0x170] sm:$0xf0]  ;;  %v10223_v53 = vld [vmem:[#allocation9 + $0x4c] sm:$0xf0] }
  0x51   : > { %v7149_v52 = vld [vmem:[#allocation9 + $0x40] sm:$0xf]  ;;  %v10221_v54 = vld [vmem:[#allocation9 + $0x44] sm:$0xf]  ;;  %v7294_v56 = vor.u32 %v10259_v48, %v7293_v46  ;;  %v10255_v60 = vld [vmem:[#allocation9 + $0x14c] sm:$0xf0] }
  0x52   : > { %734 = vmatpush.bf16.msra.mxu1 %v7062_v49  ;;  %v10257_v49 = vld [vmem:[#allocation9 + $0x164] sm:$0xf]  ;;  %v7277_v58 = vld [vmem:[#allocation9 + $0x140] sm:$0xf]  ;;  %v7150_v59 = vor.u32 %v10223_v53, %v7149_v52  ;;  %v7279_v62 = vld [vmem:[#allocation9 + $0x150] sm:$0xf0] }
  0x53   : > { %617 = vmatpush.bf16.msra.mxu0 %v10189_v43  ;;  %747 = vmatpush.bf16.msra.mxu2 %v7066_v51  ;;  %v7167_v43 = vld [vmem:[#allocation9 + $0x70] sm:$0xf0]  ;;  %v10253_v61 = vld [vmem:[#allocation9 + $0x144] sm:$0xf]  ;;  %v11101_v63 = vld [vmem:[#allocation4] ss:$0 sm:$0xff]  ;;  %v7278_v5 = vor.u32 %v10255_v60, %v7277_v58 }
  0x54   : > { %1157 = vmatpush.bf16.msra.mxu3 %v7182_v35  ;;  %v7170_v51 = vor.u32 %v10225_v42, %v7167_v43  ;;  %v10219_v2 = vld [vmem:[#allocation9 + $0x2c] sm:$0xf0]  ;;  %v10217_v3 = vld [vmem:[#allocation9 + $0x24] sm:$0xf]  ;;  %v7135_v4 = vld [vmem:[#allocation9 + $0x30] sm:$0xf0]  ;;  %v7282_v6 = vor.u32 %v10253_v61, %v7279_v62 }
  0x55   : > { %v7261_v7 = vld [vmem:[#allocation9 + $0x120] sm:$0xf]  ;;  %v7263_v12 = vld [vmem:[#allocation9 + $0x130] sm:$0xf0]  ;;  %v7138_v14 = vor.u32 %v10217_v3, %v7135_v4  ;;  %v10215_v16 = vld [vmem:[#allocation9 + $0xc] sm:$0xf0] }
  0x56   : > { %618 = vmatmul.bf16.vlgmr.msra.gmra.mxu0 %v541_v45  ;;  %735 = vmatpush.bf16.msra.mxu1 %v7054_v55  ;;  %v7314_v45 = vor.u32 %v10261_v37, %v7311_v38  ;;  %v7151_v55 = vld [vmem:[#allocation9 + $0x50] sm:$0xf0]  ;;  %v7117_v15 = vld [vmem:[#allocation9] sm:$0xf]  ;;  %v10213_v17 = vld [vmem:[#allocation9 + $0x4] sm:$0xf] }
  0x57   : > { %748 = vmatpush.bf16.msra.mxu2 %v7058_v57  ;;  %1167 = vmatpush.bf16.msrb.mxu0 %v7358_v10  ;;  %v7298_v57 = vor.u32 %v10257_v49, %v7295_v50  ;;  %v7154_v0 = vor.u32 %v10221_v54, %v7151_v55  ;;  %v10251_v10 = vld [vmem:[#allocation9 + $0x12c] sm:$0xf0]  ;;  %v7237_v19 = vld [vmem:[#allocation9 + $0xe8] sm:$0xf]  ;;  %v10244_v21 = vld [vmem:[#allocation9 + $0xf4] sm:$0xf0] }
  0x58   : > { %1158 = vmatpush.bf16.msra.mxu3 %v7166_v47  ;;  %v7262_v23 = vor.u32 %v10251_v10, %v7261_v7  ;;  %v7239_v26 = vld [vmem:[#allocation9 + $0xf8] sm:$0xf0]  ;;  %v7245_v27 = vld [vmem:[#allocation9 + $0x100] sm:$0xf]  ;;  %v10247_v28 = vld [vmem:[#allocation9 + $0x10c] sm:$0xf0] }
  0x59   : > { %v10245_v30 = vld [vmem:[#allocation9 + $0x104] sm:$0xf]  ;;  %v7247_v31 = vld [vmem:[#allocation9 + $0x110] sm:$0xf0]  ;;  %v7221_v36 = vld [vmem:[#allocation9 + $0xc8] sm:$0xf]  ;;  %v7246_v38 = vor.u32 %v10247_v28, %v7245_v27 }
  0x5a   : > { %1180 = vmatpush.bf16.msrb.mxu1 %v7234_v1  ;;  %v7133_v1 = vld [vmem:[#allocation9 + $0x20] sm:$0xf]  ;;  %v10240_v37 = vld [vmem:[#allocation9 + $0xd4] sm:$0xf0]  ;;  %v10238_v40 = vld [vmem:[#allocation9 + $0xcc] sm:$0xf]  ;;  %v7250_v42 = vor.u32 %v10245_v30, %v7247_v31 }
  0x5b   : > { %1193 = vmatpush.bf16.msrb.mxu2 %v7362_v11  ;;  %1168 = vmatpush.bf16.msrb.mxu0 %v7342_v18  ;;  %v10249_v11 = vld [vmem:[#allocation9 + $0x124] sm:$0xf]  ;;  %v7119_v18 = vld [vmem:[#allocation9 + $0x10] sm:$0xf0]  ;;  %v7223_v41 = vld [vmem:[#allocation9 + $0xd8] sm:$0xf0]  ;;  %v7222_v43 = vor.u32 %v10240_v37, %v7221_v36 }
  0x5c   : > { %1159 = vmatpush.bf16.msra.mxu3 %v7150_v59  ;;  %v7266_v24 = vor.u32 %v10249_v11, %v7263_v12  ;;  %v10276_v46 = vld [vmem:[#allocation9 + $0x1f4] sm:$0xf0]  ;;  %v10274_v47 = vld [vmem:[#allocation9 + $0x1ec] sm:$0xf]  ;;  %v7367_v49 = vld [vmem:[#allocation9 + $0x1f8] sm:$0xf0] }
  0x5d   : > { %v7370_v50 = vor.u32 %v10274_v47, %v7367_v49  ;;  %v10236_v52 = vld [vmem:[#allocation9 + $0xb4] sm:$0xf0]  ;;  %v10234_v53 = vld [vmem:[#allocation9 + $0xac] sm:$0xf]  ;;  %v7207_v55 = vld [vmem:[#allocation9 + $0xb8] sm:$0xf0] }
  0x5e   : > { %1181 = vmatpush.bf16.msrb.mxu1 %v7218_v9  ;;  %v7134_v9 = vor.u32 %v10219_v2, %v7133_v1  ;;  %v10272_v58 = vld [vmem:[#allocation9 + $0x1d4] sm:$0xf0]  ;;  %v10270_v59 = vld [vmem:[#allocation9 + $0x1cc] sm:$0xf]  ;;  %v7351_v61 = vld [vmem:[#allocation9 + $0x1d8] sm:$0xf0] }
  0x5f   : > { %1194 = vmatpush.bf16.msrb.mxu2 %v7346_v22  ;;  %1169 = vmatpush.bf16.msrb.mxu0 %v7326_v32  ;;  %v10242_v22 = vld [vmem:[#allocation9 + $0xec] sm:$0xf]  ;;  %v7122_v32 = vor.u32 %v10213_v17, %v7119_v18  ;;  %v7354_v62 = vor.u32 %v10270_v59, %v7351_v61  ;;  %v7191_v3 = vld [vmem:[#allocation9 + $0x98] sm:$0xf0]  ;;  %v7173_v11 = vld [vmem:[#allocation9 + $0x68] sm:$0xf] }
  0x60   : > { %1160 = vmatpush.bf16.msra.mxu3 %v7134_v9  ;;  %v7242_v35 = vor.u32 %v10242_v22, %v7239_v26  ;;  %v10230_v1 = vld [vmem:[#allocation9 + $0x8c] sm:$0xf]  ;;  %v7335_v9 = vld [vmem:[#allocation9 + $0x1b8] sm:$0xf0]  ;;  %v10228_v12 = vld [vmem:[#allocation9 + $0x74] sm:$0xf0] }
  0x61   : > { %v7194_v4 = vor.u32 %v10230_v1, %v7191_v3  ;;  %v7317_v17 = vld [vmem:[#allocation9 + $0x188] sm:$0xf]  ;;  %v10264_v18 = vld [vmem:[#allocation9 + $0x194] sm:$0xf0]  ;;  %v7159_v27 = vld [vmem:[#allocation9 + $0x58] sm:$0xf0] }
  0x62   : > { %1182 = vmatpush.bf16.msrb.mxu1 %v7202_v25  ;;  %v7118_v25 = vor.u32 %v10215_v16, %v7117_v15  ;;  %v7175_v15 = vld [vmem:[#allocation9 + $0x78] sm:$0xf0]  ;;  %v10260_v30 = vld [vmem:[#allocation9 + $0x174] sm:$0xf0]  ;;  %v10258_v31 = vld [vmem:[#allocation9 + $0x16c] sm:$0xf] }
  0x63   : > { %1195 = vmatpush.bf16.msrb.mxu2 %v7330_v33  ;;  %1170 = vmatpush.bf16.msrb.mxu0 %v7310_v44  ;;  %v7238_v33 = vor.u32 %v10244_v21, %v7237_v19  ;;  %v7226_v44 = vor.u32 %v10238_v40, %v7223_v41  ;;  %v10262_v19 = vld [vmem:[#allocation9 + $0x18c] sm:$0xf]  ;;  %v7319_v21 = vld [vmem:[#allocation9 + $0x198] sm:$0xf0]  ;;  %v10220_v36 = vld [vmem:[#allocation9 + $0x34] sm:$0xf0] }
  0x64   : > { %1161 = vmatpush.bf16.msra.mxu3 %v7118_v25  ;;  %v7322_v22 = vor.u32 %v10262_v19, %v7319_v21  ;;  %v10222_v25 = vld [vmem:[#allocation9 + $0x4c] sm:$0xf]  ;;  %v7285_v40 = vld [vmem:[#allocation9 + $0x148] sm:$0xf]  ;;  %v10256_v41 = vld [vmem:[#allocation9 + $0x154] sm:$0xf0] }
  0x65   : > { %v7162_v28 = vor.u32 %v10222_v25, %v7159_v27  ;;  %v10218_v37 = vld [vmem:[#allocation9 + $0x2c] sm:$0xf]  ;;  %v7253_v59 = vld [vmem:[#allocation9 + $0x108] sm:$0xf]  ;;  %v8077_v19 = vld [vmem:[#allocation12 + $0x580] sm:$0xf] }
  0x66   : > { %1183 = vmatpush.bf16.msrb.mxu1 %v7186_v39  ;;  %v10214_v49 = vld [vmem:[#allocation9 + $0xc] sm:$0xf]  ;;  %v8365_v25 = vld [vmem:[#allocation12 + $0x7c0] sm:$0xf] }
  0x67   : > { %1196 = vmatpush.bf16.msrb.mxu2 %v7314_v45  ;;  %1171 = vmatpush.bf16.msrb.mxu0 %v7294_v56  ;;  %v7365_v45 = vld [vmem:[#allocation9 + $0x1e8] sm:$0xf]  ;;  %v7210_v56 = vor.u32 %v10234_v53, %v7207_v55  ;;  %v10250_v55 = vld [vmem:[#allocation9 + $0x12c] sm:$0xf] }
  0x68   : > { %1206 = vmatpush.bf16.msrb.mxu3 %v7238_v33  ;;  %v7366_v48 = vor.u32 %v10276_v46, %v7365_v45  ;;  %v7303_v33 = vld [vmem:[#allocation9 + $0x178] sm:$0xf0]  ;;  %v7125_v46 = vld [vmem:[#allocation9 + $0x8] sm:$0xf]  ;;  %v10246_v61 = vld [vmem:[#allocation9 + $0x10c] sm:$0xf] }
  0x69   : > { %v7287_v45 = vld [vmem:[#allocation9 + $0x158] sm:$0xf0]  ;;  %v7269_v53 = vld [vmem:[#allocation9 + $0x128] sm:$0xf] }
  0x6a   : > { %1184 = vmatpush.bf16.msrb.mxu1 %v7170_v51  ;;  %v7205_v51 = vld [vmem:[#allocation9 + $0xa8] sm:$0xf] }
  0x6b   : > { %1197 = vmatpush.bf16.msrb.mxu2 %v7298_v57  ;;  %1172 = vmatpush.bf16.msrb.mxu0 %v7278_v5  ;;  %v7206_v54 = vor.u32 %v10236_v52, %v7205_v51  ;;  %v7349_v57 = vld [vmem:[#allocation9 + $0x1c8] sm:$0xf] }
  0x6c   : > { %1207 = vmatpush.bf16.msrb.mxu3 %v7222_v43  ;;  %v7350_v60 = vor.u32 %v10272_v58, %v7349_v57  ;;  %v7333_v5 = vld [vmem:[#allocation9 + $0x1a8] sm:$0xf]  ;;  %v7286_v43 = vor.u32 %v10256_v41, %v7285_v40  ;;  %v7271_v57 = vld [vmem:[#allocation9 + $0x138] sm:$0xf0]  ;;  %v10521_v40 = vld [vmem:[#allocation12 + $0x79c] sm:$0xf0] }
  0x6d   : > { %v7274_v58 = vor.u32 %v10250_v55, %v7271_v57  ;;  %v7469_v55 = vld [vmem:[#allocation12 + $0xc0] sm:$0xf] }
  0x6e   : > { %1185 = vmatpush.bf16.msrb.mxu1 %v7154_v0  ;;  %v10232_v0 = vld [vmem:[#allocation9 + $0x94] sm:$0xf0]  ;;  %v10305_v57 = vld [vmem:[#allocation12 + $0xdc] sm:$0xf0] }
  0x6f   : > { %1198 = vmatpush.bf16.msrb.mxu2 %v7282_v6  ;;  %1173 = vmatpush.bf16.msrb.mxu0 %v7262_v23  ;;  %v10268_v6 = vld [vmem:[#allocation9 + $0x1b4] sm:$0xf0]  ;;  %v7157_v23 = vld [vmem:[#allocation9 + $0x48] sm:$0xf] }
  0x70   : > { %1208 = vmatpush.bf16.msrb.mxu3 %v7206_v54  ;;  %v7334_v7 = vor.u32 %v10268_v6, %v7333_v5  ;;  %v10252_v54 = vld [vmem:[#allocation9 + $0x134] sm:$0xf0] }
  0x72   : > { %1186 = vmatpush.bf16.msrb.mxu1 %v7138_v14  ;;  %v7174_v14 = vor.u32 %v10228_v12, %v7173_v11  ;;  %v10465_v11 = vld [vmem:[#allocation12 + $0x5dc] sm:$0xf0] }
  0x73   : > { %1199 = vmatpush.bf16.msrb.mxu2 %v7266_v24  ;;  %1174 = vmatpush.bf16.msrb.mxu0 %v7246_v38  ;;  %v10224_v24 = vld [vmem:[#allocation9 + $0x54] sm:$0xf0] }
  0x74   : > { %v7158_v26 = vor.u32 %v10224_v24, %v7157_v23  ;;  %v10401_v23 = vld [vmem:[#allocation12 + $0x3dc] sm:$0xf0] }
  0x76   : > { %1187 = vmatpush.bf16.msrb.mxu1 %v7122_v32 }
  0x77   : > { %1200 = vmatpush.bf16.msrb.mxu2 %v7250_v42  ;;  %1219 = vmatpush.bf16.msra.mxu0 %v7366_v48  ;;  %v10216_v48 = vld [vmem:[#allocation9 + $0x14] sm:$0xf0] }
  0x78   : > { %v7126_v51 = vor.u32 %v10216_v48, %v7125_v46  ;;  %v8013_v46 = vld [vmem:[#allocation12 + $0x500] sm:$0xf] }
  0x7b   : > { %1220 = vmatpush.bf16.msra.mxu0 %v7350_v60  ;;  %v10248_v60 = vld [vmem:[#allocation9 + $0x114] sm:$0xf0] }
  0x7f   : > { %1221 = vmatpush.bf16.msra.mxu0 %v7334_v7  ;;  %v7597_v7 = vld [vmem:[#allocation12 + $0x1c0] sm:$0xf] }
  0xd3   : > { %v619_v8 = vpop.f32.mrf.mxu0 }
  0xd4   : > { %v620_v13 = vadd.f32 %v11101_v63, %v619_v8  ;;  %v7189_v63 = vld [vmem:[#allocation9 + $0x88] sm:$0xf]  ;;  %v10266_v8 = vld [vmem:[#allocation9 + $0x1ac] sm:$0xf] }
  0xd5   : > { %v7190_v2 = vor.u32 %v10232_v0, %v7189_v63  ;;  %v7338_v10 = vor.u32 %v10266_v8, %v7335_v9  ;;  %v7254_v63 = vor.u32 %v10248_v60, %v7253_v59  ;;  %v7255_v0 = vld [vmem:[#allocation9 + $0x118] sm:$0xf0]  ;;  %v10337_v8 = vld [vmem:[#allocation12 + $0x1dc] sm:$0xf0] }
  0xd6   : > { %v623_v20 = vmul.f32 0.2, %v620_v13  ;;  %v7258_v1 = vor.u32 %v10246_v61, %v7255_v0  ;;  %v10433_v59 = vld [vmem:[#allocation12 + $0x4dc] sm:$0xf0] }
  0xd7   : > { %1209 = vmatpush.bf16.msrb.mxu3 %v7190_v2  ;;  %v7757_v61 = vld [vmem:[#allocation12 + $0x300] sm:$0xf] }
  0xd8   : > { %v624_v29 = vmax.f32 %v620_v13, %v623_v20  ;;  %v10226_v13 = vld [vmem:[#allocation9 + $0x6c] sm:$0xf]  ;;  %v7318_v20 = vor.u32 %v10264_v18, %v7317_v17  ;;  %v10329_v18 = vld [vmem:[#allocation12 + $0x19c] sm:$0xf0] }
  0xd9   : > { %v7178_v16 = vor.u32 %v10226_v13, %v7175_v15  ;;  %v7598_v13 = vor.u32 %v10337_v8, %v7597_v7  ;;  %v8269_v0 = vld [vmem:[#allocation12 + $0x700] sm:$0xf] }
  0xda   : > { %v625_v34 = vpack.c.bf16 %v624_v29, %v624_v29  ;;  %1222 = vmatpush.bf16.msra.mxu0 %v7318_v20  ;;  %v7301_v29 = vld [vmem:[#allocation9 + $0x168] sm:$0xf]  ;;  %v10457_v20 = vld [vmem:[#allocation12 + $0x59c] sm:$0xf0] }
  0xdb   : > { %v621_v39 = vpop.f32.mrf.mxu0  ;;  %1210 = vmatpush.bf16.msrb.mxu3 %v7174_v14  ;;  %v7302_v32 = vor.u32 %v10260_v30, %v7301_v29  ;;  %v7565_v14 = vld [vmem:[#allocation12 + $0x180] sm:$0xf]  ;;  %v8078_v29 = vor.u32 %v10457_v20, %v8077_v19 }
  0xdc   : > { %736 = vmatmul.bf16.vlgmr.msra.gmra.mxu1 %v625_v34  ;;  %749 = vmatmul.bf16.vlgmr.msra.gmra.mxu2 %v625_v34  ;;  %v7306_v34 = vor.u32 %v10258_v31, %v7303_v33  ;;  %v7143_v39 = vld [vmem:[#allocation9 + $0x38] sm:$0xf0]  ;;  %v7566_v27 = vor.u32 %v10329_v18, %v7565_v14  ;;  %v10321_v31 = vld [vmem:[#allocation12 + $0x15c] sm:$0xf0] }
  0xdd   : > { %1232 = vmatpush.bf16.msra.mxu1 %v7242_v35  ;;  %1245 = vmatpush.bf16.msra.mxu2 %v7370_v50  ;;  %v7141_v35 = vld [vmem:[#allocation9 + $0x28] sm:$0xf]  ;;  %v7146_v42 = vor.u32 %v10218_v37, %v7143_v39  ;;  %v7127_v50 = vld [vmem:[#allocation9 + $0x18] sm:$0xf0]  ;;  %v10449_v33 = vld [vmem:[#allocation12 + $0x55c] sm:$0xf0] }
  0xde   : > { %1223 = vmatpush.bf16.msra.mxu0 %v7302_v32  ;;  %v7142_v38 = vor.u32 %v10220_v36, %v7141_v35  ;;  %v7130_v52 = vor.u32 %v10214_v49, %v7127_v50  ;;  %v8045_v32 = vld [vmem:[#allocation12 + $0x540] sm:$0xf] }
  0xdf   : > { %1211 = vmatpush.bf16.msrb.mxu3 %v7158_v26  ;;  %v10529_v26 = vld [vmem:[#allocation12 + $0x7dc] sm:$0xf0] }
  0xe0   : > { %v7821_v35 = vld [vmem:[#allocation12 + $0x380] sm:$0xf]  ;;  %v8366_v36 = vor.u32 %v10529_v26, %v8365_v25 }
  0xe1   : > { %1233 = vmatpush.bf16.msra.mxu1 %v7226_v44  ;;  %1246 = vmatpush.bf16.msra.mxu2 %v7354_v62  ;;  %v10254_v44 = vld [vmem:[#allocation9 + $0x14c] sm:$0xf]  ;;  %v642_v62 = vld [vmem:[#allocation7] sm:$0x3]  ;;  %v8333_v39 = vld [vmem:[#allocation12 + $0x780] sm:$0xf] }
  0xe2   : > { %v7290_v47 = vor.u32 %v10254_v44, %v7287_v45  ;;  %1224 = vmatpush.bf16.msra.mxu0 %v7286_v43  ;;  %v644_v2 = vperm.slane %v642_v62, 0  ;;  %v645_v5 = vperm.slane %v642_v62, 1  ;;  %v7501_v43 = vld [vmem:[#allocation12 + $0x100] sm:$0xf]  ;;  %v8046_v44 = vor.u32 %v10449_v33, %v8045_v32  ;;  %v7599_v32 = vld [vmem:[#allocation12 + $0x1e0] sm:$0xf0] }
  0xe3   : > { %1212 = vmatpush.bf16.msrb.mxu3 %v7142_v38  ;;  %v10393_v38 = vld [vmem:[#allocation12 + $0x39c] sm:$0xf0]  ;;  %v8334_v50 = vor.u32 %v10521_v40, %v8333_v39  ;;  %v10325_v40 = vld [vmem:[#allocation12 + $0x184] sm:$0xf] }
  0xe4   : > { %v10313_v45 = vld [vmem:[#allocation12 + $0x11c] sm:$0xf0]  ;;  %v7822_v48 = vor.u32 %v10393_v38, %v7821_v35 }
  0xe5   : > { %1234 = vmatpush.bf16.msra.mxu1 %v7210_v56  ;;  %1247 = vmatpush.bf16.msra.mxu2 %v7338_v10  ;;  %v7270_v56 = vor.u32 %v10252_v54, %v7269_v53  ;;  %v8109_v10 = vld [vmem:[#allocation12 + $0x5c0] sm:$0xf]  ;;  %v7502_v54 = vor.u32 %v10313_v45, %v7501_v43  ;;  %v10397_v43 = vld [vmem:[#allocation12 + $0x3c4] sm:$0xf] }
  0xe6   : > { %v8110_v15 = vor.u32 %v10465_v11, %v8109_v10  ;;  %v7789_v49 = vld [vmem:[#allocation12 + $0x340] sm:$0xf] }
  0xe7   : > { %1213 = vmatpush.bf16.msrb.mxu3 %v7126_v51  ;;  %1225 = vmatpush.bf16.msra.mxu0 %v7270_v56  ;;  %v10385_v51 = vld [vmem:[#allocation12 + $0x35c] sm:$0xf0] }
  0xe8   : > { %v10513_v53 = vld [vmem:[#allocation12 + $0x75c] sm:$0xf0]  ;;  %v7790_v60 = vor.u32 %v10385_v51, %v7789_v49  ;;  %v7823_v51 = vld [vmem:[#allocation12 + $0x3a0] sm:$0xf0] }
  0xe9   : > { %1235 = vmatpush.bf16.msra.mxu1 %v7194_v4  ;;  %1248 = vmatpush.bf16.msra.mxu2 %v7322_v22  ;;  %v7853_v22 = vld [vmem:[#allocation12 + $0x3c0] sm:$0xf] }
  0xea   : > { %v10425_v7 = vld [vmem:[#allocation12 + $0x49c] sm:$0xf0] }
  0xeb   : > { %1226 = vmatpush.bf16.msra.mxu0 %v7254_v63  ;;  %v10377_v63 = vld [vmem:[#allocation12 + $0x31c] sm:$0xf0] }
  0xec   : > { %v7758_v8 = vor.u32 %v10377_v63, %v7757_v61  ;;  %v10369_v11 = vld [vmem:[#allocation12 + $0x2dc] sm:$0xf0] }
  0xed   : > { %1236 = vmatpush.bf16.msra.mxu1 %v7178_v16  ;;  %1249 = vmatpush.bf16.msra.mxu2 %v7306_v34  ;;  %v7854_v34 = vor.u32 %v10401_v23, %v7853_v22  ;;  %v10289_v18 = vld [vmem:[#allocation12 + $0x5c] sm:$0xf0] }
  0xee   : > { %v7917_v19 = vld [vmem:[#allocation12 + $0x440] sm:$0xf] }
  0xef   : > { %v10417_v20 = vld [vmem:[#allocation12 + $0x45c] sm:$0xf0] }
  0xf0   : > { %v7693_v22 = vld [vmem:[#allocation12 + $0x280] sm:$0xf] }
  0xf1   : > { %1237 = vmatpush.bf16.msra.mxu1 %v7162_v28  ;;  %1250 = vmatpush.bf16.msra.mxu2 %v7290_v47  ;;  %v7533_v28 = vld [vmem:[#allocation12 + $0x140] sm:$0xf] }
  0xf2   : > { %v10441_v47 = vld [vmem:[#allocation12 + $0x51c] sm:$0xf0] }
  0xf3   : > { %v8014_v56 = vor.u32 %v10441_v47, %v8013_v46  ;;  %v8205_v25 = vld [vmem:[#allocation12 + $0x680] sm:$0xf]  ;;  %v10317_v47 = vld [vmem:[#allocation12 + $0x144] sm:$0xf] }
  0xf4   : > { %v10489_v26 = vld [vmem:[#allocation12 + $0x69c] sm:$0xf0] }
  0xf5   : > { %1238 = vmatpush.bf16.msra.mxu1 %v7146_v42  ;;  %1251 = vmatpush.bf16.msra.mxu2 %v7274_v58  ;;  %v7534_v42 = vor.u32 %v10321_v31, %v7533_v28  ;;  %v7981_v58 = vld [vmem:[#allocation12 + $0x4c0] sm:$0xf]  ;;  %v10333_v31 = vld [vmem:[#allocation12 + $0x1c4] sm:$0xf]  ;;  %v8206_v33 = vor.u32 %v10489_v26, %v8205_v25 }
  0xf6   : > { %v7373_v28 = vld [vmem:[#allocation12] sm:$0xf]  ;;  %v7602_v38 = vor.u32 %v10333_v31, %v7599_v32  ;;  %v8367_v25 = vld [vmem:[#allocation12 + $0x7e0] sm:$0xf0] }
  0xf7   : > { %v10353_v35 = vld [vmem:[#allocation12 + $0x25c] sm:$0xf0]  ;;  %v10445_v31 = vld [vmem:[#allocation12 + $0x544] sm:$0xf] }
  0xf8   : > { %v10409_v61 = vld [vmem:[#allocation12 + $0x41c] sm:$0xf0]  ;;  %v8047_v32 = vld [vmem:[#allocation12 + $0x560] sm:$0xf0] }
  0xf9   : > { %1239 = vmatpush.bf16.msra.mxu1 %v7130_v52  ;;  %1252 = vmatpush.bf16.msra.mxu2 %v7258_v1  ;;  %v8301_v52 = vld [vmem:[#allocation12 + $0x740] sm:$0xf] }
  0xfa   : > { %v8302_v62 = vor.u32 %v10513_v53, %v8301_v52  ;;  %v10505_v1 = vld [vmem:[#allocation12 + $0x71c] sm:$0xf0] }
  0xfb   : > { %v8270_v10 = vor.u32 %v10505_v1, %v8269_v0  ;;  %v10481_v0 = vld [vmem:[#allocation12 + $0x65c] sm:$0xf0]  ;;  %v10301_v1 = vld [vmem:[#allocation12 + $0xc4] sm:$0xf] }
 0x159   : > { %v737_v3 = vpop.f32.mrf.mxu1 }
 0x15a   : > { %v738_v4 = vadd.f32 %v737_v3, %v644_v2  ;;  %v7470_v2 = vor.u32 %v10305_v57, %v7469_v55  ;;  %v7437_v3 = vld [vmem:[#allocation12 + $0x80] sm:$0xf]  ;;  %v7503_v55 = vld [vmem:[#allocation12 + $0x120] sm:$0xf0] }
 0x15c   : > { %v754_v6 = vmul.f32 0.2, %v738_v4 }
 0x15e   : > { %v756_v9 = vmax.f32 %v738_v4, %v754_v6  ;;  %v7982_v4 = vor.u32 %v10433_v59, %v7981_v58  ;;  %v7949_v6 = vld [vmem:[#allocation12 + $0x480] sm:$0xf]  ;;  %v7791_v58 = vld [vmem:[#allocation12 + $0x360] sm:$0xf0] }
 0x15f   : > { %v750_v12 = vpop.f32.mrf.mxu2 }
 0x160   : > { %v11638_v16 = vpack.c.bf16 %v756_v9, %v756_v9  ;;  %v751_v17 = vadd.f32 %v750_v12, %v645_v5  ;;  %v10297_v5 = vld [vmem:[#allocation12 + $0x9c] sm:$0xf0] }
 0x161   : > { %v739_v21 = vpop.f32.mrf.mxu1  ;;  %v7725_v9 = vld [vmem:[#allocation12 + $0x2c0] sm:$0xf]  ;;  %v7438_v14 = vor.u32 %v10297_v5, %v7437_v3  ;;  %v10373_v5 = vld [vmem:[#allocation12 + $0x304] sm:$0xf] }
 0x162   : > { %v755_v24 = vmul.f32 0.2, %v751_v17  ;;  %1162 = vmatmul.bf16.vlgmr.msra.gmra.mxu3 %v11638_v16  ;;  %1188 = vmatmul.bf16.vlgmr.msrb.gmra.mxu1 %v11638_v16  ;;  %v8237_v12 = vld [vmem:[#allocation12 + $0x6c0] sm:$0xf]  ;;  %v7726_v21 = vor.u32 %v10369_v11, %v7725_v9  ;;  %v8111_v9 = vld [vmem:[#allocation12 + $0x5e0] sm:$0xf0] }
 0x163   : > { %2824 = vmatpush.bf16.msra.mxu3 %v7598_v13  ;;  %2850 = vmatpush.bf16.msrb.mxu1 %v8110_v15  ;;  %v10497_v13 = vld [vmem:[#allocation12 + $0x6dc] sm:$0xf0] }
 0x164   : > { %v757_v30 = vmax.f32 %v751_v17, %v755_v24  ;;  %v7405_v15 = vld [vmem:[#allocation12 + $0x40] sm:$0xf]  ;;  %v7950_v17 = vor.u32 %v10425_v7, %v7949_v6  ;;  %v8238_v23 = vor.u32 %v10497_v13, %v8237_v12  ;;  %v7759_v6 = vld [vmem:[#allocation12 + $0x320] sm:$0xf0] }
 0x165   : > { %v10361_v24 = vld [vmem:[#allocation12 + $0x29c] sm:$0xf0]  ;;  %v10461_v7 = vld [vmem:[#allocation12 + $0x5c4] sm:$0xf] }
 0x166   : > { %v11642_v37 = vpack.c.bf16 %v757_v30, %v757_v30  ;;  %v7694_v30 = vor.u32 %v10361_v24, %v7693_v22  ;;  %v8141_v11 = vld [vmem:[#allocation12 + $0x600] sm:$0xf]  ;;  %v10525_v24 = vld [vmem:[#allocation12 + $0x7c4] sm:$0xf] }
 0x167   : > { %v752_v41 = vpop.f32.mrf.mxu2  ;;  %2825 = vmatpush.bf16.msra.mxu3 %v7566_v27  ;;  %2851 = vmatpush.bf16.msrb.mxu1 %v8078_v29  ;;  %v7918_v27 = vor.u32 %v10417_v20, %v7917_v19  ;;  %v10281_v29 = vld [vmem:[#allocation12 + $0x1c] sm:$0xf0]  ;;  %v7727_v19 = vld [vmem:[#allocation12 + $0x2e0] sm:$0xf0]  ;;  %v8370_v26 = vor.u32 %v10525_v24, %v8367_v25 }
 0x168   : > { %1175 = vmatmul.bf16.vlgmr.msrb.gmra.mxu0 %v11642_v37  ;;  %1201 = vmatmul.bf16.vlgmr.msrb.gmra.mxu2 %v11642_v37  ;;  %v7567_v41 = vld [vmem:[#allocation12 + $0x1a0] sm:$0xf0]  ;;  %v10473_v12 = vld [vmem:[#allocation12 + $0x61c] sm:$0xf0] }
 0x169   : > { %2837 = vmatpush.bf16.msrb.mxu0 %v7854_v34  ;;  %2863 = vmatpush.bf16.msrb.mxu2 %v8366_v36  ;;  %v7661_v34 = vld [vmem:[#allocation12 + $0x240] sm:$0xf]  ;;  %v7374_v36 = vor.u32 %v10281_v29, %v7373_v28  ;;  %v7570_v45 = vor.u32 %v10325_v40, %v7567_v41  ;;  %v8142_v13 = vor.u32 %v10473_v12, %v8141_v11  ;;  %v10453_v20 = vld [vmem:[#allocation12 + $0x584] sm:$0xf] }
 0x16a   : > { %v7662_v39 = vor.u32 %v10353_v35, %v7661_v34  ;;  %v10357_v28 = vld [vmem:[#allocation12 + $0x284] sm:$0xf]  ;;  %v8050_v34 = vor.u32 %v10445_v31, %v8047_v32 }
 0x16b   : > { %2826 = vmatpush.bf16.msra.mxu3 %v7534_v42  ;;  %2852 = vmatpush.bf16.msrb.mxu1 %v8046_v44  ;;  %v10345_v42 = vld [vmem:[#allocation12 + $0x21c] sm:$0xf0]  ;;  %v7855_v44 = vld [vmem:[#allocation12 + $0x3e0] sm:$0xf0] }
 0x16c   : > { %v7858_v49 = vor.u32 %v10397_v43, %v7855_v44  ;;  %v10517_v35 = vld [vmem:[#allocation12 + $0x784] sm:$0xf] }
 0x16d   : > { %2838 = vmatpush.bf16.msrb.mxu0 %v7822_v48  ;;  %2864 = vmatpush.bf16.msrb.mxu2 %v8334_v50  ;;  %v7535_v48 = vld [vmem:[#allocation12 + $0x160] sm:$0xf0] }
 0x16e   : > { %v10389_v50 = vld [vmem:[#allocation12 + $0x384] sm:$0xf]  ;;  %v7538_v52 = vor.u32 %v10317_v47, %v7535_v48 }
 0x16f   : > { %2827 = vmatpush.bf16.msra.mxu3 %v7502_v54  ;;  %2853 = vmatpush.bf16.msrb.mxu1 %v8014_v56  ;;  %v7826_v53 = vor.u32 %v10389_v50, %v7823_v51  ;;  %v10309_v54 = vld [vmem:[#allocation12 + $0x104] sm:$0xf] }
 0x170   : > { %v10381_v56 = vld [vmem:[#allocation12 + $0x344] sm:$0xf]  ;;  %v7506_v57 = vor.u32 %v10309_v54, %v7503_v55 }
 0x171   : > { %2839 = vmatpush.bf16.msrb.mxu0 %v7790_v60  ;;  %2865 = vmatpush.bf16.msrb.mxu2 %v8302_v62  ;;  %v7794_v59 = vor.u32 %v10381_v56, %v7791_v58  ;;  %v7885_v60 = vld [vmem:[#allocation12 + $0x400] sm:$0xf]  ;;  %v7375_v40 = vld [vmem:[#allocation12 + $0x20] sm:$0xf0] }
 0x172   : > { %1214 = vmatmul.bf16.vlgmr.msrb.gmra.mxu3 %v11638_v16  ;;  %1240 = vmatmul.bf16.vlgmr.msra.gmra.mxu1 %v11638_v16  ;;  %v7406_v16 = vor.u32 %v10289_v18, %v7405_v15  ;;  %v8173_v62 = vld [vmem:[#allocation12 + $0x640] sm:$0xf]  ;;  %v7886_v63 = vor.u32 %v10409_v61, %v7885_v60  ;;  %v7439_v15 = vld [vmem:[#allocation12 + $0xa0] sm:$0xf0] }
 0x173   : > { %2828 = vmatpush.bf16.msra.mxu3 %v7470_v2  ;;  %2854 = vmatpush.bf16.msrb.mxu1 %v7982_v4  ;;  %v7471_v2 = vld [vmem:[#allocation12 + $0xe0] sm:$0xf0]  ;;  %v8174_v3 = vor.u32 %v10481_v0, %v8173_v62 }
 0x174   : > { %v7474_v4 = vor.u32 %v10301_v1, %v7471_v2  ;;  %v10349_v41 = vld [vmem:[#allocation12 + $0x244] sm:$0xf] }
 0x175   : > { %2840 = vmatpush.bf16.msrb.mxu0 %v7758_v8  ;;  %2866 = vmatpush.bf16.msrb.mxu2 %v8270_v10  ;;  %v7762_v8 = vor.u32 %v10373_v5, %v7759_v6  ;;  %v8114_v10 = vor.u32 %v10461_v7, %v8111_v9  ;;  %v10437_v43 = vld [vmem:[#allocation12 + $0x504] sm:$0xf] }
 0x176   : > { %v8015_v44 = vld [vmem:[#allocation12 + $0x520] sm:$0xf0] }
 0x177   : > { %2829 = vmatpush.bf16.msra.mxu3 %v7438_v14  ;;  %2855 = vmatpush.bf16.msrb.mxu1 %v7950_v17  ;;  %v10293_v14 = vld [vmem:[#allocation12 + $0x84] sm:$0xf] }
 0x178   : > { %1227 = vmatmul.bf16.vlgmr.msra.gmra.mxu0 %v11642_v37  ;;  %1253 = vmatmul.bf16.vlgmr.msra.gmra.mxu2 %v11642_v37  ;;  %v7629_v37 = vld [vmem:[#allocation12 + $0x200] sm:$0xf]  ;;  %v10365_v17 = vld [vmem:[#allocation12 + $0x2c4] sm:$0xf]  ;;  %v7442_v18 = vor.u32 %v10293_v14, %v7439_v15  ;;  %v11650_v14 = vld [vmem:[#allocation10] sm:$0xf] }
 0x179   : > { %2841 = vmatpush.bf16.msrb.mxu0 %v7726_v21  ;;  %2867 = vmatpush.bf16.msrb.mxu2 %v8238_v23  ;;  %v7630_v46 = vor.u32 %v10345_v42, %v7629_v37  ;;  %v8079_v21 = vld [vmem:[#allocation12 + $0x5a0] sm:$0xf0]  ;;  %v7730_v22 = vor.u32 %v10365_v17, %v7727_v19  ;;  %v826_v15 = vperm.slane %v11650_v14, 0 }
 0x17a   : > { %v8082_v23 = vor.u32 %v10453_v20, %v8079_v21  ;;  %v7663_v42 = vld [vmem:[#allocation12 + $0x260] sm:$0xf0] }
 0x17b   : > { %2830 = vmatpush.bf16.msra.mxu3 %v7406_v16  ;;  %2856 = vmatpush.bf16.msrb.mxu1 %v7918_v27  ;;  %v10285_v16 = vld [vmem:[#allocation12 + $0x44] sm:$0xf] }
 0x17c   : > { %v7407_v27 = vld [vmem:[#allocation12 + $0x60] sm:$0xf0] }
 0x17d   : > { %2842 = vmatpush.bf16.msrb.mxu0 %v7694_v30  ;;  %2868 = vmatpush.bf16.msrb.mxu2 %v8206_v33  ;;  %v7410_v29 = vor.u32 %v10285_v16, %v7407_v27  ;;  %v7695_v30 = vld [vmem:[#allocation12 + $0x2a0] sm:$0xf0]  ;;  %v7605_v27 = vld [vmem:[#allocation12 + $0x1c8] sm:$0xf] }
 0x17e   : > { %v7698_v33 = vor.u32 %v10357_v28, %v7695_v30  ;;  %v10509_v47 = vld [vmem:[#allocation12 + $0x744] sm:$0xf]  ;;  %v10338_v28 = vld [vmem:[#allocation12 + $0x1e4] sm:$0xf0] }
 0x17f   : > { %2831 = vmatpush.bf16.msra.mxu3 %v7374_v36  ;;  %2857 = vmatpush.bf16.msrb.mxu1 %v7886_v63  ;;  %v8335_v36 = vld [vmem:[#allocation12 + $0x7a0] sm:$0xf0] }
 0x180   : > { %v8303_v48 = vld [vmem:[#allocation12 + $0x760] sm:$0xf0] }
 0x181   : > { %2843 = vmatpush.bf16.msrb.mxu0 %v7662_v39  ;;  %2869 = vmatpush.bf16.msrb.mxu2 %v8174_v3  ;;  %v10277_v39 = vld [vmem:[#allocation12 + $0x4] sm:$0xf] }
 0x182   : > { %v7378_v37 = vor.u32 %v10277_v39, %v7375_v40  ;;  %v10341_v50 = vld [vmem:[#allocation12 + $0x204] sm:$0xf]  ;;  %v7861_v40 = vld [vmem:[#allocation12 + $0x3c8] sm:$0xf] }
 0x183   : > { %2876 = vmatpush.bf16.msrb.mxu3 %v7602_v38  ;;  %2902 = vmatpush.bf16.msra.mxu1 %v8114_v10  ;;  %v8338_v38 = vor.u32 %v10517_v35, %v8335_v36  ;;  %v7631_v51 = vld [vmem:[#allocation12 + $0x220] sm:$0xf0]  ;;  %v7573_v35 = vld [vmem:[#allocation12 + $0x188] sm:$0xf] }
 0x184   : > { %v7983_v54 = vld [vmem:[#allocation12 + $0x4e0] sm:$0xf0]  ;;  %v10330_v36 = vld [vmem:[#allocation12 + $0x1a4] sm:$0xf0] }
 0x185   : > { %2844 = vmatpush.bf16.msrb.mxu0 %v7630_v46  ;;  %2870 = vmatpush.bf16.msrb.mxu2 %v8142_v13  ;;  %v8018_v46 = vor.u32 %v10437_v43, %v8015_v44  ;;  %v10501_v55 = vld [vmem:[#allocation12 + $0x704] sm:$0xf]  ;;  %v7574_v43 = vor.u32 %v10330_v36, %v7573_v35  ;;  %v7701_v36 = vld [vmem:[#allocation12 + $0x288] sm:$0xf] }
 0x186   : > { %v8271_v56 = vld [vmem:[#allocation12 + $0x720] sm:$0xf0] }
 0x187   : > { %2877 = vmatpush.bf16.msrb.mxu3 %v7570_v45  ;;  %2903 = vmatpush.bf16.msra.mxu1 %v8082_v23  ;;  %v7666_v45 = vor.u32 %v10349_v41, %v7663_v42  ;;  %v8274_v58 = vor.u32 %v10501_v55, %v8271_v56  ;;  %v7951_v60 = vld [vmem:[#allocation12 + $0x4a0] sm:$0xf0]  ;;  %v10402_v41 = vld [vmem:[#allocation12 + $0x3e4] sm:$0xf0] }
 0x188   : > { %v10493_v62 = vld [vmem:[#allocation12 + $0x6c4] sm:$0xf]  ;;  %v7862_v44 = vor.u32 %v10402_v41, %v7861_v40  ;;  %v8053_v40 = vld [vmem:[#allocation12 + $0x548] sm:$0xf] }
 0x189   : > { %2889 = vmatpush.bf16.msra.mxu0 %v7858_v49  ;;  %2915 = vmatpush.bf16.msra.mxu2 %v8370_v26  ;;  %v8306_v49 = vor.u32 %v10509_v47, %v8303_v48  ;;  %v8239_v63 = vld [vmem:[#allocation12 + $0x6e0] sm:$0xf0]  ;;  %v10322_v48 = vld [vmem:[#allocation12 + $0x164] sm:$0xf0] }
 0x18a   : > { %v8242_v0 = vor.u32 %v10493_v62, %v8239_v63  ;;  %v10413_v1 = vld [vmem:[#allocation12 + $0x444] sm:$0xf] }
 0x18b   : > { %2878 = vmatpush.bf16.msrb.mxu3 %v7538_v52  ;;  %2904 = vmatpush.bf16.msra.mxu1 %v8050_v34  ;;  %v10429_v52 = vld [vmem:[#allocation12 + $0x4c4] sm:$0xf]  ;;  %v7606_v34 = vor.u32 %v10338_v28, %v7605_v27  ;;  %v10530_v27 = vld [vmem:[#allocation12 + $0x7e4] sm:$0xf0] }
 0x18c   : > { %v7919_v2 = vld [vmem:[#allocation12 + $0x460] sm:$0xf0] }
 0x18d   : > { %2890 = vmatpush.bf16.msra.mxu0 %v7826_v53  ;;  %2916 = vmatpush.bf16.msra.mxu2 %v8338_v38  ;;  %v7634_v53 = vor.u32 %v10341_v50, %v7631_v51  ;;  %v10485_v3 = vld [vmem:[#allocation12 + $0x684] sm:$0xf]  ;;  %v10394_v50 = vld [vmem:[#allocation12 + $0x3a4] sm:$0xf0] }
 0x18e   : > { %v8207_v5 = vld [vmem:[#allocation12 + $0x6a0] sm:$0xf0] }
 0x18f   : > { %2879 = vmatpush.bf16.msrb.mxu3 %v7506_v57  ;;  %2905 = vmatpush.bf16.msra.mxu1 %v8018_v46  ;;  %v7986_v57 = vor.u32 %v10429_v52, %v7983_v54  ;;  %v8210_v6 = vor.u32 %v10485_v3, %v8207_v5  ;;  %v10405_v7 = vld [vmem:[#allocation12 + $0x404] sm:$0xf]  ;;  %v7541_v46 = vld [vmem:[#allocation12 + $0x148] sm:$0xf]  ;;  %v829_v52 = vperm.slane %v11650_v14, 3 }
 0x190   : > { %v10477_v9 = vld [vmem:[#allocation12 + $0x644] sm:$0xf]  ;;  %v7542_v55 = vor.u32 %v10322_v48, %v7541_v46  ;;  %v10306_v3 = vld [vmem:[#allocation12 + $0xe4] sm:$0xf0] }
 0x191   : > { %2891 = vmatpush.bf16.msra.mxu0 %v7794_v59  ;;  %2917 = vmatpush.bf16.msra.mxu2 %v8306_v49  ;;  %v10421_v59 = vld [vmem:[#allocation12 + $0x484] sm:$0xf]  ;;  %v7829_v49 = vld [vmem:[#allocation12 + $0x388] sm:$0xf] }
 0x192   : > { %v7954_v61 = vor.u32 %v10421_v59, %v7951_v60  ;;  %v8175_v11 = vld [vmem:[#allocation12 + $0x660] sm:$0xf0]  ;;  %v7830_v56 = vor.u32 %v10394_v50, %v7829_v49  ;;  %v10314_v59 = vld [vmem:[#allocation12 + $0x124] sm:$0xf0] }
 0x193   : > { %2880 = vmatpush.bf16.msrb.mxu3 %v7474_v4  ;;  %2906 = vmatpush.bf16.msra.mxu1 %v7986_v57  ;;  %v7922_v4 = vor.u32 %v10413_v1, %v7919_v2  ;;  %v8178_v13 = vor.u32 %v10477_v9, %v8175_v11  ;;  %v10469_v17 = vld [vmem:[#allocation12 + $0x604] sm:$0xf]  ;;  %v7509_v57 = vld [vmem:[#allocation12 + $0x108] sm:$0xf] }
 0x194   : > { %v7797_v60 = vld [vmem:[#allocation12 + $0x348] sm:$0xf] }
 0x195   : > { %2892 = vmatpush.bf16.msra.mxu0 %v7762_v8  ;;  %2918 = vmatpush.bf16.msra.mxu2 %v8274_v58  ;;  %v7887_v8 = vld [vmem:[#allocation12 + $0x420] sm:$0xf0]  ;;  %v7477_v2 = vld [vmem:[#allocation12 + $0xc8] sm:$0xf] }
 0x196   : > { %v7890_v10 = vor.u32 %v10405_v7, %v7887_v8  ;;  %v10378_v7 = vld [vmem:[#allocation12 + $0x324] sm:$0xf0] }
 0x197   : > { %2881 = vmatpush.bf16.msrb.mxu3 %v7442_v18  ;;  %2907 = vmatpush.bf16.msra.mxu1 %v7954_v61  ;;  %v8143_v18 = vld [vmem:[#allocation12 + $0x620] sm:$0xf0]  ;;  %v10386_v61 = vld [vmem:[#allocation12 + $0x364] sm:$0xf0] }
 0x198   : > { %v8146_v19 = vor.u32 %v10469_v17, %v8143_v18  ;;  %v7798_v1 = vor.u32 %v10386_v61, %v7797_v60  ;;  %v8117_v9 = vld [vmem:[#allocation12 + $0x5c8] sm:$0xf] }
 0x199   : > { %2893 = vmatpush.bf16.msra.mxu0 %v7730_v22  ;;  %2919 = vmatpush.bf16.msra.mxu2 %v8242_v0  ;;  %v827_v22 = vperm.slane %v11650_v14, 1  ;;  %v7510_v0 = vor.u32 %v10314_v59, %v7509_v57  ;;  %v7445_v18 = vld [vmem:[#allocation12 + $0x88] sm:$0xf]  ;;  %v10334_v57 = vld [vmem:[#allocation12 + $0x1cc] sm:$0xf] }
 0x19a   : > { %v7381_v46 = vld [vmem:[#allocation12 + $0x8] sm:$0xf] }
 0x19b   : > { %2882 = vmatpush.bf16.msrb.mxu3 %v7410_v29  ;;  %2908 = vmatpush.bf16.msra.mxu1 %v7922_v4  ;;  %v10282_v48 = vld [vmem:[#allocation12 + $0x24] sm:$0xf0] }
 0x19c   : > { %v7382_v59 = vor.u32 %v10282_v48, %v7381_v46  ;;  %v7637_v61 = vld [vmem:[#allocation12 + $0x208] sm:$0xf]  ;;  %v10302_v46 = vld [vmem:[#allocation12 + $0xcc] sm:$0xf] }
 0x19d   : > { %2894 = vmatpush.bf16.msra.mxu0 %v7698_v33  ;;  %2920 = vmatpush.bf16.msra.mxu2 %v8210_v6  ;;  %v7765_v6 = vld [vmem:[#allocation12 + $0x308] sm:$0xf]  ;;  %v7479_v48 = vld [vmem:[#allocation12 + $0xe8] sm:$0xf0] }
 0x19e   : > { %v7766_v17 = vor.u32 %v10378_v7, %v7765_v6  ;;  %v10326_v6 = vld [vmem:[#allocation12 + $0x18c] sm:$0xf] }
 0x19f   : > { %2883 = vmatpush.bf16.msrb.mxu3 %v7378_v37  ;;  %2909 = vmatpush.bf16.msra.mxu1 %v7890_v10  ;;  %v10466_v10 = vld [vmem:[#allocation12 + $0x5e4] sm:$0xf0]  ;;  %v7575_v7 = vld [vmem:[#allocation12 + $0x1a8] sm:$0xf0] }
 0x1a1   : > { %2895 = vmatpush.bf16.msra.mxu0 %v7666_v45  ;;  %2921 = vmatpush.bf16.msra.mxu2 %v8178_v13  ;;  %v828_v45 = vperm.slane %v11650_v14, 2 }
 0x1a5   : > { %2896 = vmatpush.bf16.msra.mxu0 %v7634_v53  ;;  %2922 = vmatpush.bf16.msra.mxu2 %v8146_v19  ;;  %v10298_v19 = vld [vmem:[#allocation12 + $0xa4] sm:$0xf0] }
 0x1df   : > { %v1189_v12 = vpop.f32.mrf.mxu1 }
 0x1e0   : > { %v1190_v26 = vadd.f32 %v1189_v12, %v827_v22 }
 0x1e5   : > { %v1163_v20 = vpop.f32.mrf.mxu3  ;;  %v1176_v21 = vpop.f32.mrf.mxu0 }
 0x1e6   : > { %v1164_v23 = vadd.f32 %v1163_v20, %v826_v15  ;;  %v7478_v15 = vor.u32 %v10306_v3, %v7477_v2  ;;  %v7733_v20 = vld [vmem:[#allocation12 + $0x2c8] sm:$0xf] }
 0x1e7   : > { %v1191_v24 = vpop.f32.mrf.mxu1  ;;  %v10434_v2 = vld [vmem:[#allocation12 + $0x4e4] sm:$0xf0] }
 0x1e8   : > { %v1177_v25 = vadd.f32 %v1176_v21, %v1164_v23  ;;  %v8118_v23 = vor.u32 %v10466_v10, %v8117_v9  ;;  %v10370_v24 = vld [vmem:[#allocation12 + $0x2e4] sm:$0xf0]  ;;  %v7863_v9 = vld [vmem:[#allocation12 + $0x3e8] sm:$0xf0] }
 0x1ea   : > { %v1258_v16 = vmul.f32 0.2, %v1177_v25 }
 0x1eb   : > { %v1202_v29 = vpop.f32.mrf.mxu2 }
 0x1ec   : > { %v1262_v30 = vmax.f32 %v1177_v25, %v1258_v16  ;;  %v1203_v31 = vadd.f32 %v1202_v29, %v1190_v26  ;;  %v8085_v25 = vld [vmem:[#allocation12 + $0x588] sm:$0xf]  ;;  %v7446_v29 = vor.u32 %v10298_v19, %v7445_v18 }
 0x1ed   : > { %v1165_v32 = vpop.f32.mrf.mxu3  ;;  %v1178_v33 = vpop.f32.mrf.mxu0  ;;  %v10458_v26 = vld [vmem:[#allocation12 + $0x5a4] sm:$0xf0] }
 0x1ee   : > { %v11654_v38 = vpack.c.bf16 %v1262_v30, %v1262_v30  ;;  %v1259_v39 = vmul.f32 0.2, %v1203_v31  ;;  %v8373_v16 = vld [vmem:[#allocation12 + $0x7c8] sm:$0xf]  ;;  %v7734_v30 = vor.u32 %v10370_v24, %v7733_v20  ;;  %v10318_v20 = vld [vmem:[#allocation12 + $0x14c] sm:$0xf] }
 0x1ef   : > { %v1241_v37 = vpop.f32.mrf.mxu1  ;;  %v10290_v32 = vld [vmem:[#allocation12 + $0x64] sm:$0xf0]  ;;  %v8374_v35 = vor.u32 %v10530_v27, %v8373_v16  ;;  %v7831_v24 = vld [vmem:[#allocation12 + $0x3a8] sm:$0xf0] }
 0x1f0   : > { %v1263_v42 = vmax.f32 %v1203_v31, %v1259_v39  ;;  %2832 = vmatmul.bf16.vlgmr.msra.gmra.mxu3 %v11654_v38  ;;  %v1242_v4 = vadd.f32 %v1241_v37, %v829_v52  ;;  %v7413_v31 = vld [vmem:[#allocation12 + $0x48] sm:$0xf] }
 0x1f1   : > { %2928 = vmatpush.bf16.msra.mxu3 %v7606_v34  ;;  %v8086_v34 = vor.u32 %v10458_v26, %v8085_v25  ;;  %v10362_v39 = vld [vmem:[#allocation12 + $0x2a4] sm:$0xf0] }
 0x1f2   : > { %v11658_v47 = vpack.c.bf16 %v1263_v42, %v1263_v42  ;;  %v10450_v37 = vld [vmem:[#allocation12 + $0x564] sm:$0xf0] }
 0x1f3   : > { %v1204_v51 = vpop.f32.mrf.mxu2  ;;  %v8341_v42 = vld [vmem:[#allocation12 + $0x788] sm:$0xf]  ;;  %v8054_v49 = vor.u32 %v10450_v37, %v8053_v40 }
 0x1f4   : > { %2845 = vmatmul.bf16.vlgmr.msrb.gmra.mxu0 %v11658_v47  ;;  %v7669_v51 = vld [vmem:[#allocation12 + $0x248] sm:$0xf] }
 0x1f5   : > { %2929 = vmatpush.bf16.msra.mxu3 %v7574_v43  ;;  %2941 = vmatpush.bf16.msrb.mxu0 %v7862_v44  ;;  %v1215_v53 = vpop.f32.mrf.mxu3  ;;  %v1228_v54 = vpop.f32.mrf.mxu0  ;;  %v10522_v43 = vld [vmem:[#allocation12 + $0x7a4] sm:$0xf0]  ;;  %v7414_v44 = vor.u32 %v10290_v32, %v7413_v31  ;;  %v10310_v32 = vld [vmem:[#allocation12 + $0x10c] sm:$0xf] }
 0x1f6   : > { %v1216_v58 = vadd.f32 %v1215_v53, %v828_v45  ;;  %v7702_v45 = vor.u32 %v10362_v39, %v7701_v36  ;;  %v8342_v50 = vor.u32 %v10522_v43, %v8341_v42  ;;  %v10354_v52 = vld [vmem:[#allocation12 + $0x264] sm:$0xf0]  ;;  %v7799_v36 = vld [vmem:[#allocation12 + $0x368] sm:$0xf0] }
 0x1f7   : > { %v1243_v62 = vpop.f32.mrf.mxu1  ;;  %v8021_v53 = vld [vmem:[#allocation12 + $0x508] sm:$0xf]  ;;  %v7670_v60 = vor.u32 %v10354_v52, %v7669_v51  ;;  %v10462_v51 = vld [vmem:[#allocation12 + $0x5cc] sm:$0xf] }
 0x1f8   : > { %v1229_v63 = vadd.f32 %v1228_v54, %v1216_v58  ;;  %v10442_v54 = vld [vmem:[#allocation12 + $0x524] sm:$0xf0]  ;;  %v7607_v58 = vld [vmem:[#allocation12 + $0x1e8] sm:$0xf0] }
 0x1f9   : > { %2930 = vmatpush.bf16.msra.mxu3 %v7542_v55  ;;  %2942 = vmatpush.bf16.msrb.mxu0 %v7830_v56  ;;  %v8309_v55 = vld [vmem:[#allocation12 + $0x748] sm:$0xf]  ;;  %v8022_v62 = vor.u32 %v10442_v54, %v8021_v53  ;;  %v7610_v3 = vor.u32 %v10334_v57, %v7607_v58  ;;  %v8119_v52 = vld [vmem:[#allocation12 + $0x5e8] sm:$0xf0] }
 0x1fa   : > { %v1260_v5 = vmul.f32 0.2, %v1229_v63  ;;  %v10514_v56 = vld [vmem:[#allocation12 + $0x764] sm:$0xf0] }
 0x1fb   : > { %v1254_v8 = vpop.f32.mrf.mxu2  ;;  %v8245_v18 = vld [vmem:[#allocation12 + $0x6c8] sm:$0xf] }
 0x1fc   : > { %v1264_v11 = vmax.f32 %v1229_v63, %v1260_v5  ;;  %v1255_v12 = vadd.f32 %v1254_v8, %v1242_v4  ;;  %v8310_v63 = vor.u32 %v10514_v56, %v8309_v55  ;;  %v8277_v4 = vld [vmem:[#allocation12 + $0x708] sm:$0xf]  ;;  %v10398_v8 = vld [vmem:[#allocation12 + $0x3cc] sm:$0xf]  ;;  %v7482_v56 = vor.u32 %v10302_v46, %v7479_v48  ;;  %v10331_v46 = vld [vmem:[#allocation12 + $0x1ac] sm:$0xf0] }
 0x1fd   : > { %2931 = vmatpush.bf16.msra.mxu3 %v7510_v0  ;;  %2943 = vmatpush.bf16.msrb.mxu0 %v7798_v1  ;;  %v1217_v13 = vpop.f32.mrf.mxu3  ;;  %v1230_v14 = vpop.f32.mrf.mxu0  ;;  %v10346_v0 = vld [vmem:[#allocation12 + $0x224] sm:$0xf0]  ;;  %v7869_v48 = vld [vmem:[#allocation12 + $0x3d0] sm:$0xf] }
 0x1fe   : > { %v11662_v21 = vpack.c.bf16 %v1264_v11, %v1264_v11  ;;  %v1261_v22 = vmul.f32 0.2, %v1255_v12  ;;  %v7989_v1 = vld [vmem:[#allocation12 + $0x4c8] sm:$0xf]  ;;  %v7638_v10 = vor.u32 %v10346_v0, %v7637_v61  ;;  %v8122_v61 = vor.u32 %v10462_v51, %v8119_v52  ;;  %v10454_v0 = vld [vmem:[#allocation12 + $0x58c] sm:$0xf] }
 0x1ff   : > { %v10506_v5 = vld [vmem:[#allocation12 + $0x724] sm:$0xf0]  ;;  %v7990_v11 = vor.u32 %v10434_v2, %v7989_v1  ;;  %v8087_v1 = vld [vmem:[#allocation12 + $0x5a8] sm:$0xf0] }
 0x200   : > { %v1265_v28 = vmax.f32 %v1255_v12, %v1261_v22  ;;  %2858 = vmatmul.bf16.vlgmr.msrb.gmra.mxu1 %v11662_v21  ;;  %2884 = vmatmul.bf16.vlgmr.msrb.gmra.mxu3 %v11654_v38  ;;  %v8278_v12 = vor.u32 %v10506_v5, %v8277_v4  ;;  %v7957_v13 = vld [vmem:[#allocation12 + $0x488] sm:$0xf]  ;;  %v7543_v22 = vld [vmem:[#allocation12 + $0x168] sm:$0xf0] }
 0x201   : > { %2932 = vmatpush.bf16.msra.mxu3 %v7478_v15  ;;  %2944 = vmatpush.bf16.msrb.mxu0 %v7766_v17  ;;  %v10426_v14 = vld [vmem:[#allocation12 + $0x4a4] sm:$0xf0]  ;;  %v7578_v15 = vor.u32 %v10326_v6, %v7575_v7  ;;  %v7866_v17 = vor.u32 %v10398_v8, %v7863_v9  ;;  %v10526_v2 = vld [vmem:[#allocation12 + $0x7cc] sm:$0xf]  ;;  %v8090_v9 = vor.u32 %v10454_v0, %v8087_v1 }
 0x202   : > { %v11666_v33 = vpack.c.bf16 %v1265_v28, %v1265_v28  ;;  %2954 = vmatpush.bf16.msrb.mxu1 %v8118_v23  ;;  %v10498_v19 = vld [vmem:[#allocation12 + $0x6e4] sm:$0xf0]  ;;  %v10390_v23 = vld [vmem:[#allocation12 + $0x38c] sm:$0xf]  ;;  %v7958_v25 = vor.u32 %v10426_v14, %v7957_v13  ;;  %v7546_v28 = vor.u32 %v10318_v20, %v7543_v22 }
 0x203   : > { %v1256_v41 = vpop.f32.mrf.mxu2  ;;  %v8246_v26 = vor.u32 %v10498_v19, %v8245_v18  ;;  %v7925_v16 = vld [vmem:[#allocation12 + $0x448] sm:$0xf]  ;;  %v10286_v7 = vld [vmem:[#allocation12 + $0x4c] sm:$0xf] }
 0x204   : > { %2871 = vmatmul.bf16.vlgmr.msrb.gmra.mxu2 %v11666_v33  ;;  %2897 = vmatmul.bf16.vlgmr.msra.gmra.mxu0 %v11658_v47  ;;  %v10418_v27 = vld [vmem:[#allocation12 + $0x464] sm:$0xf0]  ;;  %v7415_v8 = vld [vmem:[#allocation12 + $0x68] sm:$0xf0] }
 0x205   : > { %2933 = vmatpush.bf16.msra.mxu3 %v7446_v29  ;;  %2945 = vmatpush.bf16.msrb.mxu0 %v7734_v30  ;;  %v7834_v29 = vor.u32 %v10390_v23, %v7831_v24  ;;  %v8213_v30 = vld [vmem:[#allocation12 + $0x688] sm:$0xf]  ;;  %v7926_v39 = vor.u32 %v10418_v27, %v7925_v16  ;;  %v10446_v13 = vld [vmem:[#allocation12 + $0x54c] sm:$0xf]  ;;  %v7418_v18 = vor.u32 %v10286_v7, %v7415_v8  ;;  %v7517_v7 = vld [vmem:[#allocation12 + $0x110] sm:$0xf] }
 0x206   : > { %2955 = vmatpush.bf16.msrb.mxu1 %v8086_v34  ;;  %2967 = vmatpush.bf16.msrb.mxu2 %v8374_v35  ;;  %v10490_v31 = vld [vmem:[#allocation12 + $0x6a4] sm:$0xf0]  ;;  %v7511_v34 = vld [vmem:[#allocation12 + $0x128] sm:$0xf0]  ;;  %v10315_v8 = vld [vmem:[#allocation12 + $0x12c] sm:$0xf0] }
 0x207   : > { %v10382_v35 = vld [vmem:[#allocation12 + $0x34c] sm:$0xf]  ;;  %v8214_v40 = vor.u32 %v10490_v31, %v8213_v30  ;;  %v7893_v41 = vld [vmem:[#allocation12 + $0x408] sm:$0xf]  ;;  %v7514_v42 = vor.u32 %v10310_v32, %v7511_v34  ;;  %v7613_v30 = vld [vmem:[#allocation12 + $0x1d0] sm:$0xf] }
 0x208   : > { %v10410_v37 = vld [vmem:[#allocation12 + $0x424] sm:$0xf0]  ;;  %v7802_v43 = vor.u32 %v10382_v35, %v7799_v36  ;;  %v8055_v14 = vld [vmem:[#allocation12 + $0x568] sm:$0xf0]  ;;  %v10339_v31 = vld [vmem:[#allocation12 + $0x1ec] sm:$0xf0] }
 0x209   : > { %2934 = vmatpush.bf16.msra.mxu3 %v7414_v44  ;;  %2946 = vmatpush.bf16.msrb.mxu0 %v7702_v45  ;;  %v8181_v44 = vld [vmem:[#allocation12 + $0x648] sm:$0xf]  ;;  %v7894_v53 = vor.u32 %v10410_v37, %v7893_v41  ;;  %v10278_v20 = vld [vmem:[#allocation12 + $0xc] sm:$0xf]  ;;  %v8058_v23 = vor.u32 %v10446_v13, %v8055_v14 }
 0x20a   : > { %2956 = vmatpush.bf16.msrb.mxu1 %v8054_v49  ;;  %2968 = vmatpush.bf16.msrb.mxu2 %v8342_v50  ;;  %v10482_v45 = vld [vmem:[#allocation12 + $0x664] sm:$0xf0]  ;;  %v10374_v49 = vld [vmem:[#allocation12 + $0x30c] sm:$0xf] }
 0x20b   : > { %v7767_v50 = vld [vmem:[#allocation12 + $0x328] sm:$0xf0]  ;;  %v8182_v54 = vor.u32 %v10482_v45, %v8181_v44  ;;  %v8149_v55 = vld [vmem:[#allocation12 + $0x608] sm:$0xf]  ;;  %v7581_v45 = vld [vmem:[#allocation12 + $0x190] sm:$0xf] }
 0x20c   : > { %v7770_v57 = vor.u32 %v10374_v49, %v7767_v50  ;;  %v10474_v58 = vld [vmem:[#allocation12 + $0x624] sm:$0xf0]  ;;  %v7383_v22 = vld [vmem:[#allocation12 + $0x28] sm:$0xf0]  ;;  %v10403_v49 = vld [vmem:[#allocation12 + $0x3ec] sm:$0xf0] }
 0x20d   : > { %2935 = vmatpush.bf16.msra.mxu3 %v7382_v59  ;;  %2947 = vmatpush.bf16.msrb.mxu0 %v7670_v60  ;;  %v10294_v59 = vld [vmem:[#allocation12 + $0x8c] sm:$0xf]  ;;  %v8150_v4 = vor.u32 %v10474_v58, %v8149_v55  ;;  %v7386_v32 = vor.u32 %v10278_v20, %v7383_v22  ;;  %v7582_v55 = vor.u32 %v10331_v46, %v7581_v45  ;;  %v7485_v20 = vld [vmem:[#allocation12 + $0xd0] sm:$0xf] }
 0x20e   : > { %2957 = vmatpush.bf16.msrb.mxu1 %v8022_v62  ;;  %2969 = vmatpush.bf16.msrb.mxu2 %v8310_v63  ;;  %v7447_v60 = vld [vmem:[#allocation12 + $0xa8] sm:$0xf0]  ;;  %v10307_v22 = vld [vmem:[#allocation12 + $0xec] sm:$0xf0] }
 0x20f   : > { %v10366_v62 = vld [vmem:[#allocation12 + $0x2cc] sm:$0xf]  ;;  %v7450_v5 = vor.u32 %v10294_v59, %v7447_v60  ;;  %v7549_v59 = vld [vmem:[#allocation12 + $0x150] sm:$0xf] }
 0x210   : > { %2910 = vmatmul.bf16.vlgmr.msra.gmra.mxu1 %v11662_v21  ;;  %2936 = vmatmul.bf16.vlgmr.msra.gmra.mxu3 %v11654_v38  ;;  %v7735_v63 = vld [vmem:[#allocation12 + $0x2e8] sm:$0xf0]  ;;  %v10323_v60 = vld [vmem:[#allocation12 + $0x16c] sm:$0xf0] }
 0x211   : > { %2980 = vmatpush.bf16.msrb.mxu3 %v7610_v3  ;;  %2948 = vmatpush.bf16.msrb.mxu0 %v7638_v10  ;;  %v8375_v3 = vld [vmem:[#allocation12 + $0x7e8] sm:$0xf0]  ;;  %v7738_v6 = vor.u32 %v10366_v62, %v7735_v63  ;;  %v10395_v62 = vld [vmem:[#allocation12 + $0x3ac] sm:$0xf0] }
 0x212   : > { %2958 = vmatpush.bf16.msrb.mxu1 %v7990_v11  ;;  %2970 = vmatpush.bf16.msrb.mxu2 %v8278_v12  ;;  %v8378_v10 = vor.u32 %v10526_v2, %v8375_v3  ;;  %v10358_v11 = vld [vmem:[#allocation12 + $0x28c] sm:$0xf]  ;;  %v7550_v3 = vor.u32 %v10323_v60, %v7549_v59  ;;  %v7421_v46 = vld [vmem:[#allocation12 + $0x50] sm:$0xf] }
 0x213   : > { %v7703_v12 = vld [vmem:[#allocation12 + $0x2a8] sm:$0xf0]  ;;  %v7389_v59 = vld [vmem:[#allocation12 + $0x10] sm:$0xf] }
 0x214   : > { %2923 = vmatmul.bf16.vlgmr.msra.gmra.mxu2 %v11666_v33  ;;  %2949 = vmatmul.bf16.vlgmr.msrb.gmra.mxu0 %v11658_v47  ;;  %v7706_v19 = vor.u32 %v10358_v11, %v7703_v12  ;;  %v10438_v16 = vld [vmem:[#allocation12 + $0x50c] sm:$0xf]  ;;  %v10283_v60 = vld [vmem:[#allocation12 + $0x2c] sm:$0xf0] }
 0x215   : > { %2981 = vmatpush.bf16.msrb.mxu3 %v7578_v15  ;;  %2993 = vmatpush.bf16.msra.mxu0 %v7866_v17  ;;  %v10518_v15 = vld [vmem:[#allocation12 + $0x78c] sm:$0xf] }
 0x216   : > { %2959 = vmatpush.bf16.msrb.mxu1 %v7958_v25  ;;  %2971 = vmatpush.bf16.msrb.mxu2 %v8246_v26  ;;  %v8343_v17 = vld [vmem:[#allocation12 + $0x7a8] sm:$0xf0] }
 0x217   : > { %v8346_v24 = vor.u32 %v10518_v15, %v8343_v17  ;;  %v10350_v25 = vld [vmem:[#allocation12 + $0x24c] sm:$0xf]  ;;  %v7518_v15 = vor.u32 %v10315_v8, %v7517_v7  ;;  %v7390_v7 = vor.u32 %v10283_v60, %v7389_v59  ;;  %v10303_v59 = vld [vmem:[#allocation12 + $0xd4] sm:$0xf] }
 0x218   : > { %v7671_v26 = vld [vmem:[#allocation12 + $0x268] sm:$0xf0]  ;;  %v7487_v60 = vld [vmem:[#allocation12 + $0xf0] sm:$0xf0] }
 0x219   : > { %2982 = vmatpush.bf16.msrb.mxu3 %v7546_v28  ;;  %2994 = vmatpush.bf16.msra.mxu0 %v7834_v29  ;;  %v8023_v27 = vld [vmem:[#allocation12 + $0x528] sm:$0xf0]  ;;  %v7674_v34 = vor.u32 %v10350_v25, %v7671_v26  ;;  %v8125_v25 = vld [vmem:[#allocation12 + $0x5d0] sm:$0xf] }
 0x21a   : > { %2960 = vmatpush.bf16.msrb.mxu1 %v7926_v39  ;;  %2972 = vmatpush.bf16.msrb.mxu2 %v8214_v40  ;;  %v10510_v28 = vld [vmem:[#allocation12 + $0x74c] sm:$0xf]  ;;  %v8026_v36 = vor.u32 %v10438_v16, %v8023_v27  ;;  %v10467_v26 = vld [vmem:[#allocation12 + $0x5ec] sm:$0xf0] }
 0x21b   : > { %v8311_v29 = vld [vmem:[#allocation12 + $0x768] sm:$0xf0] }
 0x21c   : > { %v10342_v35 = vld [vmem:[#allocation12 + $0x20c] sm:$0xf]  ;;  %v8314_v39 = vor.u32 %v10510_v28, %v8311_v29  ;;  %v7486_v29 = vor.u32 %v10307_v22, %v7485_v20  ;;  %v7583_v20 = vld [vmem:[#allocation12 + $0x1b0] sm:$0xf0] }
 0x21d   : > { %2983 = vmatpush.bf16.msrb.mxu3 %v7514_v42  ;;  %2995 = vmatpush.bf16.msra.mxu0 %v7802_v43  ;;  %v7639_v40 = vld [vmem:[#allocation12 + $0x228] sm:$0xf0]  ;;  %v7614_v42 = vor.u32 %v10339_v31, %v7613_v30  ;;  %v10399_v22 = vld [vmem:[#allocation12 + $0x3d4] sm:$0xf] }
 0x21e   : > { %2961 = vmatpush.bf16.msrb.mxu1 %v7894_v53  ;;  %2973 = vmatpush.bf16.msrb.mxu2 %v8182_v54  ;;  %v10430_v41 = vld [vmem:[#allocation12 + $0x4cc] sm:$0xf]  ;;  %v7642_v50 = vor.u32 %v10342_v35, %v7639_v40  ;;  %v8126_v35 = vor.u32 %v10467_v26, %v8125_v25  ;;  %v8093_v40 = vld [vmem:[#allocation12 + $0x590] sm:$0xf] }
 0x21f   : > { %v7991_v37 = vld [vmem:[#allocation12 + $0x4e8] sm:$0xf0] }
 0x220   : > { %v10502_v43 = vld [vmem:[#allocation12 + $0x70c] sm:$0xf]  ;;  %v7994_v51 = vor.u32 %v10430_v41, %v7991_v37  ;;  %v10459_v41 = vld [vmem:[#allocation12 + $0x5ac] sm:$0xf0] }
 0x221   : > { %2984 = vmatpush.bf16.msrb.mxu3 %v7482_v56  ;;  %2996 = vmatpush.bf16.msra.mxu0 %v7770_v57  ;;  %v8279_v44 = vld [vmem:[#allocation12 + $0x728] sm:$0xf0]  ;;  %v7870_v56 = vor.u32 %v10403_v49, %v7869_v48  ;;  %v8381_v37 = vld [vmem:[#allocation12 + $0x7d0] sm:$0xf]  ;;  %v8094_v49 = vor.u32 %v10459_v41, %v8093_v40 }
 0x222   : > { %3006 = vmatpush.bf16.msra.mxu1 %v8122_v61  ;;  %2974 = vmatpush.bf16.msrb.mxu2 %v8150_v4  ;;  %v8282_v52 = vor.u32 %v10502_v43, %v8279_v44  ;;  %v10422_v53 = vld [vmem:[#allocation12 + $0x48c] sm:$0xf]  ;;  %v7837_v61 = vld [vmem:[#allocation12 + $0x390] sm:$0xf] }
 0x223   : > { %2962 = vmatmul.bf16.vlgmr.msrb.gmra.mxu1 %v11662_v21  ;;  %v7959_v54 = vld [vmem:[#allocation12 + $0x4a8] sm:$0xf0]  ;;  %v7838_v4 = vor.u32 %v10395_v62, %v7837_v61  ;;  %v10291_v48 = vld [vmem:[#allocation12 + $0x6c] sm:$0xf0] }
 0x224   : > { %v10494_v57 = vld [vmem:[#allocation12 + $0x6cc] sm:$0xf]  ;;  %v7962_v63 = vor.u32 %v10422_v53, %v7959_v54  ;;  %v8061_v53 = vld [vmem:[#allocation12 + $0x550] sm:$0xf] }
 0x225   : > { %2985 = vmatpush.bf16.msrb.mxu3 %v7450_v5  ;;  %2997 = vmatpush.bf16.msra.mxu0 %v7738_v6  ;;  %v8247_v58 = vld [vmem:[#allocation12 + $0x6e8] sm:$0xf0]  ;;  %v10451_v54 = vld [vmem:[#allocation12 + $0x56c] sm:$0xf0] }
 0x226   : > { %3007 = vmatpush.bf16.msra.mxu1 %v8090_v9  ;;  %3019 = vmatpush.bf16.msra.mxu2 %v8378_v10  ;;  %v8250_v0 = vor.u32 %v10494_v57, %v8247_v58  ;;  %v10414_v1 = vld [vmem:[#allocation12 + $0x44c] sm:$0xf]  ;;  %v7805_v9 = vld [vmem:[#allocation12 + $0x350] sm:$0xf]  ;;  %v7422_v57 = vor.u32 %v10291_v48, %v7421_v46  ;;  %v8062_v61 = vor.u32 %v10451_v54, %v8061_v53  ;;  %v10311_v46 = vld [vmem:[#allocation12 + $0x114] sm:$0xf] }
 0x227   : > { %2975 = vmatmul.bf16.vlgmr.msrb.gmra.mxu2 %v11666_v33  ;;  %v7927_v2 = vld [vmem:[#allocation12 + $0x468] sm:$0xf0]  ;;  %v10387_v10 = vld [vmem:[#allocation12 + $0x36c] sm:$0xf0]  ;;  %v7519_v48 = vld [vmem:[#allocation12 + $0x130] sm:$0xf0] }
 0x228   : > { %v10486_v5 = vld [vmem:[#allocation12 + $0x68c] sm:$0xf]  ;;  %v7930_v11 = vor.u32 %v10414_v1, %v7927_v2  ;;  %v7806_v17 = vor.u32 %v10387_v10, %v7805_v9  ;;  %v8029_v1 = vld [vmem:[#allocation12 + $0x510] sm:$0xf] }
 0x229   : > { %2986 = vmatpush.bf16.msrb.mxu3 %v7418_v18  ;;  %2998 = vmatpush.bf16.msra.mxu0 %v7706_v19  ;;  %v8215_v6 = vld [vmem:[#allocation12 + $0x6a8] sm:$0xf0]  ;;  %v10443_v2 = vld [vmem:[#allocation12 + $0x52c] sm:$0xf0] }
 0x22a   : > { %3008 = vmatpush.bf16.msra.mxu1 %v8058_v23  ;;  %3020 = vmatpush.bf16.msra.mxu2 %v8346_v24  ;;  %v8218_v12 = vor.u32 %v10486_v5, %v8215_v6  ;;  %v10406_v13 = vld [vmem:[#allocation12 + $0x40c] sm:$0xf]  ;;  %v7773_v23 = vld [vmem:[#allocation12 + $0x310] sm:$0xf]  ;;  %v10335_v5 = vld [vmem:[#allocation12 + $0x1d4] sm:$0xf]  ;;  %v8030_v10 = vor.u32 %v10443_v2, %v8029_v1 }
 0x22b   : > { %v7895_v14 = vld [vmem:[#allocation12 + $0x428] sm:$0xf0]  ;;  %v10379_v24 = vld [vmem:[#allocation12 + $0x32c] sm:$0xf0]  ;;  %v7615_v6 = vld [vmem:[#allocation12 + $0x1f0] sm:$0xf0] }
 0x22c   : > { %v10478_v18 = vld [vmem:[#allocation12 + $0x64c] sm:$0xf]  ;;  %v7898_v16 = vor.u32 %v10406_v13, %v7895_v14  ;;  %v7774_v30 = vor.u32 %v10379_v24, %v7773_v23  ;;  %v7645_v9 = vld [vmem:[#allocation12 + $0x210] sm:$0xf]  ;;  %v7871_v23 = vld [vmem:[#allocation12 + $0x3f0] sm:$0xf0] }
 0x22d   : > { %2987 = vmatpush.bf16.msrb.mxu3 %v7386_v32  ;;  %2999 = vmatpush.bf16.msra.mxu0 %v7674_v34  ;;  %v8183_v19 = vld [vmem:[#allocation12 + $0x668] sm:$0xf0]  ;;  %v7453_v32 = vld [vmem:[#allocation12 + $0x90] sm:$0xf] }
 0x22e   : > { %3009 = vmatpush.bf16.msra.mxu1 %v8026_v36  ;;  %3021 = vmatpush.bf16.msra.mxu2 %v8314_v39  ;;  %v8186_v27 = vor.u32 %v10478_v18, %v8183_v19  ;;  %v10470_v28 = vld [vmem:[#allocation12 + $0x60c] sm:$0xf]  ;;  %v10299_v34 = vld [vmem:[#allocation12 + $0xac] sm:$0xf0]  ;;  %v10327_v19 = vld [vmem:[#allocation12 + $0x194] sm:$0xf] }
 0x22f   : > { %v8151_v31 = vld [vmem:[#allocation12 + $0x628] sm:$0xf0]  ;;  %v7741_v36 = vld [vmem:[#allocation12 + $0x2d0] sm:$0xf]  ;;  %v7454_v44 = vor.u32 %v10299_v34, %v7453_v32  ;;  %v10319_v32 = vld [vmem:[#allocation12 + $0x154] sm:$0xf] }
 0x230   : > { %2988 = vmatmul.bf16.vlgmr.msrb.gmra.mxu3 %v11654_v38  ;;  %v10371_v39 = vld [vmem:[#allocation12 + $0x2ec] sm:$0xf0]  ;;  %v8154_v43 = vor.u32 %v10470_v28, %v8151_v31  ;;  %v7586_v28 = vor.u32 %v10327_v19, %v7583_v20  ;;  %v7551_v34 = vld [vmem:[#allocation12 + $0x170] sm:$0xf0] }
 0x231   : > { %3032 = vmatpush.bf16.msra.mxu3 %v7614_v42  ;;  %3000 = vmatpush.bf16.msra.mxu0 %v7642_v50  ;;  %v10531_v42 = vld [vmem:[#allocation12 + $0x7ec] sm:$0xf0]  ;;  %v7742_v45 = vor.u32 %v10371_v39, %v7741_v36  ;;  %v7839_v36 = vld [vmem:[#allocation12 + $0x3b0] sm:$0xf0] }
 0x232   : > { %3010 = vmatpush.bf16.msra.mxu1 %v7994_v51  ;;  %3022 = vmatpush.bf16.msra.mxu2 %v8282_v52  ;;  %v8382_v50 = vor.u32 %v10531_v42, %v8381_v37  ;;  %v7709_v51 = vld [vmem:[#allocation12 + $0x290] sm:$0xf]  ;;  %v7554_v42 = vor.u32 %v10319_v32, %v7551_v34  ;;  %v10287_v20 = vld [vmem:[#allocation12 + $0x54] sm:$0xf] }
 0x233   : > { %v10363_v52 = vld [vmem:[#allocation12 + $0x2ac] sm:$0xf0]  ;;  %v10279_v32 = vld [vmem:[#allocation12 + $0x14] sm:$0xf] }
 0x234   : > { %3001 = vmatmul.bf16.vlgmr.msra.gmra.mxu0 %v11658_v47  ;;  %v7710_v58 = vor.u32 %v10363_v52, %v7709_v51  ;;  %v7997_v13 = vld [vmem:[#allocation12 + $0x4d0] sm:$0xf]  ;;  %v7391_v34 = vld [vmem:[#allocation12 + $0x30] sm:$0xf0] }
 0x235   : > { %3033 = vmatpush.bf16.msra.mxu3 %v7582_v55  ;;  %3045 = vmatpush.bf16.msrb.mxu0 %v7870_v56  ;;  %v8349_v55 = vld [vmem:[#allocation12 + $0x790] sm:$0xf] }
 0x236   : > { %3011 = vmatpush.bf16.msra.mxu1 %v7962_v63  ;;  %3023 = vmatpush.bf16.msra.mxu2 %v8250_v0  ;;  %v10523_v56 = vld [vmem:[#allocation12 + $0x7ac] sm:$0xf0] }
 0x237   : > { %v8350_v62 = vor.u32 %v10523_v56, %v8349_v55  ;;  %v7677_v63 = vld [vmem:[#allocation12 + $0x250] sm:$0xf]  ;;  %v7522_v55 = vor.u32 %v10311_v46, %v7519_v48  ;;  %v7394_v46 = vor.u32 %v10279_v32, %v7391_v34  ;;  %v10479_v34 = vld [vmem:[#allocation12 + $0x654] sm:$0xf] }
 0x238   : > { %v10355_v0 = vld [vmem:[#allocation12 + $0x26c] sm:$0xf0] }
 0x239   : > { %3034 = vmatpush.bf16.msra.mxu3 %v7550_v3  ;;  %3046 = vmatpush.bf16.msrb.mxu0 %v7838_v4  ;;  %v8317_v3 = vld [vmem:[#allocation12 + $0x750] sm:$0xf]  ;;  %v7678_v8 = vor.u32 %v10355_v0, %v7677_v63  ;;  %v10463_v63 = vld [vmem:[#allocation12 + $0x5d4] sm:$0xf] }
 0x23a   : > { %3012 = vmatpush.bf16.msra.mxu1 %v7930_v11  ;;  %3024 = vmatpush.bf16.msra.mxu2 %v8218_v12  ;;  %v10515_v4 = vld [vmem:[#allocation12 + $0x76c] sm:$0xf0]  ;;  %v8127_v0 = vld [vmem:[#allocation12 + $0x5f0] sm:$0xf0] }
 0x23b   : > { %v8318_v11 = vor.u32 %v10515_v4, %v8317_v3  ;;  %v10347_v12 = vld [vmem:[#allocation12 + $0x22c] sm:$0xf0]  ;;  %v7490_v4 = vor.u32 %v10303_v59, %v7487_v60  ;;  %v10332_v59 = vld [vmem:[#allocation12 + $0x1b4] sm:$0xf0] }
 0x23c   : > { %v10435_v14 = vld [vmem:[#allocation12 + $0x4ec] sm:$0xf0]  ;;  %v7646_v24 = vor.u32 %v10347_v12, %v7645_v9  ;;  %v8130_v9 = vor.u32 %v10463_v63, %v8127_v0  ;;  %v10455_v12 = vld [vmem:[#allocation12 + $0x594] sm:$0xf]  ;;  %v7877_v60 = vld [vmem:[#allocation12 + $0x3d8] sm:$0xf] }
 0x23d   : > { %3035 = vmatpush.bf16.msra.mxu3 %v7518_v15  ;;  %3047 = vmatpush.bf16.msrb.mxu0 %v7806_v17  ;;  %v7618_v15 = vor.u32 %v10335_v5, %v7615_v6  ;;  %v8285_v17 = vld [vmem:[#allocation12 + $0x710] sm:$0xf]  ;;  %v7998_v25 = vor.u32 %v10435_v14, %v7997_v13  ;;  %v8095_v13 = vld [vmem:[#allocation12 + $0x5b0] sm:$0xf0] }
 0x23e   : > { %3013 = vmatpush.bf16.msra.mxu1 %v7898_v16  ;;  %3025 = vmatpush.bf16.msra.mxu2 %v8186_v27  ;;  %v10507_v18 = vld [vmem:[#allocation12 + $0x72c] sm:$0xf0]  ;;  %v10527_v14 = vld [vmem:[#allocation12 + $0x7d4] sm:$0xf] }
 0x23f   : > { %v8286_v26 = vor.u32 %v10507_v18, %v8285_v17  ;;  %v7965_v16 = vld [vmem:[#allocation12 + $0x490] sm:$0xf] }
 0x240   : > { %v10427_v27 = vld [vmem:[#allocation12 + $0x4ac] sm:$0xf0] }
 0x241   : > { %3036 = vmatpush.bf16.msra.mxu3 %v7486_v29  ;;  %3048 = vmatpush.bf16.msrb.mxu0 %v7774_v30  ;;  %v7874_v29 = vor.u32 %v10399_v22, %v7871_v23  ;;  %v8253_v30 = vld [vmem:[#allocation12 + $0x6d0] sm:$0xf]  ;;  %v7966_v39 = vor.u32 %v10427_v27, %v7965_v16  ;;  %v7423_v22 = vld [vmem:[#allocation12 + $0x70] sm:$0xf0]  ;;  %v8098_v23 = vor.u32 %v10455_v12, %v8095_v13 }
 0x242   : > { %3058 = vmatpush.bf16.msrb.mxu1 %v8126_v35  ;;  %3026 = vmatpush.bf16.msra.mxu2 %v8154_v43  ;;  %v10499_v31 = vld [vmem:[#allocation12 + $0x6ec] sm:$0xf0]  ;;  %v10391_v35 = vld [vmem:[#allocation12 + $0x394] sm:$0xf] }
 0x243   : > { %3014 = vmatmul.bf16.vlgmr.msra.gmra.mxu1 %v11662_v21  ;;  %v8254_v40 = vor.u32 %v10499_v31, %v8253_v30  ;;  %v7933_v41 = vld [vmem:[#allocation12 + $0x450] sm:$0xf]  ;;  %v7842_v43 = vor.u32 %v10391_v35, %v7839_v36  ;;  %v10447_v16 = vld [vmem:[#allocation12 + $0x554] sm:$0xf]  ;;  %v7426_v30 = vor.u32 %v10287_v20, %v7423_v22  ;;  %v7525_v20 = vld [vmem:[#allocation12 + $0x118] sm:$0xf] }
 0x244   : > { %v10419_v37 = vld [vmem:[#allocation12 + $0x46c] sm:$0xf0]  ;;  %v8063_v27 = vld [vmem:[#allocation12 + $0x570] sm:$0xf0]  ;;  %v11685_v22 = vld [vmem:[#allocation13] sm:$0xff] }
 0x245   : > { %3037 = vmatpush.bf16.msra.mxu3 %v7454_v44  ;;  %3049 = vmatpush.bf16.msrb.mxu0 %v7742_v45  ;;  %v8221_v44 = vld [vmem:[#allocation12 + $0x690] sm:$0xf]  ;;  %v7934_v51 = vor.u32 %v10419_v37, %v7933_v41  ;;  %v8066_v35 = vor.u32 %v10447_v16, %v8063_v27  ;;  %v10439_v41 = vld [vmem:[#allocation12 + $0x514] sm:$0xf]  ;;  %v1528_v27 = vperm.slane %v11685_v22, 0 }
 0x246   : > { %3059 = vmatpush.bf16.msrb.mxu1 %v8094_v49  ;;  %3071 = vmatpush.bf16.msrb.mxu2 %v8382_v50  ;;  %v10491_v45 = vld [vmem:[#allocation12 + $0x6ac] sm:$0xf0]  ;;  %v10383_v49 = vld [vmem:[#allocation12 + $0x354] sm:$0xf] }
 0x247   : > { %3027 = vmatmul.bf16.vlgmr.msra.gmra.mxu2 %v11666_v33  ;;  %v7807_v50 = vld [vmem:[#allocation12 + $0x370] sm:$0xf0]  ;;  %v8222_v52 = vor.u32 %v10491_v45, %v8221_v44  ;;  %v7901_v53 = vld [vmem:[#allocation12 + $0x410] sm:$0xf]  ;;  %v7621_v44 = vld [vmem:[#allocation12 + $0x1d8] sm:$0xf] }
 0x248   : > { %v10411_v54 = vld [vmem:[#allocation12 + $0x42c] sm:$0xf0]  ;;  %v7810_v56 = vor.u32 %v10383_v49, %v7807_v50  ;;  %v8031_v37 = vld [vmem:[#allocation12 + $0x530] sm:$0xf0]  ;;  %v10340_v45 = vld [vmem:[#allocation12 + $0x1f4] sm:$0xf0] }
 0x249   : > { %3038 = vmatpush.bf16.msra.mxu3 %v7422_v57  ;;  %3050 = vmatpush.bf16.msrb.mxu0 %v7710_v58  ;;  %v8189_v57 = vld [vmem:[#allocation12 + $0x650] sm:$0xf]  ;;  %v7902_v1 = vor.u32 %v10411_v54, %v7901_v53  ;;  %v10343_v49 = vld [vmem:[#allocation12 + $0x214] sm:$0xf]  ;;  %v8034_v50 = vor.u32 %v10439_v41, %v8031_v37  ;;  %v10380_v41 = vld [vmem:[#allocation12 + $0x334] sm:$0xf0] }
 0x24a   : > { %3060 = vmatpush.bf16.msrb.mxu1 %v8062_v61  ;;  %3072 = vmatpush.bf16.msrb.mxu2 %v8350_v62  ;;  %v10483_v58 = vld [vmem:[#allocation12 + $0x66c] sm:$0xf0]  ;;  %v10375_v61 = vld [vmem:[#allocation12 + $0x314] sm:$0xf] }
 0x24b   : > { %v7775_v62 = vld [vmem:[#allocation12 + $0x330] sm:$0xf0]  ;;  %v8190_v2 = vor.u32 %v10483_v58, %v8189_v57  ;;  %v8157_v3 = vld [vmem:[#allocation12 + $0x610] sm:$0xf]  ;;  %v7589_v58 = vld [vmem:[#allocation12 + $0x198] sm:$0xf] }
 0x24c   : > { %v7778_v5 = vor.u32 %v10375_v61, %v7775_v62  ;;  %v10475_v6 = vld [vmem:[#allocation12 + $0x62c] sm:$0xf0]  ;;  %v10431_v53 = vld [vmem:[#allocation12 + $0x4d4] sm:$0xf]  ;;  %v10404_v61 = vld [vmem:[#allocation12 + $0x3f4] sm:$0xf0] }
 0x24d   : > { %3039 = vmatpush.bf16.msra.mxu3 %v7390_v7  ;;  %3051 = vmatpush.bf16.msrb.mxu0 %v7678_v8  ;;  %v10295_v7 = vld [vmem:[#allocation12 + $0x94] sm:$0xf]  ;;  %v8158_v17 = vor.u32 %v10475_v6, %v8157_v3  ;;  %v7590_v3 = vor.u32 %v10332_v59, %v7589_v58  ;;  %v10460_v59 = vld [vmem:[#allocation12 + $0x5b4] sm:$0xf0] }
 0x24e   : > { %3061 = vmatpush.bf16.msrb.mxu1 %v8030_v10  ;;  %3073 = vmatpush.bf16.msrb.mxu2 %v8318_v11  ;;  %v7455_v8 = vld [vmem:[#allocation12 + $0xb0] sm:$0xf0] }
 0x24f   : > { %v10367_v10 = vld [vmem:[#allocation12 + $0x2d4] sm:$0xf]  ;;  %v7458_v18 = vor.u32 %v10295_v7, %v7455_v8  ;;  %v7557_v7 = vld [vmem:[#allocation12 + $0x158] sm:$0xf] }
 0x250   : > { %3040 = vmatmul.bf16.vlgmr.msra.gmra.mxu3 %v11654_v38  ;;  %v7743_v11 = vld [vmem:[#allocation12 + $0x2f0] sm:$0xf0]  ;;  %v10324_v8 = vld [vmem:[#allocation12 + $0x174] sm:$0xf0] }
 0x251   : > { %3084 = vmatpush.bf16.msrb.mxu3 %v7618_v15  ;;  %3052 = vmatpush.bf16.msrb.mxu0 %v7646_v24  ;;  %v8383_v15 = vld [vmem:[#allocation12 + $0x7f0] sm:$0xf0]  ;;  %v7746_v19 = vor.u32 %v10367_v10, %v7743_v11  ;;  %v10396_v10 = vld [vmem:[#allocation12 + $0x3b4] sm:$0xf0] }
 0x252   : > { %3062 = vmatpush.bf16.msrb.mxu1 %v7998_v25  ;;  %3074 = vmatpush.bf16.msrb.mxu2 %v8286_v26  ;;  %v8386_v24 = vor.u32 %v10527_v14, %v8383_v15  ;;  %v10359_v25 = vld [vmem:[#allocation12 + $0x294] sm:$0xf] }
 0x253   : > { %v7711_v26 = vld [vmem:[#allocation12 + $0x2b0] sm:$0xf0] }
 0x254   : > { %3053 = vmatmul.bf16.vlgmr.msrb.gmra.mxu0 %v11658_v47  ;;  %v7714_v31 = vor.u32 %v10359_v25, %v7711_v26  ;;  %v7999_v54 = vld [vmem:[#allocation12 + $0x4f0] sm:$0xf0]  ;;  %v10388_v25 = vld [vmem:[#allocation12 + $0x374] sm:$0xf0] }
 0x255   : > { %3085 = vmatpush.bf16.msrb.mxu3 %v7586_v28  ;;  %3097 = vmatpush.bf16.msra.mxu0 %v7874_v29  ;;  %v10519_v28 = vld [vmem:[#allocation12 + $0x794] sm:$0xf]  ;;  %v8002_v63 = vor.u32 %v10431_v53, %v7999_v54  ;;  %v10300_v53 = vld [vmem:[#allocation12 + $0xb4] sm:$0xf0] }
 0x256   : > { %3063 = vmatpush.bf16.msrb.mxu1 %v7966_v39  ;;  %3075 = vmatpush.bf16.msrb.mxu2 %v8254_v40  ;;  %v8351_v29 = vld [vmem:[#allocation12 + $0x7b0] sm:$0xf0] }
 0x257   : > { %v8354_v36 = vor.u32 %v10519_v28, %v8351_v29  ;;  %v10351_v39 = vld [vmem:[#allocation12 + $0x254] sm:$0xf] }
 0x258   : > { %v7679_v40 = vld [vmem:[#allocation12 + $0x270] sm:$0xf0] }
 0x259   : > { %3086 = vmatpush.bf16.msrb.mxu3 %v7554_v42  ;;  %3098 = vmatpush.bf16.msra.mxu0 %v7842_v43  ;;  %v10511_v42 = vld [vmem:[#allocation12 + $0x754] sm:$0xf]  ;;  %v7682_v48 = vor.u32 %v10351_v39, %v7679_v40  ;;  %v10308_v39 = vld [vmem:[#allocation12 + $0xf4] sm:$0xf0] }
 0x25a   : > { %3064 = vmatpush.bf16.msrb.mxu1 %v7934_v51  ;;  %3076 = vmatpush.bf16.msrb.mxu2 %v8222_v52  ;;  %v8319_v43 = vld [vmem:[#allocation12 + $0x770] sm:$0xf0]  ;;  %v7781_v40 = vld [vmem:[#allocation12 + $0x318] sm:$0xf] }
 0x25b   : > { %v8322_v51 = vor.u32 %v10511_v42, %v8319_v43  ;;  %v7647_v52 = vld [vmem:[#allocation12 + $0x230] sm:$0xf0]  ;;  %v8133_v42 = vld [vmem:[#allocation12 + $0x5d8] sm:$0xf] }
 0x25c   : > { %v8287_v57 = vld [vmem:[#allocation12 + $0x730] sm:$0xf0]  ;;  %v7650_v62 = vor.u32 %v10343_v49, %v7647_v52  ;;  %v10468_v43 = vld [vmem:[#allocation12 + $0x5f4] sm:$0xf0] }
 0x25d   : > { %3087 = vmatpush.bf16.msrb.mxu3 %v7522_v55  ;;  %3099 = vmatpush.bf16.msra.mxu0 %v7810_v56  ;;  %v7622_v55 = vor.u32 %v10340_v45, %v7621_v44  ;;  %v10503_v56 = vld [vmem:[#allocation12 + $0x714] sm:$0xf]  ;;  %v7461_v52 = vld [vmem:[#allocation12 + $0x98] sm:$0xf]  ;;  %v8134_v54 = vor.u32 %v10468_v43, %v8133_v42 }
 0x25e   : > { %3065 = vmatpush.bf16.msrb.mxu1 %v7902_v1  ;;  %3077 = vmatpush.bf16.msrb.mxu2 %v8190_v2  ;;  %v8290_v0 = vor.u32 %v10503_v56, %v8287_v57  ;;  %v10423_v1 = vld [vmem:[#allocation12 + $0x494] sm:$0xf]  ;;  %v10372_v56 = vld [vmem:[#allocation12 + $0x2f4] sm:$0xf0] }
 0x25f   : > { %v7967_v2 = vld [vmem:[#allocation12 + $0x4b0] sm:$0xf0]  ;;  %v8101_v57 = vld [vmem:[#allocation12 + $0x598] sm:$0xf] }
 0x260   : > { %v8255_v6 = vld [vmem:[#allocation12 + $0x6f0] sm:$0xf0]  ;;  %v7970_v11 = vor.u32 %v10423_v1, %v7967_v2  ;;  %v7429_v2 = vld [vmem:[#allocation12 + $0x58] sm:$0xf] }
 0x261   : > { %3088 = vmatpush.bf16.msrb.mxu3 %v7490_v4  ;;  %3100 = vmatpush.bf16.msra.mxu0 %v7778_v5  ;;  %v7878_v4 = vor.u32 %v10404_v61, %v7877_v60  ;;  %v10495_v5 = vld [vmem:[#allocation12 + $0x6d4] sm:$0xf]  ;;  %v8389_v60 = vld [vmem:[#allocation12 + $0x7d8] sm:$0xf] }
 0x262   : > { %3110 = vmatpush.bf16.msra.mxu1 %v8130_v9  ;;  %3078 = vmatpush.bf16.msrb.mxu2 %v8158_v17  ;;  %v7845_v9 = vld [vmem:[#allocation12 + $0x398] sm:$0xf]  ;;  %v8258_v12 = vor.u32 %v10495_v5, %v8255_v6  ;;  %v10415_v13 = vld [vmem:[#allocation12 + $0x454] sm:$0xf]  ;;  %v7558_v17 = vor.u32 %v10324_v8, %v7557_v7 }
 0x263   : > { %3066 = vmatmul.bf16.vlgmr.msrb.gmra.mxu1 %v11662_v21  ;;  %v7935_v14 = vld [vmem:[#allocation12 + $0x470] sm:$0xf0]  ;;  %v10532_v61 = vld [vmem:[#allocation12 + $0x7f4] sm:$0xf0] }
 0x264   : > { %v10487_v15 = vld [vmem:[#allocation12 + $0x694] sm:$0xf]  ;;  %v7938_v26 = vor.u32 %v10415_v13, %v7935_v14  ;;  %v8390_v5 = vor.u32 %v10532_v61, %v8389_v60  ;;  %v7717_v6 = vld [vmem:[#allocation12 + $0x298] sm:$0xf] }
 0x265   : > { %3089 = vmatpush.bf16.msrb.mxu3 %v7458_v18  ;;  %3101 = vmatpush.bf16.msra.mxu0 %v7746_v19  ;;  %v7846_v18 = vor.u32 %v10396_v10, %v7845_v9  ;;  %v8223_v19 = vld [vmem:[#allocation12 + $0x6b0] sm:$0xf0]  ;;  %v10364_v7 = vld [vmem:[#allocation12 + $0x2b4] sm:$0xf0] }
 0x266   : > { %3111 = vmatpush.bf16.msra.mxu1 %v8098_v23  ;;  %3123 = vmatpush.bf16.msra.mxu2 %v8386_v24  ;;  %v10316_v23 = vld [vmem:[#allocation12 + $0x134] sm:$0xf0]  ;;  %v8226_v16 = vor.u32 %v10487_v15, %v8223_v19  ;;  %v10407_v28 = vld [vmem:[#allocation12 + $0x414] sm:$0xf]  ;;  %v7718_v14 = vor.u32 %v10364_v7, %v7717_v6 }
 0x267   : > { %3079 = vmatmul.bf16.vlgmr.msrb.gmra.mxu2 %v11666_v33  ;;  %v7813_v24 = vld [vmem:[#allocation12 + $0x358] sm:$0xf]  ;;  %v7903_v29 = vld [vmem:[#allocation12 + $0x430] sm:$0xf0] }
 0x268   : > { %v7906_v45 = vor.u32 %v10407_v28, %v7903_v29  ;;  %v8069_v8 = vld [vmem:[#allocation12 + $0x558] sm:$0xf]  ;;  %v10336_v28 = vld [vmem:[#allocation12 + $0x1dc] sm:$0xf] }
 0x269   : > { %3090 = vmatpush.bf16.msrb.mxu3 %v7426_v30  ;;  %3102 = vmatpush.bf16.msra.mxu0 %v7714_v31  ;;  %v7526_v30 = vor.u32 %v10316_v23, %v7525_v20  ;;  %v7814_v31 = vor.u32 %v10388_v25, %v7813_v24  ;;  %v10452_v10 = vld [vmem:[#allocation12 + $0x574] sm:$0xf0]  ;;  %v7623_v29 = vld [vmem:[#allocation12 + $0x1f8] sm:$0xf0] }
 0x26a   : > { %3112 = vmatpush.bf16.msra.mxu1 %v8066_v35  ;;  %3124 = vmatpush.bf16.msra.mxu2 %v8354_v36  ;;  %v8191_v35 = vld [vmem:[#allocation12 + $0x670] sm:$0xf0]  ;;  %v7493_v36 = vld [vmem:[#allocation12 + $0xd8] sm:$0xf]  ;;  %v8070_v19 = vor.u32 %v10452_v10, %v8069_v8 }
 0x26b   : > { %v7494_v49 = vor.u32 %v10308_v39, %v7493_v36  ;;  %v7685_v23 = vld [vmem:[#allocation12 + $0x258] sm:$0xf] }
 0x26c   : > { %v10356_v24 = vld [vmem:[#allocation12 + $0x274] sm:$0xf0] }
 0x26d   : > { %3091 = vmatpush.bf16.msrb.mxu3 %v7394_v46  ;;  %3103 = vmatpush.bf16.msra.mxu0 %v7682_v48  ;;  %v8194_v46 = vor.u32 %v10479_v34, %v8191_v35  ;;  %v10471_v48 = vld [vmem:[#allocation12 + $0x614] sm:$0xf]  ;;  %v8037_v25 = vld [vmem:[#allocation12 + $0x518] sm:$0xf] }
 0x26e   : > { %3113 = vmatpush.bf16.msra.mxu1 %v8034_v50  ;;  %3125 = vmatpush.bf16.msra.mxu2 %v8322_v51  ;;  %v7782_v50 = vor.u32 %v10380_v41, %v7781_v40  ;;  %v8159_v51 = vld [vmem:[#allocation12 + $0x630] sm:$0xf0]  ;;  %v7653_v34 = vld [vmem:[#allocation12 + $0x218] sm:$0xf] }
 0x26f   : > { %v10348_v39 = vld [vmem:[#allocation12 + $0x234] sm:$0xf0] }
 0x270   : > { %3092 = vmatmul.bf16.vlgmr.msrb.gmra.mxu3 %v11654_v38  ;;  %v8005_v40 = vld [vmem:[#allocation12 + $0x4d8] sm:$0xf] }
 0x271   : > { %3136 = vmatpush.bf16.msra.mxu3 %v7622_v55  ;;  %3104 = vmatpush.bf16.msra.mxu0 %v7650_v62  ;;  %v2846_v32 = vpop.f32.mrf.mxu0  ;;  %v7749_v55 = vld [vmem:[#allocation12 + $0x2d8] sm:$0xf]  ;;  %v8162_v62 = vor.u32 %v10471_v48, %v8159_v51  ;;  %v10400_v48 = vld [vmem:[#allocation12 + $0x3dc] sm:$0xf] }
 0x272   : > { %3114 = vmatpush.bf16.msra.mxu1 %v8002_v63  ;;  %3126 = vmatpush.bf16.msra.mxu2 %v8290_v0  ;;  %v7462_v63 = vor.u32 %v10300_v53, %v7461_v52  ;;  %v7750_v0 = vor.u32 %v10372_v56, %v7749_v55  ;;  %v10436_v41 = vld [vmem:[#allocation12 + $0x4f4] sm:$0xf0] }
 0x273   : > { %v2833_v37 = vpop.f32.mrf.mxu3  ;;  %v8293_v43 = vld [vmem:[#allocation12 + $0x718] sm:$0xf]  ;;  %v8006_v52 = vor.u32 %v10436_v41, %v8005_v40 }
 0x274   : > { %3105 = vmatmul.bf16.vlgmr.msra.gmra.mxu0 %v11658_v47  ;;  %v2834_v44 = vadd.f32 %v2833_v37, %v1528_v27  ;;  %v10516_v27 = vld [vmem:[#allocation12 + $0x774] sm:$0xf0]  ;;  %v7626_v37 = vor.u32 %v10336_v28, %v7623_v29  ;;  %v10304_v29 = vld [vmem:[#allocation12 + $0xdc] sm:$0xf] }
 0x275   : > { %3137 = vmatpush.bf16.msra.mxu3 %v7590_v3  ;;  %3149 = vmatpush.bf16.msrb.mxu0 %v7878_v4  ;;  %v10292_v3 = vld [vmem:[#allocation12 + $0x74] sm:$0xf0]  ;;  %v8102_v4 = vor.u32 %v10460_v59, %v8101_v57 }
 0x276   : > { %3115 = vmatpush.bf16.msra.mxu1 %v7970_v11  ;;  %3127 = vmatpush.bf16.msra.mxu2 %v8258_v12  ;;  %v11689_v58 = vadd.f32 %v2846_v32, %v2834_v44  ;;  %v8357_v11 = vld [vmem:[#allocation12 + $0x798] sm:$0xf]  ;;  %v7430_v13 = vor.u32 %v10292_v3, %v7429_v2 }
 0x277   : > { %v10524_v12 = vld [vmem:[#allocation12 + $0x7b4] sm:$0xf0] }
 0x278   : > { %v8358_v20 = vor.u32 %v10524_v12, %v8357_v11  ;;  %v10508_v44 = vld [vmem:[#allocation12 + $0x734] sm:$0xf0]  ;;  %v10312_v12 = vld [vmem:[#allocation12 + $0x11c] sm:$0xf] }
 0x279   : > { %3138 = vmatpush.bf16.msra.mxu3 %v7558_v17  ;;  %3150 = vmatpush.bf16.msrb.mxu0 %v7846_v18  ;;  %v2848_v1 = vpop.f32.mrf.mxu0  ;;  %v7397_v17 = vld [vmem:[#allocation12 + $0x18] sm:$0xf]  ;;  %v8294_v53 = vor.u32 %v10508_v44, %v8293_v43 }
 0x27a   : > { %3116 = vmatpush.bf16.msra.mxu1 %v7938_v26  ;;  %3128 = vmatpush.bf16.msra.mxu2 %v8226_v16  ;;  %v10284_v18 = vld [vmem:[#allocation12 + $0x34] sm:$0xf0]  ;;  %v7847_v1 = vld [vmem:[#allocation12 + $0x3b8] sm:$0xf0] }
 0x27b   : > { %v2835_v9 = vpop.f32.mrf.mxu3  ;;  %v10444_v26 = vld [vmem:[#allocation12 + $0x534] sm:$0xf0] }
 0x27c   : > { %v8325_v16 = vld [vmem:[#allocation12 + $0x758] sm:$0xf]  ;;  %v8038_v35 = vor.u32 %v10444_v26, %v8037_v25 }
 0x27d   : > { %3139 = vmatpush.bf16.msra.mxu3 %v7526_v30  ;;  %3151 = vmatpush.bf16.msrb.mxu0 %v7814_v31  ;;  %v11692_v15 = vpop.f32.mrf.mxu1  ;;  %v7398_v30 = vor.u32 %v10284_v18, %v7397_v17  ;;  %v7686_v31 = vor.u32 %v10356_v24, %v7685_v23  ;;  %v8326_v36 = vor.u32 %v10516_v27, %v8325_v16  ;;  %v10428_v55 = vld [vmem:[#allocation12 + $0x4b4] sm:$0xf0]  ;;  %v7815_v17 = vld [vmem:[#allocation12 + $0x378] sm:$0xf0] }
 0x27e   : > { %3117 = vmatpush.bf16.msra.mxu1 %v7906_v45  ;;  %3129 = vmatpush.bf16.msra.mxu2 %v8194_v46  ;;  %v10328_v45 = vld [vmem:[#allocation12 + $0x19c] sm:$0xf]  ;;  %v8261_v60 = vld [vmem:[#allocation12 + $0x6d8] sm:$0xf] }
 0x27f   : > { %v7591_v46 = vld [vmem:[#allocation12 + $0x1b8] sm:$0xf0]  ;;  %v10500_v61 = vld [vmem:[#allocation12 + $0x6f4] sm:$0xf0] }
 0x280   : > { %v7594_v56 = vor.u32 %v10328_v45, %v7591_v46  ;;  %v10420_v6 = vld [vmem:[#allocation12 + $0x474] sm:$0xf0] }
 0x281   : > { %3140 = vmatpush.bf16.msra.mxu3 %v7494_v49  ;;  %3152 = vmatpush.bf16.msrb.mxu0 %v7782_v50  ;;  %v11695_v32 = vpop.f32.mrf.mxu0  ;;  %v7879_v49 = vld [vmem:[#allocation12 + $0x3f8] sm:$0xf0]  ;;  %v7654_v50 = vor.u32 %v10348_v39, %v7653_v34  ;;  %v8229_v10 = vld [vmem:[#allocation12 + $0x698] sm:$0xf] }
 0x282   : > { %3162 = vmatpush.bf16.msrb.mxu1 %v8134_v54  ;;  %3130 = vmatpush.bf16.msra.mxu2 %v8162_v62  ;;  %v7973_v54 = vld [vmem:[#allocation12 + $0x498] sm:$0xf]  ;;  %v7882_v57 = vor.u32 %v10400_v48, %v7879_v49  ;;  %v10320_v62 = vld [vmem:[#allocation12 + $0x15c] sm:$0xf] }
 0x283   : > { %3118 = vmatmul.bf16.vlgmr.msra.gmra.mxu1 %v11662_v21  ;;  %v11697_v42 = vpop.f32.mrf.mxu3  ;;  %v7974_v3 = vor.u32 %v10428_v55, %v7973_v54  ;;  %v10492_v11 = vld [vmem:[#allocation12 + $0x6b4] sm:$0xf0]  ;;  %v7783_v34 = vld [vmem:[#allocation12 + $0x338] sm:$0xf0] }
 0x284   : > { %v7909_v23 = vld [vmem:[#allocation12 + $0x418] sm:$0xf]  ;;  %v8135_v39 = vld [vmem:[#allocation12 + $0x5f8] sm:$0xf0] }
 0x285   : > { %3141 = vmatpush.bf16.msra.mxu3 %v7462_v63  ;;  %3153 = vmatpush.bf16.msrb.mxu0 %v7750_v0  ;;  %v2861_v51 = vpop.f32.mrf.mxu1  ;;  %v7559_v63 = vld [vmem:[#allocation12 + $0x178] sm:$0xf0]  ;;  %v10412_v24 = vld [vmem:[#allocation12 + $0x434] sm:$0xf0] }
 0x286   : > { %3163 = vmatpush.bf16.msrb.mxu1 %v8102_v4  ;;  %3175 = vmatpush.bf16.msrb.mxu2 %v8390_v5  ;;  %v10392_v0 = vld [vmem:[#allocation12 + $0x39c] sm:$0xf]  ;;  %v8262_v4 = vor.u32 %v10500_v61, %v8261_v60  ;;  %v7941_v5 = vld [vmem:[#allocation12 + $0x458] sm:$0xf]  ;;  %v7562_v7 = vor.u32 %v10320_v62, %v7559_v63  ;;  %v7910_v40 = vor.u32 %v10412_v24, %v7909_v23 }
 0x287   : > { %3131 = vmatmul.bf16.vlgmr.msra.gmra.mxu2 %v11666_v33  ;;  %v11699_v59 = vpop.f32.mrf.mxu2  ;;  %v7850_v8 = vor.u32 %v10392_v0, %v7847_v1  ;;  %v8197_v27 = vld [vmem:[#allocation12 + $0x658] sm:$0xf]  ;;  %v10296_v48 = vld [vmem:[#allocation12 + $0x9c] sm:$0xf] }
 0x288   : > { %v10484_v28 = vld [vmem:[#allocation12 + $0x674] sm:$0xf0]  ;;  %v7463_v49 = vld [vmem:[#allocation12 + $0xb8] sm:$0xf0] }
 0x289   : > { %3142 = vmatpush.bf16.msra.mxu3 %v7430_v13  ;;  %3154 = vmatpush.bf16.msrb.mxu0 %v7718_v14  ;;  %v2900_v2 = vpop.f32.mrf.mxu0  ;;  %v7527_v13 = vld [vmem:[#allocation12 + $0x138] sm:$0xf0]  ;;  %v8198_v41 = vor.u32 %v10484_v28, %v8197_v27  ;;  %v10476_v46 = vld [vmem:[#allocation12 + $0x634] sm:$0xf0]  ;;  %v7466_v61 = vor.u32 %v10296_v48, %v7463_v49 }
 0x28a   : > { %3164 = vmatpush.bf16.msrb.mxu1 %v8070_v19  ;;  %3176 = vmatpush.bf16.msrb.mxu2 %v8358_v20  ;;  %v10384_v14 = vld [vmem:[#allocation12 + $0x35c] sm:$0xf]  ;;  %v7942_v19 = vor.u32 %v10420_v6, %v7941_v5  ;;  %v8230_v20 = vor.u32 %v10492_v11, %v8229_v10  ;;  %v7530_v25 = vor.u32 %v10312_v12, %v7527_v13 }
 0x28b   : > { %v2887_v9 = vpop.f32.mrf.mxu3  ;;  %v7818_v26 = vor.u32 %v10384_v14, %v7815_v17  ;;  %v10368_v51 = vld [vmem:[#allocation12 + $0x2dc] sm:$0xf] }
 0x28c   : > { %v8103_v55 = vld [vmem:[#allocation12 + $0x5b8] sm:$0xf0] }
 0x28d   : > { %3143 = vmatpush.bf16.msra.mxu3 %v7398_v30  ;;  %3155 = vmatpush.bf16.msrb.mxu0 %v7686_v31  ;;  %v11703_v18 = vpop.f32.mrf.mxu1  ;;  %v7495_v30 = vld [vmem:[#allocation12 + $0xf8] sm:$0xf0] }
 0x28e   : > { %3165 = vmatpush.bf16.msrb.mxu1 %v8038_v35  ;;  %3177 = vmatpush.bf16.msrb.mxu2 %v8326_v36  ;;  %v10376_v31 = vld [vmem:[#allocation12 + $0x31c] sm:$0xf]  ;;  %v7498_v43 = vor.u32 %v10304_v29, %v7495_v30  ;;  %v8593_v29 = vld [vmem:[#allocation15 + $0x188] sm:$0xf]  ;;  %v10585_v30 = vld [vmem:[#allocation15 + $0x1a0] sm:$0xf0] }
 0x28f   : > { %v2874_v16 = vpop.f32.mrf.mxu2  ;;  %v10464_v36 = vld [vmem:[#allocation12 + $0x5dc] sm:$0xf]  ;;  %v7786_v44 = vor.u32 %v10376_v31, %v7783_v34 }
 0x290   : > { %3144 = vmatmul.bf16.vlgmr.msra.gmra.mxu3 %v11654_v38  ;;  %v10288_v0 = vld [vmem:[#allocation12 + $0x5c] sm:$0xf] }
 0x291   : > { %3188 = vmatpush.bf16.msrb.mxu3 %v7626_v37  ;;  %3156 = vmatpush.bf16.msrb.mxu0 %v7654_v50  ;;  %v11705_v35 = vpop.f32.mrf.mxu0  ;;  %v8165_v37 = vld [vmem:[#allocation12 + $0x618] sm:$0xf]  ;;  %v8138_v50 = vor.u32 %v10464_v36, %v8135_v39  ;;  %v7431_v1 = vld [vmem:[#allocation12 + $0x78] sm:$0xf0] }
 0x292   : > { %3166 = vmatpush.bf16.msrb.mxu1 %v8006_v52  ;;  %3178 = vmatpush.bf16.msrb.mxu2 %v8294_v53  ;;  %v7751_v52 = vld [vmem:[#allocation12 + $0x2f8] sm:$0xf0]  ;;  %v8166_v60 = vor.u32 %v10476_v46, %v8165_v37  ;;  %v7434_v11 = vor.u32 %v10288_v0, %v7431_v1  ;;  %v8594_v46 = vor.u32 %v10585_v30, %v8593_v29 }
 0x293   : > { %v11707_v45 = vpop.f32.mrf.mxu3  ;;  %v10456_v53 = vld [vmem:[#allocation12 + $0x59c] sm:$0xf]  ;;  %v7754_v62 = vor.u32 %v10368_v51, %v7751_v52  ;;  %v10578_v51 = vld [vmem:[#allocation15 + $0x168] sm:$0xf0]  ;;  %v8817_v52 = vld [vmem:[#allocation15 + $0x348] sm:$0xf] }
 0x294   : > { %3157 = vmatmul.bf16.vlgmr.msrb.gmra.mxu0 %v11658_v47  ;;  %v8106_v2 = vor.u32 %v10456_v53, %v8103_v55  ;;  %v7719_v5 = vld [vmem:[#allocation12 + $0x2b8] sm:$0xf0]  ;;  %v10641_v53 = vld [vmem:[#allocation15 + $0x360] sm:$0xf0] }
 0x295   : > { %3189 = vmatpush.bf16.msrb.mxu3 %v7594_v56  ;;  %3201 = vmatpush.bf16.msra.mxu0 %v7882_v57  ;;  %v2913_v54 = vpop.f32.mrf.mxu1  ;;  %v10528_v56 = vld [vmem:[#allocation12 + $0x7dc] sm:$0xf] }
 0x296   : > { %3167 = vmatpush.bf16.msrb.mxu1 %v7974_v3  ;;  %3179 = vmatpush.bf16.msrb.mxu2 %v8262_v4  ;;  %v8391_v57 = vld [vmem:[#allocation12 + $0x7f8] sm:$0xf0] }
 0x297   : > { %v11709_v63 = vpop.f32.mrf.mxu2  ;;  %v8394_v3 = vor.u32 %v10528_v56, %v8391_v57  ;;  %v10360_v4 = vld [vmem:[#allocation12 + $0x29c] sm:$0xf] }
 0x298   : > { %v10448_v6 = vld [vmem:[#allocation12 + $0x55c] sm:$0xf]  ;;  %v7722_v12 = vor.u32 %v10360_v4, %v7719_v5  ;;  %v8789_v5 = vld [vmem:[#allocation15 + $0x310] sm:$0xf] }
 0x299   : > { %3190 = vmatpush.bf16.msrb.mxu3 %v7562_v7  ;;  %3202 = vmatpush.bf16.msra.mxu0 %v7850_v8  ;;  %v2952_v7 = vpop.f32.mrf.mxu0  ;;  %v8071_v8 = vld [vmem:[#allocation12 + $0x578] sm:$0xf0] }
 0x29a   : > { %3168 = vmatpush.bf16.msrb.mxu1 %v7942_v19  ;;  %3180 = vmatpush.bf16.msrb.mxu2 %v8230_v20  ;;  %v10520_v9 = vld [vmem:[#allocation12 + $0x79c] sm:$0xf]  ;;  %v8074_v19 = vor.u32 %v10448_v6, %v8071_v8  ;;  %v10634_v6 = vld [vmem:[#allocation15 + $0x328] sm:$0xf0] }
 0x29b   : > { %v8359_v10 = vld [vmem:[#allocation12 + $0x7b8] sm:$0xf0]  ;;  %v2939_v13 = vpop.f32.mrf.mxu3 }
 0x29c   : > { %v10280_v14 = vld [vmem:[#allocation12 + $0x1c] sm:$0xf]  ;;  %v8362_v20 = vor.u32 %v10520_v9, %v8359_v10  ;;  %v8790_v13 = vor.u32 %v10634_v6, %v8789_v5 }
 0x29d   : > { %3191 = vmatpush.bf16.msrb.mxu3 %v7530_v25  ;;  %3203 = vmatpush.bf16.msra.mxu0 %v7818_v26  ;;  %v7399_v17 = vld [vmem:[#allocation12 + $0x38] sm:$0xf0] }
 0x29e   : > { %3169 = vmatpush.bf16.msrb.mxu1 %v7910_v40  ;;  %3181 = vmatpush.bf16.msrb.mxu2 %v8198_v41  ;;  %v10352_v23 = vld [vmem:[#allocation12 + $0x25c] sm:$0xf]  ;;  %v7402_v31 = vor.u32 %v10280_v14, %v7399_v17 }
 0x29f   : > { %v7687_v24 = vld [vmem:[#allocation12 + $0x278] sm:$0xf0]  ;;  %v2926_v36 = vpop.f32.mrf.mxu2 }
 0x2a0   : > { %v10440_v25 = vld [vmem:[#allocation12 + $0x51c] sm:$0xf]  ;;  %v11713_v28 = vpop.f32.mrf.mxu1  ;;  %v7690_v34 = vor.u32 %v10352_v23, %v7687_v24  ;;  %v1529_v24 = vperm.slane %v11685_v22, 1  ;;  %v8481_v36 = vld [vmem:[#allocation15 + $0xa8] sm:$0xf] }
 0x2a1   : > { %3192 = vmatpush.bf16.msrb.mxu3 %v7498_v43  ;;  %3204 = vmatpush.bf16.msra.mxu0 %v7786_v44  ;;  %v8039_v26 = vld [vmem:[#allocation12 + $0x538] sm:$0xf0] }
 0x2a2   : > { %3214 = vmatpush.bf16.msra.mxu1 %v8138_v50  ;;  %3182 = vmatpush.bf16.msrb.mxu2 %v8166_v60  ;;  %v10512_v16 = vld [vmem:[#allocation12 + $0x75c] sm:$0xf]  ;;  %v8042_v40 = vor.u32 %v10440_v25, %v8039_v26  ;;  %v8565_v50 = vld [vmem:[#allocation15 + $0x150] sm:$0xf] }
 0x2a3   : > { %3170 = vmatmul.bf16.vlgmr.msrb.gmra.mxu1 %v11662_v21  ;;  %v8327_v27 = vld [vmem:[#allocation12 + $0x778] sm:$0xf0] }
 0x2a4   : > { %v10344_v39 = vld [vmem:[#allocation12 + $0x21c] sm:$0xf]  ;;  %v8330_v41 = vor.u32 %v10512_v16, %v8327_v27 }
 0x2a5   : > { %3193 = vmatpush.bf16.msrb.mxu3 %v7466_v61  ;;  %3205 = vmatpush.bf16.msra.mxu0 %v7754_v62  ;;  %v7655_v37 = vld [vmem:[#allocation12 + $0x238] sm:$0xf0]  ;;  %v8566_v61 = vor.u32 %v10578_v51, %v8565_v50  ;;  %v8818_v62 = vor.u32 %v10641_v53, %v8817_v52  ;;  %v2886_v50 = vadd.f32 %v11697_v42, %v1529_v24 }
 0x2a6   : > { %3215 = vmatpush.bf16.msra.mxu1 %v8106_v2  ;;  %3227 = vmatpush.bf16.msra.mxu2 %v8394_v3  ;;  %v10432_v43 = vld [vmem:[#allocation12 + $0x4dc] sm:$0xf]  ;;  %v7658_v54 = vor.u32 %v10344_v39, %v7655_v37  ;;  %v8537_v2 = vld [vmem:[#allocation15 + $0x118] sm:$0xf]  ;;  %v10557_v39 = vld [vmem:[#allocation15 + $0xc0] sm:$0xf0] }
 0x2a7   : > { %3183 = vmatmul.bf16.vlgmr.msrb.gmra.mxu2 %v11666_v33  ;;  %v8007_v44 = vld [vmem:[#allocation12 + $0x4f8] sm:$0xf0]  ;;  %v9041_v37 = vld [vmem:[#allocation15 + $0x508] sm:$0xf]  ;;  %v8482_v51 = vor.u32 %v10557_v39, %v8481_v36  ;;  %v2899_v5 = vadd.f32 %v11695_v32, %v2886_v50  ;;  %v10746_v32 = vld [vmem:[#allocation15 + $0x6a8] sm:$0xf0] }
 0x2a8   : > { %v10504_v48 = vld [vmem:[#allocation12 + $0x71c] sm:$0xf]  ;;  %v8010_v55 = vor.u32 %v10432_v43, %v8007_v44  ;;  %v2965_v3 = vpop.f32.mrf.mxu1  ;;  %v10697_v43 = vld [vmem:[#allocation15 + $0x520] sm:$0xf0]  ;;  %v9209_v36 = vld [vmem:[#allocation15 + $0x658] sm:$0xf] }
 0x2a9   : > { %3194 = vmatpush.bf16.msrb.mxu3 %v7434_v11  ;;  %3206 = vmatpush.bf16.msra.mxu0 %v7722_v12  ;;  %v8295_v49 = vld [vmem:[#allocation12 + $0x738] sm:$0xf0]  ;;  %v10753_v3 = vld [vmem:[#allocation15 + $0x6e0] sm:$0xf0] }
 0x2aa   : > { %3216 = vmatpush.bf16.msra.mxu1 %v8074_v19  ;;  %3228 = vmatpush.bf16.msra.mxu2 %v8362_v20  ;;  %v8298_v56 = vor.u32 %v10504_v48, %v8295_v49  ;;  %v10424_v57 = vld [vmem:[#allocation12 + $0x49c] sm:$0xf]  ;;  %v11716_v9 = vpop.f32.mrf.mxu2  ;;  %v10564_v19 = vld [vmem:[#allocation15 + $0xf8] sm:$0xf0]  ;;  %v8761_v20 = vld [vmem:[#allocation15 + $0x2d8] sm:$0xf] }
 0x2ab   : > { %v7975_v60 = vld [vmem:[#allocation12 + $0x4b8] sm:$0xf0] }
 0x2ac   : > { %v10496_v0 = vld [vmem:[#allocation12 + $0x6dc] sm:$0xf]  ;;  %v7978_v7 = vor.u32 %v10424_v57, %v7975_v60  ;;  %v2860_v57 = vadd.f32 %v11692_v15, %v11689_v58  ;;  %v9042_v60 = vor.u32 %v10697_v43, %v9041_v37  ;;  %v10809_v37 = vld [vmem:[#allocation15 + $0x8a0] sm:$0xf0] }
 0x2ad   : > { %3195 = vmatpush.bf16.msrb.mxu3 %v7402_v31  ;;  %3207 = vmatpush.bf16.msra.mxu0 %v7690_v34  ;;  %v8263_v1 = vld [vmem:[#allocation12 + $0x6f8] sm:$0xf0] }
 0x2ae   : > { %3217 = vmatpush.bf16.msra.mxu1 %v8042_v40  ;;  %3229 = vmatpush.bf16.msra.mxu2 %v8330_v41  ;;  %v10571_v4 = vld [vmem:[#allocation15 + $0x130] sm:$0xf0]  ;;  %v8266_v8 = vor.u32 %v10496_v0, %v8263_v1  ;;  %v10620_v40 = vld [vmem:[#allocation15 + $0x2b8] sm:$0xf0]  ;;  %v9013_v0 = vld [vmem:[#allocation15 + $0x4d0] sm:$0xf]  ;;  %v2873_v42 = vadd.f32 %v11699_v59, %v2860_v57 }
 0x2af   : > { %v10416_v10 = vld [vmem:[#allocation12 + $0x45c] sm:$0xf]  ;;  %v8538_v12 = vor.u32 %v10571_v4, %v8537_v2  ;;  %v10690_v1 = vld [vmem:[#allocation15 + $0x4e8] sm:$0xf0]  ;;  %v9265_v2 = vld [vmem:[#allocation15 + $0x6c8] sm:$0xf] }
 0x2b0   : > { %3196 = vmatmul.bf16.vlgmr.msrb.gmra.mxu3 %v11654_v38  ;;  %v7943_v11 = vld [vmem:[#allocation12 + $0x478] sm:$0xf0]  ;;  %v8509_v38 = vld [vmem:[#allocation15 + $0xe0] sm:$0xf]  ;;  %v9014_v15 = vor.u32 %v10690_v1, %v9013_v0  ;;  %v10865_v0 = vld [vmem:[#allocation15 + $0xa60] sm:$0xf0] }
 0x2b1   : > { %6096 = vmatpush.bf16.msra.mxu3 %v8594_v46  ;;  %3208 = vmatpush.bf16.msra.mxu0 %v7658_v54  ;;  %v10488_v14 = vld [vmem:[#allocation12 + $0x69c] sm:$0xf]  ;;  %v7946_v25 = vor.u32 %v10416_v10, %v7943_v11  ;;  %v8510_v29 = vor.u32 %v10564_v19, %v8509_v38  ;;  %v11720_v41 = vpop.f32.mrf.mxu0  ;;  %v9266_v10 = vor.u32 %v10753_v3, %v9265_v2  ;;  %v8677_v11 = vld [vmem:[#allocation15 + $0x230] sm:$0xf]  ;;  %v3240_v19 = vmul.f32 0.2, %v2873_v42 }
 0x2b2   : > { %3218 = vmatpush.bf16.msra.mxu1 %v8010_v55  ;;  %3230 = vmatpush.bf16.msra.mxu2 %v8298_v56  ;;  %v8231_v17 = vld [vmem:[#allocation12 + $0x6b8] sm:$0xf0]  ;;  %v2978_v48 = vpop.f32.mrf.mxu2  ;;  %v8453_v55 = vld [vmem:[#allocation15 + $0x70] sm:$0xf]  ;;  %v10550_v56 = vld [vmem:[#allocation15 + $0x88] sm:$0xf0] }
 0x2b3   : > { %v10627_v23 = vld [vmem:[#allocation15 + $0x2f0] sm:$0xf0]  ;;  %v8234_v26 = vor.u32 %v10488_v14, %v8231_v17  ;;  %v11723_v53 = vpop.f32.mrf.mxu3  ;;  %v8454_v6 = vor.u32 %v10550_v56, %v8453_v55  ;;  %v2912_v14 = vadd.f32 %v11703_v18, %v2899_v5  ;;  %v9237_v38 = vld [vmem:[#allocation15 + $0x690] sm:$0xf]  ;;  %v10669_v55 = vld [vmem:[#allocation15 + $0x440] sm:$0xf0] }
 0x2b4   : > { %3209 = vmatmul.bf16.vlgmr.msra.gmra.mxu0 %v11658_v47  ;;  %v10408_v16 = vld [vmem:[#allocation12 + $0x41c] sm:$0xf]  ;;  %v8762_v30 = vor.u32 %v10627_v23, %v8761_v20  ;;  %v8733_v47 = vld [vmem:[#allocation15 + $0x2a0] sm:$0xf]  ;;  %v1530_v20 = vperm.slane %v11685_v22, 2  ;;  %v9238_v18 = vor.u32 %v10746_v32, %v9237_v38 }
 0x2b5   : > { %6097 = vmatpush.bf16.msra.mxu3 %v8566_v61  ;;  %6109 = vmatpush.bf16.msrb.mxu0 %v8818_v62  ;;  %v7911_v27 = vld [vmem:[#allocation12 + $0x438] sm:$0xf0]  ;;  %v8734_v52 = vor.u32 %v10620_v40, %v8733_v47  ;;  %v8705_v61 = vld [vmem:[#allocation15 + $0x268] sm:$0xf]  ;;  %v10613_v62 = vld [vmem:[#allocation15 + $0x280] sm:$0xf0]  ;;  %v2925_v23 = vadd.f32 %v11709_v63, %v2912_v14  ;;  %v3248_v63 = vmax.f32 %v2873_v42, %v3240_v19 }
 0x2b6   : > { %3219 = vmatpush.bf16.msra.mxu1 %v7978_v7  ;;  %3231 = vmatpush.bf16.msra.mxu2 %v8266_v8  ;;  %v10480_v31 = vld [vmem:[#allocation12 + $0x65c] sm:$0xf]  ;;  %v7914_v44 = vor.u32 %v10408_v16, %v7911_v27  ;;  %v8706_v7 = vor.u32 %v10613_v62, %v8705_v61  ;;  %v8425_v8 = vld [vmem:[#allocation15 + $0x38] sm:$0xf]  ;;  %v8397_v16 = vld [vmem:[#allocation15] sm:$0xf]  ;;  %v2938_v50 = vadd.f32 %v11707_v45, %v1530_v20 }
 0x2b7   : > { %v8199_v34 = vld [vmem:[#allocation12 + $0x678] sm:$0xf0]  ;;  %v10536_v27 = vld [vmem:[#allocation15 + $0x18] sm:$0xf0]  ;;  %v9489_v40 = vld [vmem:[#allocation15 + $0x888] sm:$0xf]  ;;  %v11738_v1 = vpack.c.bf16 %v3248_v63, %v3248_v63 }
 0x2b8   : > { %v8202_v46 = vor.u32 %v10480_v31, %v8199_v34  ;;  %v10472_v49 = vld [vmem:[#allocation12 + $0x61c] sm:$0xf]  ;;  %v8957_v31 = vld [vmem:[#allocation15 + $0x460] sm:$0xf]  ;;  %v10676_v34 = vld [vmem:[#allocation15 + $0x478] sm:$0xf0]  ;;  %v9490_v56 = vor.u32 %v10809_v37, %v9489_v40  ;;  %v2951_v3 = vadd.f32 %v11705_v35, %v2938_v50 }
 0x2b9   : > { %6098 = vmatpush.bf16.msra.mxu3 %v8538_v12  ;;  %6110 = vmatpush.bf16.msrb.mxu0 %v8790_v13  ;;  %v8167_v54 = vld [vmem:[#allocation12 + $0x638] sm:$0xf0]  ;;  %v10606_v12 = vld [vmem:[#allocation15 + $0x248] sm:$0xf0]  ;;  %v8985_v13 = vld [vmem:[#allocation15 + $0x498] sm:$0xf]  ;;  %v3004_v59 = vpop.f32.mrf.mxu0 }
 0x2ba   : > { %3220 = vmatpush.bf16.msra.mxu1 %v7946_v25  ;;  %3232 = vmatpush.bf16.msra.mxu2 %v8234_v26  ;;  %v8170_v4 = vor.u32 %v10472_v49, %v8167_v54  ;;  %v10543_v58 = vld [vmem:[#allocation15 + $0x50] sm:$0xf0]  ;;  %v8678_v25 = vor.u32 %v10606_v12, %v8677_v11  ;;  %v3241_v43 = vmul.f32 0.2, %v2925_v23  ;;  %v8621_v49 = vld [vmem:[#allocation15 + $0x1c0] sm:$0xf]  ;;  %v2964_v12 = vadd.f32 %v11713_v28, %v2951_v3 }
 0x2bb   : > { %v10683_v17 = vld [vmem:[#allocation15 + $0x4b0] sm:$0xf0]  ;;  %v8426_v24 = vor.u32 %v10543_v58, %v8425_v8  ;;  %v2991_v26 = vpop.f32.mrf.mxu3  ;;  %v8929_v54 = vld [vmem:[#allocation15 + $0x428] sm:$0xf]  ;;  %v9181_v57 = vld [vmem:[#allocation15 + $0x620] sm:$0xf] }
 0x2bc   : > { %v10739_v39 = vld [vmem:[#allocation15 + $0x670] sm:$0xf0]  ;;  %v9461_v61 = vld [vmem:[#allocation15 + $0x850] sm:$0xf]  ;;  %v10802_v62 = vld [vmem:[#allocation15 + $0x868] sm:$0xf0]  ;;  %v3249_v2 = vmax.f32 %v2925_v23, %v3241_v43  ;;  %v8930_v42 = vor.u32 %v10669_v55, %v8929_v54  ;;  %v2977_v38 = vadd.f32 %v11716_v9, %v2964_v12 }
 0x2bd   : > { %6099 = vmatpush.bf16.msra.mxu3 %v8510_v29  ;;  %6111 = vmatpush.bf16.msrb.mxu0 %v8762_v30  ;;  %v8649_v29 = vld [vmem:[#allocation15 + $0x1f8] sm:$0xf]  ;;  %v10599_v30 = vld [vmem:[#allocation15 + $0x210] sm:$0xf0]  ;;  %v8901_v5 = vld [vmem:[#allocation15 + $0x3f0] sm:$0xf]  ;;  %v9462_v8 = vor.u32 %v10802_v62, %v9461_v61 }
 0x2be   : > { %3221 = vmatpush.bf16.msra.mxu1 %v7914_v44  ;;  %3233 = vmatpush.bf16.msra.mxu2 %v8202_v46  ;;  %v1531_v44 = vperm.slane %v11685_v22, 3  ;;  %v8398_v46 = vor.u32 %v10536_v27, %v8397_v16  ;;  %v8650_v48 = vor.u32 %v10599_v30, %v8649_v29  ;;  %v9713_v22 = vld [vmem:[#allocation15 + $0xa48] sm:$0xf]  ;;  %v10795_v35 = vld [vmem:[#allocation15 + $0x830] sm:$0xf0] }
 0x2bf   : > { %v9153_v58 = vld [vmem:[#allocation15 + $0x5e8] sm:$0xf]  ;;  %v9714_v11 = vor.u32 %v10865_v0, %v9713_v22  ;;  %v9685_v14 = vld [vmem:[#allocation15 + $0xa10] sm:$0xf]  ;;  %v10858_v59 = vld [vmem:[#allocation15 + $0xa28] sm:$0xf0] }
 0x2c0   : > { %v11734_v47 = vpop.f32.mrf.mxu1  ;;  %v8873_v20 = vld [vmem:[#allocation15 + $0x3b8] sm:$0xf]  ;;  %v10655_v23 = vld [vmem:[#allocation15 + $0x3d0] sm:$0xf0]  ;;  %v10718_v26 = vld [vmem:[#allocation15 + $0x5c8] sm:$0xf0]  ;;  %v9686_v27 = vor.u32 %v10858_v59, %v9685_v14 }
 0x2c1   : > { %6100 = vmatpush.bf16.msra.mxu3 %v8482_v51  ;;  %6112 = vmatpush.bf16.msrb.mxu0 %v8734_v52  ;;  %v9210_v51 = vor.u32 %v10739_v39, %v9209_v36  ;;  %v10592_v52 = vld [vmem:[#allocation15 + $0x1d8] sm:$0xf0]  ;;  %v9405_v16 = vld [vmem:[#allocation15 + $0x7e0] sm:$0xf]  ;;  %v9657_v9 = vld [vmem:[#allocation15 + $0x9d8] sm:$0xf] }
 0x2c2   : > { %6122 = vmatpush.bf16.msrb.mxu1 %v9042_v60  ;;  %3234 = vmatpush.bf16.msra.mxu2 %v8170_v4  ;;  %v10732_v60 = vld [vmem:[#allocation15 + $0x638] sm:$0xf0]  ;;  %v8622_v45 = vor.u32 %v10592_v52, %v8621_v49  ;;  %v3242_v30 = vmul.f32 0.2, %v2977_v38  ;;  %v9097_v40 = vld [vmem:[#allocation15 + $0x578] sm:$0xf] }
 0x2c3   : > { %3222 = vmatmul.bf16.vlgmr.msra.gmra.mxu1 %v11662_v21  ;;  %v8986_v21 = vor.u32 %v10683_v17, %v8985_v13  ;;  %v9182_v4 = vor.u32 %v10732_v60, %v9181_v57  ;;  %v11744_v17 = vpack.c.bf16 %v3249_v2, %v3249_v2  ;;  %v10648_v36 = vld [vmem:[#allocation15 + $0x398] sm:$0xf0]  ;;  %v10711_v37 = vld [vmem:[#allocation15 + $0x590] sm:$0xf0]  ;;  %v9377_v43 = vld [vmem:[#allocation15 + $0x7a8] sm:$0xf] }
 0x2c4   : > { %v10844_v49 = vld [vmem:[#allocation15 + $0x9b8] sm:$0xf0]  ;;  %v9069_v54 = vld [vmem:[#allocation15 + $0x540] sm:$0xf]  ;;  %v9937_v55 = vld [vmem:[#allocation15 + $0xc08] sm:$0xf] }
 0x2c5   : > { %6101 = vmatpush.bf16.msra.mxu3 %v8454_v6  ;;  %6113 = vmatpush.bf16.msrb.mxu0 %v8706_v7  ;;  %v10662_v6 = vld [vmem:[#allocation15 + $0x408] sm:$0xf0]  ;;  %v2990_v7 = vadd.f32 %v11723_v53, %v1531_v44  ;;  %v10704_v62 = vld [vmem:[#allocation15 + $0x558] sm:$0xf0]  ;;  %v9349_v22 = vld [vmem:[#allocation15 + $0x770] sm:$0xf] }
 0x2c6   : > { %6123 = vmatpush.bf16.msrb.mxu1 %v9014_v15  ;;  %6135 = vmatpush.bf16.msrb.mxu2 %v9266_v10  ;;  %v10725_v15 = vld [vmem:[#allocation15 + $0x600] sm:$0xf0]  ;;  %v9433_v10 = vld [vmem:[#allocation15 + $0x818] sm:$0xf]  ;;  %v8902_v53 = vor.u32 %v10662_v6, %v8901_v5  ;;  %v10774_v2 = vld [vmem:[#allocation15 + $0x788] sm:$0xf0]  ;;  %v9070_v5 = vor.u32 %v10704_v62, %v9069_v54 }
 0x2c7   : > { %3235 = vmatmul.bf16.vlgmr.msra.gmra.mxu2 %v11666_v33  ;;  %v8958_v33 = vor.u32 %v10676_v34, %v8957_v31  ;;  %v9154_v32 = vor.u32 %v10725_v15, %v9153_v58  ;;  %v3003_v28 = vadd.f32 %v11720_v41, %v2990_v7  ;;  %v8874_v31 = vor.u32 %v10655_v23, %v8873_v20  ;;  %v8845_v41 = vld [vmem:[#allocation15 + $0x380] sm:$0xf]  ;;  %v10837_v3 = vld [vmem:[#allocation15 + $0x980] sm:$0xf0]  ;;  %v9909_v6 = vld [vmem:[#allocation15 + $0xbd0] sm:$0xf] }
 0x2c8   : > { %v3017_v13 = vpop.f32.mrf.mxu1  ;;  %v10914_v7 = vld [vmem:[#allocation15 + $0xbe8] sm:$0xf0]  ;;  %v9350_v58 = vor.u32 %v10774_v2, %v9349_v22  ;;  %v9321_v15 = vld [vmem:[#allocation15 + $0x738] sm:$0xf]  ;;  %v9573_v12 = vld [vmem:[#allocation15 + $0x930] sm:$0xf] }
 0x2c9   : > { %6102 = vmatpush.bf16.msra.mxu3 %v8426_v24  ;;  %6114 = vmatpush.bf16.msrb.mxu0 %v8678_v25  ;;  %v9434_v24 = vor.u32 %v10795_v35, %v9433_v10  ;;  %v9125_v25 = vld [vmem:[#allocation15 + $0x5b0] sm:$0xf]  ;;  %v3016_v29 = vadd.f32 %v11734_v47, %v3003_v28  ;;  %v3250_v47 = vmax.f32 %v2977_v38, %v3242_v30  ;;  %v10830_v13 = vld [vmem:[#allocation15 + $0x948] sm:$0xf0]  ;;  %v9881_v59 = vld [vmem:[#allocation15 + $0xb98] sm:$0xf] }
 0x2ca   : > { %6124 = vmatpush.bf16.msrb.mxu1 %v8986_v21  ;;  %6136 = vmatpush.bf16.msrb.mxu2 %v9238_v18  ;;  %v3028_v19 = vpop.f32.mrf.mxu2  ;;  %v10788_v21 = vld [vmem:[#allocation15 + $0x7f8] sm:$0xf0]  ;;  %v10851_v18 = vld [vmem:[#allocation15 + $0x9f0] sm:$0xf0]  ;;  %v9126_v34 = vor.u32 %v10718_v26, %v9125_v25  ;;  %v9910_v35 = vor.u32 %v10914_v7, %v9909_v6  ;;  %v9293_v20 = vld [vmem:[#allocation15 + $0x700] sm:$0xf]  ;;  %v9574_v23 = vor.u32 %v10830_v13, %v9573_v12 }
 0x2cb   : > { %v3029_v39 = vadd.f32 %v3028_v19, %v3016_v29  ;;  %v9406_v63 = vor.u32 %v10788_v21, %v9405_v16  ;;  %v9658_v44 = vor.u32 %v10851_v18, %v9657_v9  ;;  %v10907_v38 = vld [vmem:[#allocation15 + $0xbb0] sm:$0xf0]  ;;  %v10760_v28 = vld [vmem:[#allocation15 + $0x718] sm:$0xf0]  ;;  %v10582_v21 = vld [vmem:[#allocation15 + $0x18c] sm:$0xf] }
 0x2cc   : > { %v10823_v25 = vld [vmem:[#allocation15 + $0x910] sm:$0xf0]  ;;  %v9882_v26 = vor.u32 %v10907_v38, %v9881_v59  ;;  %v11757_v16 = vld [vmem:[#allocation13] sm:$0xff]  ;;  %v8595_v9 = vld [vmem:[#allocation15 + $0x1a4] sm:$0xf0] }
 0x2cd   : > { %6103 = vmatpush.bf16.msra.mxu3 %v8398_v46  ;;  %6115 = vmatpush.bf16.msrb.mxu0 %v8650_v48  ;;  %v10781_v46 = vld [vmem:[#allocation15 + $0x7c0] sm:$0xf0]  ;;  %v9629_v48 = vld [vmem:[#allocation15 + $0x9a0] sm:$0xf]  ;;  %v3243_v57 = vmul.f32 0.2, %v3029_v39 }
 0x2ce   : > { %6125 = vmatpush.bf16.msrb.mxu1 %v8958_v33  ;;  %6137 = vmatpush.bf16.msrb.mxu2 %v9210_v51  ;;  %v8846_v33 = vor.u32 %v10648_v36, %v8845_v41  ;;  %v9098_v51 = vor.u32 %v10711_v37, %v9097_v40  ;;  %v9378_v60 = vor.u32 %v10781_v46, %v9377_v43  ;;  %v9853_v29 = vld [vmem:[#allocation15 + $0xb60] sm:$0xf]  ;;  %v10900_v30 = vld [vmem:[#allocation15 + $0xb78] sm:$0xf0]  ;;  %v10575_v36 = vld [vmem:[#allocation15 + $0x154] sm:$0xf] }
 0x2cf   : > { %v9630_v0 = vor.u32 %v10844_v49, %v9629_v48  ;;  %v8598_v41 = vor.u32 %v10582_v21, %v8595_v9  ;;  %v9854_v40 = vor.u32 %v10900_v30, %v9853_v29  ;;  %v8567_v43 = vld [vmem:[#allocation15 + $0x16c] sm:$0xf0]  ;;  %v8819_v46 = vld [vmem:[#allocation15 + $0x364] sm:$0xf0]  ;;  %v10893_v49 = vld [vmem:[#allocation15 + $0xb40] sm:$0xf0] }
 0x2d0   : > { %6104 = vmatmul.bf16.vlgmr.msra.gmra.mxu3 %v11738_v1  ;;  %v9825_v48 = vld [vmem:[#allocation15 + $0xb28] sm:$0xf]  ;;  %v9797_v62 = vld [vmem:[#allocation15 + $0xaf0] sm:$0xf]  ;;  %v10886_v22 = vld [vmem:[#allocation15 + $0xb08] sm:$0xf0] }
 0x2d1   : > { %6148 = vmatpush.bf16.msrb.mxu3 %v9490_v56  ;;  %6116 = vmatpush.bf16.msrb.mxu0 %v8622_v45  ;;  %v11750_v50 = vpop.f32.mrf.mxu0  ;;  %v10921_v56 = vld [vmem:[#allocation15 + $0xc20] sm:$0xf0]  ;;  %v9601_v45 = vld [vmem:[#allocation15 + $0x968] sm:$0xf]  ;;  %v8511_v6 = vld [vmem:[#allocation15 + $0xfc] sm:$0xf0] }
 0x2d2   : > { %6126 = vmatpush.bf16.msrb.mxu1 %v8930_v42  ;;  %6138 = vmatpush.bf16.msrb.mxu2 %v9182_v4  ;;  %v3030_v52 = vpop.f32.mrf.mxu2  ;;  %v9938_v42 = vor.u32 %v10921_v56, %v9937_v55  ;;  %v11752_v4 = vpack.c.bf16 %v3250_v47, %v3250_v47  ;;  %v9602_v10 = vor.u32 %v10837_v3, %v9601_v45  ;;  %v8539_v55 = vld [vmem:[#allocation15 + $0x134] sm:$0xf0]  ;;  %v10631_v56 = vld [vmem:[#allocation15 + $0x314] sm:$0xf]  ;;  %v10561_v3 = vld [vmem:[#allocation15 + $0xe4] sm:$0xf] }
 0x2d3   : > { %v3041_v61 = vpop.f32.mrf.mxu3  ;;  %v10624_v7 = vld [vmem:[#allocation15 + $0x2dc] sm:$0xf]  ;;  %v10554_v12 = vld [vmem:[#allocation15 + $0xac] sm:$0xf]  ;;  %v10617_v59 = vld [vmem:[#allocation15 + $0x2a4] sm:$0xf] }
 0x2d4   : > { %6117 = vmatmul.bf16.vlgmr.msrb.gmra.mxu0 %v11744_v17  ;;  %v8735_v38 = vld [vmem:[#allocation15 + $0x2bc] sm:$0xf0]  ;;  %v10161_v9 = vld [vmem:[#allocation15 + $0xdc8] sm:$0xf]  ;;  %v10694_v29 = vld [vmem:[#allocation15 + $0x50c] sm:$0xf] }
 0x2d5   : > { %6149 = vmatpush.bf16.msrb.mxu3 %v9462_v8  ;;  %6161 = vmatpush.bf16.msra.mxu0 %v9714_v11  ;;  %v3251_v8 = vmax.f32 %v3029_v39, %v3243_v57  ;;  %v10767_v11 = vld [vmem:[#allocation15 + $0x750] sm:$0xf0]  ;;  %v9517_v39 = vld [vmem:[#allocation15 + $0x8c0] sm:$0xf]  ;;  %v8791_v57 = vld [vmem:[#allocation15 + $0x32c] sm:$0xf0]  ;;  %v8738_v21 = vor.u32 %v10617_v59, %v8735_v38 }
 0x2d6   : > { %6127 = vmatpush.bf16.msrb.mxu1 %v8902_v53  ;;  %6139 = vmatpush.bf16.msrb.mxu2 %v9154_v32  ;;  %v9322_v32 = vor.u32 %v10767_v11, %v9321_v15  ;;  %v10879_v15 = vld [vmem:[#allocation15 + $0xad0] sm:$0xf0]  ;;  %v8514_v11 = vor.u32 %v10561_v3, %v8511_v6  ;;  %v8399_v3 = vld [vmem:[#allocation15 + $0x1c] sm:$0xf0]  ;;  %v1533_v6 = vperm.slane %v11757_v16, 5 }
 0x2d7   : > { %v11755_v53 = vpack.c.bf16 %v3251_v8, %v3251_v8  ;;  %v8763_v8 = vld [vmem:[#allocation15 + $0x2f4] sm:$0xf0]  ;;  %v10589_v38 = vld [vmem:[#allocation15 + $0x1c4] sm:$0xf] }
 0x2d8   : > { %v8766_v13 = vor.u32 %v10624_v7, %v8763_v8  ;;  %v10806_v7 = vld [vmem:[#allocation15 + $0x88c] sm:$0xf]  ;;  %v9491_v8 = vld [vmem:[#allocation15 + $0x8a4] sm:$0xf0] }
 0x2d9   : > { %6150 = vmatpush.bf16.msrb.mxu3 %v9434_v24  ;;  %6162 = vmatpush.bf16.msra.mxu0 %v9686_v27  ;;  %v3056_v14 = vpop.f32.mrf.mxu0  ;;  %v9545_v24 = vld [vmem:[#allocation15 + $0x8f8] sm:$0xf]  ;;  %v1532_v27 = vperm.slane %v11757_v16, 4  ;;  %v9494_v59 = vor.u32 %v10806_v7, %v9491_v8 }
 0x2da   : > { %6128 = vmatpush.bf16.msrb.mxu1 %v8874_v31  ;;  %6140 = vmatpush.bf16.msrb.mxu2 %v9126_v34  ;;  %v9294_v31 = vor.u32 %v10760_v28, %v9293_v20  ;;  %v9546_v34 = vor.u32 %v10823_v25, %v9545_v24  ;;  %v8483_v14 = vld [vmem:[#allocation15 + $0xc4] sm:$0xf0]  ;;  %v10872_v20 = vld [vmem:[#allocation15 + $0xa98] sm:$0xf0]  ;;  %v10547_v24 = vld [vmem:[#allocation15 + $0x74] sm:$0xf] }
 0x2db   : > { %v3043_v19 = vpop.f32.mrf.mxu3  ;;  %v3042_v37 = vadd.f32 %v3041_v61, %v1532_v27  ;;  %v8455_v25 = vld [vmem:[#allocation15 + $0x8c] sm:$0xf0]  ;;  %v8486_v27 = vor.u32 %v10554_v12, %v8483_v14  ;;  %v8959_v14 = vld [vmem:[#allocation15 + $0x47c] sm:$0xf0] }
 0x2dc   : > { %v9741_v19 = vld [vmem:[#allocation15 + $0xa80] sm:$0xf] }
 0x2dd   : > { %6151 = vmatpush.bf16.msrb.mxu3 %v9406_v63  ;;  %6163 = vmatpush.bf16.msra.mxu0 %v9658_v44  ;;  %v10816_v63 = vld [vmem:[#allocation15 + $0x8d8] sm:$0xf0]  ;;  %v10638_v44 = vld [vmem:[#allocation15 + $0x34c] sm:$0xf]  ;;  %v3055_v54 = vadd.f32 %v11750_v50, %v3042_v37  ;;  %v9798_v50 = vor.u32 %v10886_v22, %v9797_v62  ;;  %v10533_v62 = vld [vmem:[#allocation15 + $0x4] sm:$0xf] }
 0x2de   : > { %6129 = vmatpush.bf16.msrb.mxu1 %v8846_v33  ;;  %6141 = vmatpush.bf16.msrb.mxu2 %v9098_v51  ;;  %v9518_v47 = vor.u32 %v10816_v63, %v9517_v39  ;;  %v8570_v33 = vor.u32 %v10575_v36, %v8567_v43  ;;  %v10568_v51 = vld [vmem:[#allocation15 + $0x11c] sm:$0xf]  ;;  %v8822_v52 = vor.u32 %v10638_v44, %v8819_v46  ;;  %v9043_v39 = vld [vmem:[#allocation15 + $0x524] sm:$0xf0]  ;;  %v10970_v37 = vld [vmem:[#allocation15 + $0xda8] sm:$0xf0] }
 0x2df   : > { %v8542_v45 = vor.u32 %v10568_v51, %v8539_v55  ;;  %v9046_v63 = vor.u32 %v10694_v29, %v9043_v39  ;;  %v10687_v43 = vld [vmem:[#allocation15 + $0x4d4] sm:$0xf]  ;;  %v8458_v44 = vor.u32 %v10547_v24, %v8455_v25  ;;  %v10540_v46 = vld [vmem:[#allocation15 + $0x3c] sm:$0xf]  ;;  %v8402_v12 = vor.u32 %v10533_v62, %v8399_v3  ;;  %v8931_v29 = vld [vmem:[#allocation15 + $0x444] sm:$0xf0] }
 0x2e0   : > { %v3067_v18 = vpop.f32.mrf.mxu1  ;;  %v10603_v51 = vld [vmem:[#allocation15 + $0x234] sm:$0xf]  ;;  %v10862_v62 = vld [vmem:[#allocation15 + $0xa4c] sm:$0xf] }
 0x2e1   : > { %6152 = vmatpush.bf16.msrb.mxu3 %v9378_v60  ;;  %6164 = vmatpush.bf16.msra.mxu0 %v9630_v0  ;;  %v9826_v60 = vor.u32 %v10893_v49, %v9825_v48  ;;  %v3068_v0 = vadd.f32 %v3067_v18, %v3055_v54  ;;  %v10977_v18 = vld [vmem:[#allocation15 + $0xde0] sm:$0xf0] }
 0x2e2   : > { %6174 = vmatpush.bf16.msra.mxu1 %v9938_v42  ;;  %6142 = vmatpush.bf16.msrb.mxu2 %v9070_v5  ;;  %v8794_v42 = vor.u32 %v10631_v56, %v8791_v57  ;;  %v10162_v36 = vor.u32 %v10977_v18, %v10161_v9  ;;  %v10105_v56 = vld [vmem:[#allocation15 + $0xd58] sm:$0xf]  ;;  %v10963_v57 = vld [vmem:[#allocation15 + $0xd70] sm:$0xf0] }
 0x2e3   : > { %6130 = vmatmul.bf16.vlgmr.msrb.gmra.mxu1 %v11752_v4 }
 0x2e5   : > { %6153 = vmatpush.bf16.msrb.mxu3 %v9350_v58  ;;  %6165 = vmatpush.bf16.msra.mxu0 %v9602_v10  ;;  %v9769_v58 = vld [vmem:[#allocation15 + $0xab8] sm:$0xf] }
 0x2e6   : > { %6175 = vmatpush.bf16.msra.mxu1 %v9910_v35  ;;  %6143 = vmatmul.bf16.vlgmr.msrb.gmra.mxu2 %v11755_v53 }
 0x2e7   : > { %6187 = vmatpush.bf16.msra.mxu2 %v10162_v36 }
 0x2e8   : > { %v3069_v61 = vpop.f32.mrf.mxu1 }
 0x2e9   : > { %6154 = vmatpush.bf16.msrb.mxu3 %v9322_v32  ;;  %6166 = vmatpush.bf16.msra.mxu0 %v9574_v23  ;;  %v9770_v32 = vor.u32 %v10879_v15, %v9769_v58  ;;  %v10077_v58 = vld [vmem:[#allocation15 + $0xd20] sm:$0xf]  ;;  %v10956_v15 = vld [vmem:[#allocation15 + $0xd38] sm:$0xf0] }
 0x2ea   : > { %6176 = vmatpush.bf16.msra.mxu1 %v9882_v26  ;;  %v3080_v2 = vpop.f32.mrf.mxu2 }
 0x2eb   : > { %v3081_v5 = vadd.f32 %v3080_v2, %v3068_v0  ;;  %v10106_v0 = vor.u32 %v10963_v57, %v10105_v56  ;;  %v8987_v2 = vld [vmem:[#allocation15 + $0x4b4] sm:$0xf0] }
 0x2ec   : > { %v8875_v57 = vld [vmem:[#allocation15 + $0x3d4] sm:$0xf0] }
 0x2ed   : > { %6155 = vmatpush.bf16.msrb.mxu3 %v9294_v31  ;;  %6167 = vmatpush.bf16.msra.mxu0 %v9546_v34  ;;  %v3244_v10 = vmul.f32 0.2, %v3081_v5  ;;  %v10610_v31 = vld [vmem:[#allocation15 + $0x26c] sm:$0xf]  ;;  %v8707_v34 = vld [vmem:[#allocation15 + $0x284] sm:$0xf0] }
 0x2ee   : > { %6177 = vmatpush.bf16.msra.mxu1 %v9854_v40  ;;  %v10133_v40 = vld [vmem:[#allocation15 + $0xd90] sm:$0xf]  ;;  %v8710_v48 = vor.u32 %v10610_v31, %v8707_v34  ;;  %v10792_v34 = vld [vmem:[#allocation15 + $0x81c] sm:$0xf] }
 0x2ef   : > { %v3252_v35 = vmax.f32 %v3081_v5, %v3244_v10  ;;  %v10134_v49 = vor.u32 %v10970_v37, %v10133_v40  ;;  %v8651_v5 = vld [vmem:[#allocation15 + $0x214] sm:$0xf0]  ;;  %v10673_v10 = vld [vmem:[#allocation15 + $0x464] sm:$0xf]  ;;  %v10659_v40 = vld [vmem:[#allocation15 + $0x3f4] sm:$0xf] }
 0x2f0   : > { %v8962_v24 = vor.u32 %v10673_v10, %v8959_v14  ;;  %v10771_v14 = vld [vmem:[#allocation15 + $0x774] sm:$0xf] }
 0x2f1   : > { %6200 = vmatpush.bf16.msra.mxu3 %v8598_v41  ;;  %6168 = vmatpush.bf16.msra.mxu0 %v9518_v47  ;;  %v11762_v23 = vpack.c.bf16 %v3252_v35, %v3252_v35  ;;  %v11764_v28 = vpop.f32.mrf.mxu0  ;;  %v9742_v41 = vor.u32 %v10872_v20, %v9741_v19  ;;  %v9015_v47 = vld [vmem:[#allocation15 + $0x4ec] sm:$0xf0]  ;;  %v10078_v35 = vor.u32 %v10956_v15, %v10077_v58  ;;  %v10799_v19 = vld [vmem:[#allocation15 + $0x854] sm:$0xf] }
 0x2f2   : > { %6178 = vmatpush.bf16.msra.mxu1 %v9826_v60  ;;  %v3082_v26 = vpop.f32.mrf.mxu2  ;;  %v9018_v54 = vor.u32 %v10687_v43, %v9015_v47  ;;  %6188 = vmatpush.bf16.msra.mxu2 %v10134_v49  ;;  %v10680_v60 = vld [vmem:[#allocation15 + $0x49c] sm:$0xf]  ;;  %v9463_v20 = vld [vmem:[#allocation15 + $0x86c] sm:$0xf0]  ;;  %v10785_v47 = vld [vmem:[#allocation15 + $0x7e4] sm:$0xf] }
 0x2f3   : > { %v11766_v30 = vpop.f32.mrf.mxu3  ;;  %6156 = vmatmul.bf16.vlgmr.msrb.gmra.mxu3 %v11762_v23  ;;  %v10049_v26 = vld [vmem:[#allocation15 + $0xce8] sm:$0xf]  ;;  %v9466_v31 = vor.u32 %v10799_v19, %v9463_v20 }
 0x2f4   : > { %v3094_v25 = vadd.f32 %v11766_v30, %v1533_v6  ;;  %v10021_v30 = vld [vmem:[#allocation15 + $0xcb0] sm:$0xf]  ;;  %v10645_v6 = vld [vmem:[#allocation15 + $0x384] sm:$0xf] }
 0x2f5   : > { %6201 = vmatpush.bf16.msra.mxu3 %v8570_v33  ;;  %6213 = vmatpush.bf16.msrb.mxu0 %v8822_v52  ;;  %v8427_v33 = vld [vmem:[#allocation15 + $0x54] sm:$0xf0]  ;;  %v8679_v52 = vld [vmem:[#allocation15 + $0x24c] sm:$0xf0] }
 0x2f6   : > { %6179 = vmatpush.bf16.msra.mxu1 %v9798_v50  ;;  %v8430_v61 = vor.u32 %v10540_v46, %v8427_v33  ;;  %v8682_v22 = vor.u32 %v10603_v51, %v8679_v52  ;;  %v8990_v50 = vor.u32 %v10680_v60, %v8987_v2  ;;  %6189 = vmatpush.bf16.msra.mxu2 %v10106_v0  ;;  %v9407_v33 = vld [vmem:[#allocation15 + $0x7fc] sm:$0xf0]  ;;  %v10778_v0 = vld [vmem:[#allocation15 + $0x7ac] sm:$0xf]  ;;  %v9379_v2 = vld [vmem:[#allocation15 + $0x7c4] sm:$0xf0] }
 0x2f7   : > { %v3107_v39 = vadd.f32 %v11764_v28, %v3094_v25  ;;  %v9993_v28 = vld [vmem:[#allocation15 + $0xc78] sm:$0xf]  ;;  %v9382_v10 = vor.u32 %v10778_v0, %v9379_v2  ;;  %v10743_v25 = vld [vmem:[#allocation15 + $0x694] sm:$0xf]  ;;  %v10722_v0 = vld [vmem:[#allocation15 + $0x5ec] sm:$0xf] }
 0x2f8   : > { %v9155_v2 = vld [vmem:[#allocation15 + $0x604] sm:$0xf0] }
 0x2f9   : > { %6202 = vmatpush.bf16.msra.mxu3 %v8542_v45  ;;  %6214 = vmatpush.bf16.msrb.mxu0 %v8794_v42  ;;  %v3108_v55 = vpop.f32.mrf.mxu0  ;;  %v10596_v42 = vld [vmem:[#allocation15 + $0x1fc] sm:$0xf] }
 0x2fa   : > { %6180 = vmatpush.bf16.msra.mxu1 %v9770_v32  ;;  %v8623_v32 = vld [vmem:[#allocation15 + $0x1dc] sm:$0xf0]  ;;  %6190 = vmatpush.bf16.msra.mxu2 %v10078_v35  ;;  %v10652_v55 = vld [vmem:[#allocation15 + $0x3bc] sm:$0xf] }
 0x2fb   : > { %v3095_v45 = vpop.f32.mrf.mxu3  ;;  %v8626_v9 = vor.u32 %v10589_v38, %v8623_v32  ;;  %v9267_v32 = vld [vmem:[#allocation15 + $0x6e4] sm:$0xf0] }
 0x2fc   : > { %v8878_v45 = vor.u32 %v10652_v55, %v8875_v57  ;;  %v9603_v55 = vld [vmem:[#allocation15 + $0x984] sm:$0xf0] }
 0x2fd   : > { %6203 = vmatpush.bf16.msra.mxu3 %v8514_v11  ;;  %6215 = vmatpush.bf16.msrb.mxu0 %v8766_v13  ;;  %v8654_v13 = vor.u32 %v10596_v42, %v8651_v5  ;;  %v9965_v42 = vld [vmem:[#allocation15 + $0xc40] sm:$0xf]  ;;  %v10928_v5 = vld [vmem:[#allocation15 + $0xc58] sm:$0xf0] }
 0x2fe   : > { %6181 = vmatpush.bf16.msra.mxu1 %v9742_v41  ;;  %v9435_v41 = vld [vmem:[#allocation15 + $0x834] sm:$0xf0]  ;;  %v9966_v8 = vor.u32 %v10928_v5, %v9965_v42  ;;  %v9575_v42 = vld [vmem:[#allocation15 + $0x94c] sm:$0xf0]  ;;  %v9158_v5 = vor.u32 %v10722_v0, %v9155_v2  ;;  %v8433_v2 = vld [vmem:[#allocation15 + $0x40] sm:$0xf] }
 0x300   : > { %v3119_v11 = vpop.f32.mrf.mxu1 }
 0x301   : > { %6204 = vmatpush.bf16.msra.mxu3 %v8486_v27  ;;  %6216 = vmatpush.bf16.msrb.mxu0 %v8738_v21  ;;  %v10949_v27 = vld [vmem:[#allocation15 + $0xd00] sm:$0xf0]  ;;  %v10666_v21 = vld [vmem:[#allocation15 + $0x42c] sm:$0xf]  ;;  %v3120_v46 = vadd.f32 %v3119_v11, %v3107_v39  ;;  %v10855_v11 = vld [vmem:[#allocation15 + $0xa14] sm:$0xf] }
 0x302   : > { %6226 = vmatpush.bf16.msrb.mxu1 %v9046_v63  ;;  %v10050_v18 = vor.u32 %v10949_v27, %v10049_v26  ;;  %v8934_v36 = vor.u32 %v10666_v21, %v8931_v29  ;;  %v10942_v63 = vld [vmem:[#allocation15 + $0xcc8] sm:$0xf0]  ;;  %v10848_v27 = vld [vmem:[#allocation15 + $0x9dc] sm:$0xf]  ;;  %v9659_v21 = vld [vmem:[#allocation15 + $0x9f4] sm:$0xf0] }
 0x303   : > { %v10022_v43 = vor.u32 %v10942_v63, %v10021_v30  ;;  %v9323_v29 = vld [vmem:[#allocation15 + $0x754] sm:$0xf0]  ;;  %v10841_v63 = vld [vmem:[#allocation15 + $0x9a4] sm:$0xf] }
 0x304   : > { %6191 = vmatpush.bf16.msra.mxu2 %v10050_v18  ;;  %v10764_v18 = vld [vmem:[#allocation15 + $0x73c] sm:$0xf] }
 0x305   : > { %6205 = vmatpush.bf16.msra.mxu3 %v8458_v44  ;;  %6217 = vmatpush.bf16.msrb.mxu0 %v8710_v48  ;;  %v8903_v44 = vld [vmem:[#allocation15 + $0x40c] sm:$0xf0]  ;;  %v9438_v48 = vor.u32 %v10792_v34, %v9435_v41  ;;  %v9662_v34 = vor.u32 %v10848_v27, %v9659_v21  ;;  %v10736_v41 = vld [vmem:[#allocation15 + $0x65c] sm:$0xf]  ;;  %v9326_v30 = vor.u32 %v10764_v18, %v9323_v29  ;;  %v9099_v27 = vld [vmem:[#allocation15 + $0x594] sm:$0xf0] }
 0x306   : > { %6227 = vmatpush.bf16.msrb.mxu1 %v9018_v54  ;;  %v8906_v51 = vor.u32 %v10659_v40, %v8903_v44  ;;  %v10935_v54 = vld [vmem:[#allocation15 + $0xc90] sm:$0xf0]  ;;  %v9631_v40 = vld [vmem:[#allocation15 + $0x9bc] sm:$0xf0]  ;;  %v8489_v29 = vld [vmem:[#allocation15 + $0xb0] sm:$0xf] }
 0x307   : > { %v9994_v56 = vor.u32 %v10935_v54, %v9993_v28  ;;  %v9295_v44 = vld [vmem:[#allocation15 + $0x71c] sm:$0xf0]  ;;  %v10834_v54 = vld [vmem:[#allocation15 + $0x96c] sm:$0xf] }
 0x308   : > { %v3121_v37 = vpop.f32.mrf.mxu1  ;;  %6192 = vmatpush.bf16.msra.mxu2 %v10022_v43  ;;  %v10757_v43 = vld [vmem:[#allocation15 + $0x704] sm:$0xf]  ;;  %v9519_v18 = vld [vmem:[#allocation15 + $0x8dc] sm:$0xf0] }
 0x309   : > { %6206 = vmatpush.bf16.msra.mxu3 %v8430_v61  ;;  %6218 = vmatpush.bf16.msrb.mxu0 %v8682_v22  ;;  %v9410_v61 = vor.u32 %v10785_v47, %v9407_v33  ;;  %v9715_v22 = vld [vmem:[#allocation15 + $0xa64] sm:$0xf0]  ;;  %v9634_v47 = vor.u32 %v10841_v63, %v9631_v40  ;;  %v10729_v33 = vld [vmem:[#allocation15 + $0x624] sm:$0xf]  ;;  %v9298_v28 = vor.u32 %v10757_v43, %v9295_v44  ;;  %v9071_v43 = vld [vmem:[#allocation15 + $0x55c] sm:$0xf0] }
 0x30a   : > { %6228 = vmatpush.bf16.msrb.mxu1 %v8990_v50  ;;  %v3132_v49 = vpop.f32.mrf.mxu2  ;;  %v9718_v7 = vor.u32 %v10862_v62, %v9715_v22  ;;  %v8847_v50 = vld [vmem:[#allocation15 + $0x39c] sm:$0xf0]  ;;  %v10579_v62 = vld [vmem:[#allocation15 + $0x170] sm:$0xf0]  ;;  %v9606_v22 = vor.u32 %v10834_v54, %v9603_v55  ;;  %v9939_v63 = vld [vmem:[#allocation15 + $0xc24] sm:$0xf0] }
 0x30b   : > { %v3133_v52 = vadd.f32 %v3132_v49, %v3120_v46  ;;  %v8850_v38 = vor.u32 %v10645_v6, %v8847_v50  ;;  %v10586_v49 = vld [vmem:[#allocation15 + $0x1a8] sm:$0xf0]  ;;  %v10551_v54 = vld [vmem:[#allocation15 + $0x90] sm:$0xf0] }
 0x30c   : > { %6193 = vmatpush.bf16.msra.mxu2 %v9994_v56  ;;  %v10911_v55 = vld [vmem:[#allocation15 + $0xbd4] sm:$0xf] }
 0x30d   : > { %6207 = vmatpush.bf16.msra.mxu3 %v8402_v12  ;;  %6219 = vmatpush.bf16.msrb.mxu0 %v8654_v13  ;;  %v3245_v60 = vmul.f32 0.2, %v3133_v52  ;;  %v9687_v12 = vld [vmem:[#allocation15 + $0xa2c] sm:$0xf0]  ;;  %v10750_v13 = vld [vmem:[#allocation15 + $0x6cc] sm:$0xf] }
 0x30e   : > { %6229 = vmatpush.bf16.msrb.mxu1 %v8962_v24  ;;  %v9270_v20 = vor.u32 %v10750_v13, %v9267_v32  ;;  %v9690_v24 = vor.u32 %v10855_v11, %v9687_v12  ;;  %v9127_v11 = vld [vmem:[#allocation15 + $0x5cc] sm:$0xf0]  ;;  %v10820_v13 = vld [vmem:[#allocation15 + $0x8fc] sm:$0xf] }
 0x30f   : > { %v3253_v3 = vmax.f32 %v3133_v52, %v3245_v60  ;;  %v1534_v52 = vperm.slane %v11757_v16, 6 }
 0x310   : > { %6208 = vmatmul.bf16.vlgmr.msra.gmra.mxu3 %v11738_v1  ;;  %6194 = vmatpush.bf16.msra.mxu2 %v9966_v8  ;;  %v10572_v8 = vld [vmem:[#allocation15 + $0x138] sm:$0xf0] }
 0x311   : > { %6252 = vmatpush.bf16.msrb.mxu3 %v9494_v59  ;;  %6220 = vmatpush.bf16.msrb.mxu0 %v8626_v9  ;;  %v11773_v58 = vpack.c.bf16 %v3253_v3, %v3253_v3  ;;  %v11775_v15 = vpop.f32.mrf.mxu0  ;;  %v9351_v59 = vld [vmem:[#allocation15 + $0x78c] sm:$0xf0]  ;;  %v10827_v3 = vld [vmem:[#allocation15 + $0x934] sm:$0xf] }
 0x312   : > { %6230 = vmatpush.bf16.msrb.mxu1 %v8934_v36  ;;  %v3134_v35 = vpop.f32.mrf.mxu2  ;;  %v9354_v26 = vor.u32 %v10771_v14, %v9351_v59  ;;  %v9239_v9 = vld [vmem:[#allocation15 + $0x6ac] sm:$0xf0]  ;;  %v9211_v36 = vld [vmem:[#allocation15 + $0x674] sm:$0xf0]  ;;  %v9578_v50 = vor.u32 %v10827_v3, %v9575_v42  ;;  %v10628_v3 = vld [vmem:[#allocation15 + $0x2f8] sm:$0xf0] }
 0x313   : > { %v3145_v19 = vpop.f32.mrf.mxu3  ;;  %6169 = vmatmul.bf16.vlgmr.msra.gmra.mxu0 %v11773_v58  ;;  %v9214_v37 = vor.u32 %v10736_v41, %v9211_v36  ;;  %v9547_v35 = vld [vmem:[#allocation15 + $0x914] sm:$0xf0]  ;;  %v8825_v41 = vld [vmem:[#allocation15 + $0x350] sm:$0xf]  ;;  %v10642_v36 = vld [vmem:[#allocation15 + $0x368] sm:$0xf0] }
 0x314   : > { %6239 = vmatpush.bf16.msrb.mxu2 %v9270_v20  ;;  %v10565_v20 = vld [vmem:[#allocation15 + $0x100] sm:$0xf0]  ;;  %v10544_v42 = vld [vmem:[#allocation15 + $0x58] sm:$0xf0] }
 0x315   : > { %6253 = vmatpush.bf16.msrb.mxu3 %v9466_v31  ;;  %6265 = vmatpush.bf16.msra.mxu0 %v9718_v7  ;;  %v9242_v31 = vor.u32 %v10743_v25, %v9239_v9  ;;  %v8545_v7 = vld [vmem:[#allocation15 + $0x120] sm:$0xf]  ;;  %v9550_v25 = vor.u32 %v10820_v13, %v9547_v35  ;;  %v10813_v9 = vld [vmem:[#allocation15 + $0x8c4] sm:$0xf] }
 0x316   : > { %6231 = vmatpush.bf16.msrb.mxu1 %v8906_v51  ;;  %v9183_v51 = vld [vmem:[#allocation15 + $0x63c] sm:$0xf0]  ;;  %v9522_v40 = vor.u32 %v10813_v9, %v9519_v18  ;;  %v10537_v35 = vld [vmem:[#allocation15 + $0x20] sm:$0xf0]  ;;  %v9827_v9 = vld [vmem:[#allocation15 + $0xb44] sm:$0xf0] }
 0x317   : > { %v9186_v56 = vor.u32 %v10729_v33, %v9183_v51  ;;  %v8797_v33 = vld [vmem:[#allocation15 + $0x318] sm:$0xf]  ;;  %v10635_v51 = vld [vmem:[#allocation15 + $0x330] sm:$0xf0]  ;;  %v8713_v18 = vld [vmem:[#allocation15 + $0x270] sm:$0xf] }
 0x318   : > { %6240 = vmatpush.bf16.msrb.mxu2 %v9242_v31 }
 0x319   : > { %6254 = vmatpush.bf16.msrb.mxu3 %v9438_v48  ;;  %6266 = vmatpush.bf16.msra.mxu0 %v9690_v24  ;;  %v3160_v39 = vpop.f32.mrf.mxu0  ;;  %v8601_v48 = vld [vmem:[#allocation15 + $0x190] sm:$0xf] }
 0x31a   : > { %6232 = vmatpush.bf16.msrb.mxu1 %v8878_v45  ;;  %v8602_v60 = vor.u32 %v10586_v49, %v8601_v48  ;;  %v3146_v45 = vadd.f32 %v3145_v19, %v1534_v52  ;;  %v8517_v19 = vld [vmem:[#allocation15 + $0xe8] sm:$0xf] }
 0x31b   : > { %v3147_v46 = vpop.f32.mrf.mxu3  ;;  %v8518_v31 = vor.u32 %v10565_v20, %v8517_v19 }
 0x31c   : > { %6241 = vmatpush.bf16.msrb.mxu2 %v9214_v37  ;;  %v3159_v12 = vadd.f32 %v11775_v15, %v3146_v45  ;;  %v10701_v37 = vld [vmem:[#allocation15 + $0x544] sm:$0xf]  ;;  %v8826_v46 = vor.u32 %v10642_v36, %v8825_v41  ;;  %v8769_v45 = vld [vmem:[#allocation15 + $0x2e0] sm:$0xf] }
 0x31d   : > { %6255 = vmatpush.bf16.msrb.mxu3 %v9410_v61  ;;  %6267 = vmatpush.bf16.msra.mxu0 %v9662_v34  ;;  %v8573_v61 = vld [vmem:[#allocation15 + $0x158] sm:$0xf]  ;;  %v10558_v34 = vld [vmem:[#allocation15 + $0xc8] sm:$0xf0] }
 0x31e   : > { %6233 = vmatpush.bf16.msrb.mxu1 %v8850_v38  ;;  %v8574_v6 = vor.u32 %v10579_v62, %v8573_v61  ;;  %v8546_v38 = vor.u32 %v10572_v8, %v8545_v7  ;;  %v8490_v48 = vor.u32 %v10558_v34, %v8489_v29  ;;  %v8798_v62 = vor.u32 %v10635_v51, %v8797_v33  ;;  %v10614_v29 = vld [vmem:[#allocation15 + $0x288] sm:$0xf0]  ;;  %v10803_v34 = vld [vmem:[#allocation15 + $0x870] sm:$0xf0]  ;;  %v9771_v51 = vld [vmem:[#allocation15 + $0xad4] sm:$0xf0] }
 0x31f   : > { %v8770_v7 = vor.u32 %v10628_v3, %v8769_v45  ;;  %v8434_v8 = vor.u32 %v10544_v42, %v8433_v2  ;;  %v8714_v36 = vor.u32 %v10614_v29, %v8713_v18  ;;  %v10869_v2 = vld [vmem:[#allocation15 + $0xa84] sm:$0xf]  ;;  %v9743_v45 = vld [vmem:[#allocation15 + $0xa9c] sm:$0xf0]  ;;  %v8629_v3 = vld [vmem:[#allocation15 + $0x1c8] sm:$0xf] }
 0x320   : > { %v3171_v57 = vpop.f32.mrf.mxu1  ;;  %6242 = vmatpush.bf16.msrb.mxu2 %v9186_v56  ;;  %v9911_v56 = vld [vmem:[#allocation15 + $0xbec] sm:$0xf0] }
 0x321   : > { %6256 = vmatpush.bf16.msrb.mxu3 %v9382_v10  ;;  %6268 = vmatpush.bf16.msra.mxu0 %v9634_v47  ;;  %v10715_v10 = vld [vmem:[#allocation15 + $0x5b4] sm:$0xf]  ;;  %v3172_v32 = vadd.f32 %v3171_v57, %v3159_v12  ;;  %v8461_v47 = vld [vmem:[#allocation15 + $0x78] sm:$0xf]  ;;  %v9074_v57 = vor.u32 %v10701_v37, %v9071_v43  ;;  %v9914_v0 = vor.u32 %v10911_v55, %v9911_v56  ;;  %v10621_v12 = vld [vmem:[#allocation15 + $0x2c0] sm:$0xf0] }
 0x322   : > { %v9130_v14 = vor.u32 %v10715_v10, %v9127_v11  ;;  %v8405_v10 = vld [vmem:[#allocation15 + $0x8] sm:$0xf]  ;;  %v10607_v37 = vld [vmem:[#allocation15 + $0x250] sm:$0xf0]  ;;  %v9441_v43 = vld [vmem:[#allocation15 + $0x820] sm:$0xf] }
 0x323   : > { %6221 = vmatmul.bf16.vlgmr.msrb.gmra.mxu0 %v11744_v17  ;;  %v8741_v11 = vld [vmem:[#allocation15 + $0x2a8] sm:$0xf]  ;;  %v10600_v55 = vld [vmem:[#allocation15 + $0x218] sm:$0xf0] }
 0x324   : > { %6243 = vmatpush.bf16.msrb.mxu2 %v9158_v5  ;;  %v10904_v5 = vld [vmem:[#allocation15 + $0xb9c] sm:$0xf]  ;;  %v8742_v20 = vor.u32 %v10621_v12, %v8741_v11  ;;  %v9049_v12 = vld [vmem:[#allocation15 + $0x510] sm:$0xf] }
 0x325   : > { %6257 = vmatpush.bf16.msrb.mxu3 %v9354_v26  ;;  %6269 = vmatpush.bf16.msra.mxu0 %v9606_v22  ;;  %v10708_v26 = vld [vmem:[#allocation15 + $0x57c] sm:$0xf]  ;;  %v8462_v22 = vor.u32 %v10551_v54, %v8461_v47  ;;  %v8657_v54 = vld [vmem:[#allocation15 + $0x200] sm:$0xf] }
 0x326   : > { %v9102_v15 = vor.u32 %v10708_v26, %v9099_v27  ;;  %v10890_v27 = vld [vmem:[#allocation15 + $0xb2c] sm:$0xf] }
 0x327   : > { %v9830_v41 = vor.u32 %v10890_v27, %v9827_v9  ;;  %v10775_v27 = vld [vmem:[#allocation15 + $0x790] sm:$0xf0] }
 0x328   : > { %v3173_v59 = vpop.f32.mrf.mxu1  ;;  %6244 = vmatpush.bf16.msrb.mxu2 %v9130_v14  ;;  %v10897_v14 = vld [vmem:[#allocation15 + $0xb64] sm:$0xf] }
 0x329   : > { %6258 = vmatpush.bf16.msrb.mxu3 %v9326_v30  ;;  %6270 = vmatpush.bf16.msra.mxu0 %v9578_v50  ;;  %v10918_v30 = vld [vmem:[#allocation15 + $0xc0c] sm:$0xf]  ;;  %v9855_v59 = vld [vmem:[#allocation15 + $0xb7c] sm:$0xf0] }
 0x32a   : > { %v3184_v24 = vpop.f32.mrf.mxu2  ;;  %v9942_v49 = vor.u32 %v10918_v30, %v9939_v63  ;;  %v9858_v26 = vor.u32 %v10897_v14, %v9855_v59  ;;  %v9799_v63 = vld [vmem:[#allocation15 + $0xb0c] sm:$0xf0] }
 0x32b   : > { %v3185_v21 = vadd.f32 %v3184_v24, %v3172_v32  ;;  %v10810_v32 = vld [vmem:[#allocation15 + $0x8a8] sm:$0xf0]  ;;  %v1535_v24 = vperm.slane %v11757_v16, 7  ;;  %v9721_v59 = vld [vmem:[#allocation15 + $0xa50] sm:$0xf] }
 0x32c   : > { %6245 = vmatpush.bf16.msrb.mxu2 %v9102_v15 }
 0x32d   : > { %6259 = vmatpush.bf16.msrb.mxu3 %v9298_v28  ;;  %v3246_v39 = vmul.f32 0.2, %v3185_v21  ;;  %6271 = vmatpush.bf16.msra.mxu0 %v9550_v25  ;;  %v8406_v25 = vor.u32 %v10537_v35, %v8405_v10  ;;  %v10163_v10 = vld [vmem:[#allocation15 + $0xde4] sm:$0xf0]  ;;  %v9746_v35 = vor.u32 %v10869_v2, %v9743_v45 }
 0x32f   : > { %v3254_v44 = vmax.f32 %v3185_v21, %v3246_v39  ;;  %v10883_v39 = vld [vmem:[#allocation15 + $0xaf4] sm:$0xf] }
 0x330   : > { %6260 = vmatmul.bf16.vlgmr.msrb.gmra.mxu3 %v11762_v23  ;;  %6246 = vmatpush.bf16.msrb.mxu2 %v9074_v57  ;;  %v9413_v57 = vld [vmem:[#allocation15 + $0x7e8] sm:$0xf] }
 0x331   : > { %6304 = vmatpush.bf16.msra.mxu3 %v8602_v60  ;;  %v11782_v52 = vpack.c.bf16 %v3254_v44, %v3254_v44  ;;  %v11784_v28 = vpop.f32.mrf.mxu0  ;;  %6272 = vmatpush.bf16.msra.mxu0 %v9522_v40  ;;  %v8685_v40 = vld [vmem:[#allocation15 + $0x238] sm:$0xf]  ;;  %v10796_v44 = vld [vmem:[#allocation15 + $0x838] sm:$0xf0] }
 0x332   : > { %v3186_v60 = vpop.f32.mrf.mxu2  ;;  %v9442_v33 = vor.u32 %v10796_v44, %v9441_v43  ;;  %v9329_v43 = vld [vmem:[#allocation15 + $0x740] sm:$0xf]  ;;  %v10768_v44 = vld [vmem:[#allocation15 + $0x758] sm:$0xf0] }
 0x333   : > { %v3197_v61 = vpop.f32.mrf.mxu3  ;;  %6182 = vmatmul.bf16.vlgmr.msra.gmra.mxu1 %v11782_v52  ;;  %v10789_v60 = vld [vmem:[#allocation15 + $0x800] sm:$0xf0] }
 0x334   : > { %6278 = vmatpush.bf16.msra.mxu1 %v9942_v49  ;;  %6273 = vmatmul.bf16.vlgmr.msra.gmra.mxu0 %v11773_v58  ;;  %v3198_v30 = vadd.f32 %v3197_v61, %v1535_v24  ;;  %v10876_v49 = vld [vmem:[#allocation15 + $0xabc] sm:$0xf] }
 0x335   : > { %6305 = vmatpush.bf16.msra.mxu3 %v8574_v6  ;;  %6317 = vmatpush.bf16.msrb.mxu0 %v8826_v46  ;;  %v9883_v6 = vld [vmem:[#allocation15 + $0xbb4] sm:$0xf0]  ;;  %v9802_v46 = vor.u32 %v10883_v39, %v9799_v63  ;;  %v10859_v39 = vld [vmem:[#allocation15 + $0xa30] sm:$0xf0] }
 0x336   : > { %v9886_v50 = vor.u32 %v10904_v5, %v9883_v6  ;;  %v3211_v47 = vadd.f32 %v11784_v28, %v3198_v30  ;;  %v9414_v28 = vor.u32 %v10789_v60, %v9413_v57  ;;  %v10593_v5 = vld [vmem:[#allocation15 + $0x1e0] sm:$0xf0]  ;;  %v9385_v6 = vld [vmem:[#allocation15 + $0x7b0] sm:$0xf]  ;;  %v9301_v57 = vld [vmem:[#allocation15 + $0x708] sm:$0xf] }
 0x337   : > { %v8630_v14 = vor.u32 %v10593_v5, %v8629_v3  ;;  %v8965_v3 = vld [vmem:[#allocation15 + $0x468] sm:$0xf]  ;;  %v10845_v5 = vld [vmem:[#allocation15 + $0x9c0] sm:$0xf0] }
 0x338   : > { %6279 = vmatpush.bf16.msra.mxu1 %v9914_v0  ;;  %v8658_v0 = vor.u32 %v10600_v55, %v8657_v54  ;;  %v10852_v54 = vld [vmem:[#allocation15 + $0x9f8] sm:$0xf0] }
 0x339   : > { %6306 = vmatpush.bf16.msra.mxu3 %v8546_v38  ;;  %6318 = vmatpush.bf16.msrb.mxu0 %v8798_v62  ;;  %v3212_v13 = vpop.f32.mrf.mxu0  ;;  %v9497_v38 = vld [vmem:[#allocation15 + $0x890] sm:$0xf] }
 0x33a   : > { %v9498_v21 = vor.u32 %v10810_v32, %v9497_v38  ;;  %v10698_v13 = vld [vmem:[#allocation15 + $0x528] sm:$0xf0] }
 0x33b   : > { %v3199_v19 = vpop.f32.mrf.mxu3  ;;  %v10866_v38 = vld [vmem:[#allocation15 + $0xa68] sm:$0xf0] }
 0x33c   : > { %6280 = vmatpush.bf16.msra.mxu1 %v9886_v50  ;;  %v10974_v50 = vld [vmem:[#allocation15 + $0xdcc] sm:$0xf]  ;;  %v9722_v29 = vor.u32 %v10866_v38, %v9721_v59  ;;  %v8937_v38 = vld [vmem:[#allocation15 + $0x430] sm:$0xf] }
 0x33d   : > { %6307 = vmatpush.bf16.msra.mxu3 %v8518_v31  ;;  %6319 = vmatpush.bf16.msrb.mxu0 %v8770_v7  ;;  %v9469_v31 = vld [vmem:[#allocation15 + $0x858] sm:$0xf]  ;;  %v10782_v7 = vld [vmem:[#allocation15 + $0x7c8] sm:$0xf0]  ;;  %v10166_v24 = vor.u32 %v10974_v50, %v10163_v10 }
 0x33e   : > { %v9470_v16 = vor.u32 %v10803_v34, %v9469_v31  ;;  %v9386_v19 = vor.u32 %v10782_v7, %v9385_v6  ;;  %v9021_v31 = vld [vmem:[#allocation15 + $0x4d8] sm:$0xf]  ;;  %v10691_v34 = vld [vmem:[#allocation15 + $0x4f0] sm:$0xf0]  ;;  %v8603_v7 = vld [vmem:[#allocation15 + $0x1ac] sm:$0xf0] }
 0x33f   : > { %v10583_v6 = vld [vmem:[#allocation15 + $0x194] sm:$0xf] }
 0x340   : > { %v3223_v15 = vpop.f32.mrf.mxu1  ;;  %6281 = vmatpush.bf16.msra.mxu1 %v9858_v26  ;;  %v9357_v26 = vld [vmem:[#allocation15 + $0x778] sm:$0xf]  ;;  %v8606_v59 = vor.u32 %v10583_v6, %v8603_v7  ;;  %v10555_v6 = vld [vmem:[#allocation15 + $0xb4] sm:$0xf]  ;;  %v8491_v7 = vld [vmem:[#allocation15 + $0xcc] sm:$0xf0] }
 0x341   : > { %6308 = vmatpush.bf16.msra.mxu3 %v8490_v48  ;;  %6320 = vmatpush.bf16.msrb.mxu0 %v8742_v20  ;;  %v8686_v48 = vor.u32 %v10607_v37, %v8685_v40  ;;  %v3224_v61 = vadd.f32 %v3223_v15, %v3211_v47  ;;  %v10135_v15 = vld [vmem:[#allocation15 + $0xdac] sm:$0xf0]  ;;  %v9022_v37 = vor.u32 %v10691_v34, %v9021_v31  ;;  %v8993_v47 = vld [vmem:[#allocation15 + $0x4a0] sm:$0xf] }
 0x343   : > { %6234 = vmatmul.bf16.vlgmr.msrb.gmra.mxu1 %v11752_v4 }
 0x344   : > { %6282 = vmatpush.bf16.msra.mxu1 %v9830_v41 }
 0x345   : > { %6309 = vmatpush.bf16.msra.mxu3 %v8462_v22  ;;  %6321 = vmatpush.bf16.msrb.mxu0 %v8714_v36  ;;  %v9774_v22 = vor.u32 %v10876_v49, %v9771_v51  ;;  %v9693_v36 = vld [vmem:[#allocation15 + $0xa18] sm:$0xf]  ;;  %v9665_v51 = vld [vmem:[#allocation15 + $0x9e0] sm:$0xf] }
 0x346   : > { %v10107_v49 = vld [vmem:[#allocation15 + $0xd74] sm:$0xf0]  ;;  %v9666_v45 = vor.u32 %v10852_v54, %v9665_v51  ;;  %v10824_v54 = vld [vmem:[#allocation15 + $0x918] sm:$0xf0] }
 0x348   : > { %v3225_v56 = vpop.f32.mrf.mxu1  ;;  %6283 = vmatpush.bf16.msra.mxu1 %v9802_v46  ;;  %v10960_v46 = vld [vmem:[#allocation15 + $0xd5c] sm:$0xf] }
 0x349   : > { %6310 = vmatpush.bf16.msra.mxu3 %v8434_v8  ;;  %6322 = vmatpush.bf16.msrb.mxu0 %v8686_v48  ;;  %v11792_v8 = vld [vmem:[#allocation16] sm:$0xff]  ;;  %v9694_v48 = vor.u32 %v10859_v39, %v9693_v36  ;;  %v9330_v56 = vor.u32 %v10768_v44, %v9329_v43  ;;  %v10110_v60 = vor.u32 %v10960_v46, %v10107_v49  ;;  %v10663_v36 = vld [vmem:[#allocation15 + $0x410] sm:$0xf0]  ;;  %v9581_v39 = vld [vmem:[#allocation15 + $0x938] sm:$0xf] }
 0x34a   : > { %v3236_v62 = vpop.f32.mrf.mxu2  ;;  %v3778_v20 = vperm.slane %v11792_v8, 0  ;;  %v10932_v43 = vld [vmem:[#allocation15 + $0xc7c] sm:$0xf]  ;;  %v9995_v44 = vld [vmem:[#allocation15 + $0xc94] sm:$0xf0] }
 0x34b   : > { %v3237_v42 = vadd.f32 %v3236_v62, %v3224_v61  ;;  %v10761_v62 = vld [vmem:[#allocation15 + $0x720] sm:$0xf0]  ;;  %v8881_v49 = vld [vmem:[#allocation15 + $0x3c0] sm:$0xf] }
 0x34c   : > { %6284 = vmatpush.bf16.msra.mxu1 %v9774_v22  ;;  %v10953_v22 = vld [vmem:[#allocation15 + $0xd24] sm:$0xf]  ;;  %v9302_v10 = vor.u32 %v10761_v62, %v9301_v57 }
 0x34d   : > { %6311 = vmatpush.bf16.msra.mxu3 %v8406_v25  ;;  %v3247_v11 = vmul.f32 0.2, %v3237_v42  ;;  %6323 = vmatpush.bf16.msrb.mxu0 %v8658_v0  ;;  %v9050_v25 = vor.u32 %v10698_v13, %v9049_v12  ;;  %v10079_v0 = vld [vmem:[#allocation15 + $0xd3c] sm:$0xf0]  ;;  %v10946_v13 = vld [vmem:[#allocation15 + $0xcec] sm:$0xf] }
 0x34e   : > { %v10925_v62 = vld [vmem:[#allocation15 + $0xc44] sm:$0xf] }
 0x34f   : > { %v3255_v32 = vmax.f32 %v3237_v42, %v3247_v11  ;;  %v10677_v42 = vld [vmem:[#allocation15 + $0x480] sm:$0xf0]  ;;  %v10082_v11 = vor.u32 %v10953_v22, %v10079_v0  ;;  %v9967_v22 = vld [vmem:[#allocation15 + $0xc5c] sm:$0xf0]  ;;  %v8853_v0 = vld [vmem:[#allocation15 + $0x388] sm:$0xf] }
 0x350   : > { %6312 = vmatmul.bf16.vlgmr.msra.gmra.mxu3 %v11738_v1  ;;  %6285 = vmatpush.bf16.msra.mxu1 %v9746_v35  ;;  %v8966_v12 = vor.u32 %v10677_v42, %v8965_v3  ;;  %v10051_v35 = vld [vmem:[#allocation15 + $0xd04] sm:$0xf0]  ;;  %v10649_v42 = vld [vmem:[#allocation15 + $0x3a0] sm:$0xf0] }
 0x351   : > { %6356 = vmatpush.bf16.msrb.mxu3 %v9498_v21  ;;  %v10967_v21 = vld [vmem:[#allocation15 + $0xd94] sm:$0xf]  ;;  %v11795_v9 = vpack.c.bf16 %v3255_v32, %v3255_v32  ;;  %v6118_v18 = vpop.f32.mrf.mxu0  ;;  %6324 = vmatpush.bf16.msrb.mxu0 %v8630_v14  ;;  %v10670_v32 = vld [vmem:[#allocation15 + $0x448] sm:$0xf0] }
 0x352   : > { %v3238_v41 = vpop.f32.mrf.mxu2  ;;  %v10138_v40 = vor.u32 %v10967_v21, %v10135_v15  ;;  %v10054_v21 = vor.u32 %v10946_v13, %v10051_v35  ;;  %v10023_v15 = vld [vmem:[#allocation15 + $0xccc] sm:$0xf0]  ;;  %v9970_v13 = vor.u32 %v10925_v62, %v9967_v22  ;;  %v8854_v35 = vor.u32 %v10649_v42, %v8853_v0  ;;  %v10618_v62 = vld [vmem:[#allocation15 + $0x2ac] sm:$0xf]  ;;  %v8743_v22 = vld [vmem:[#allocation15 + $0x2c4] sm:$0xf0] }
 0x353   : > { %v6105_v30 = vpop.f32.mrf.mxu3  ;;  %6195 = vmatmul.bf16.vlgmr.msra.gmra.mxu2 %v11795_v9  ;;  %6286 = vmatmul.bf16.vlgmr.msra.gmra.mxu1 %v11782_v52  ;;  %v8909_v41 = vld [vmem:[#allocation15 + $0x3f8] sm:$0xf]  ;;  %v10807_v0 = vld [vmem:[#allocation15 + $0x894] sm:$0xf] }
 0x354   : > { %v6106_v63 = vadd.f32 %v6105_v30, %v3778_v20  ;;  %6291 = vmatpush.bf16.msra.mxu2 %v10166_v24  ;;  %6330 = vmatpush.bf16.msrb.mxu1 %v9050_v25  ;;  %v10838_v24 = vld [vmem:[#allocation15 + $0x988] sm:$0xf0]  ;;  %v10576_v25 = vld [vmem:[#allocation15 + $0x15c] sm:$0xf]  ;;  %v10831_v30 = vld [vmem:[#allocation15 + $0x950] sm:$0xf0] }
 0x355   : > { %6357 = vmatpush.bf16.msrb.mxu3 %v9470_v16  ;;  %v9358_v16 = vor.u32 %v10775_v27, %v9357_v26  ;;  %6369 = vmatpush.bf16.msra.mxu0 %v9722_v29  ;;  %v8575_v26 = vld [vmem:[#allocation15 + $0x174] sm:$0xf0]  ;;  %v10939_v29 = vld [vmem:[#allocation15 + $0xcb4] sm:$0xf]  ;;  %v9582_v46 = vor.u32 %v10831_v30, %v9581_v39  ;;  %v10541_v30 = vld [vmem:[#allocation15 + $0x44] sm:$0xf] }
 0x356   : > { %6325 = vmatmul.bf16.vlgmr.msrb.gmra.mxu0 %v11744_v17  ;;  %v6119_v55 = vadd.f32 %v6118_v18, %v6106_v63  ;;  %v8938_v18 = vor.u32 %v10670_v32, %v8937_v38  ;;  %v8578_v34 = vor.u32 %v10576_v25, %v8575_v26  ;;  %v8547_v63 = vld [vmem:[#allocation15 + $0x13c] sm:$0xf0]  ;;  %v8494_v32 = vor.u32 %v10555_v6, %v8491_v7  ;;  %v8463_v25 = vld [vmem:[#allocation15 + $0x94] sm:$0xf0]  ;;  %v10726_v6 = vld [vmem:[#allocation15 + $0x608] sm:$0xf0] }
 0x357   : > { %v9245_v26 = vld [vmem:[#allocation15 + $0x698] sm:$0xf]  ;;  %v8746_v7 = vor.u32 %v10618_v62, %v8743_v22  ;;  %v9387_v62 = vld [vmem:[#allocation15 + $0x7cc] sm:$0xf0] }
 0x358   : > { %6292 = vmatpush.bf16.msra.mxu2 %v10138_v40  ;;  %6331 = vmatpush.bf16.msrb.mxu1 %v9022_v37  ;;  %v10026_v40 = vor.u32 %v10939_v29, %v10023_v15  ;;  %v8910_v37 = vor.u32 %v10663_v36, %v8909_v41  ;;  %v10915_v29 = vld [vmem:[#allocation15 + $0xbf0] sm:$0xf0]  ;;  %v10169_v22 = vld [vmem:[#allocation15 + $0xdd0] sm:$0xf] }
 0x359   : > { %6358 = vmatpush.bf16.msrb.mxu3 %v9442_v33  ;;  %v10684_v33 = vld [vmem:[#allocation15 + $0x4b8] sm:$0xf0]  ;;  %6370 = vmatpush.bf16.msra.mxu0 %v9694_v48  ;;  %v6120_v2 = vpop.f32.mrf.mxu0 }
 0x35a   : > { %v8994_v61 = vor.u32 %v10684_v33, %v8993_v47  ;;  %v10656_v47 = vld [vmem:[#allocation15 + $0x3d8] sm:$0xf0]  ;;  %v9553_v33 = vld [vmem:[#allocation15 + $0x900] sm:$0xf] }
 0x35b   : > { %v6107_v50 = vpop.f32.mrf.mxu3 }
 0x35c   : > { %6293 = vmatpush.bf16.msra.mxu2 %v10110_v60  ;;  %6332 = vmatpush.bf16.msrb.mxu1 %v8994_v61  ;;  %v9998_v60 = vor.u32 %v10932_v43, %v9995_v44  ;;  %v8882_v61 = vor.u32 %v10656_v47, %v8881_v49  ;;  %v9273_v50 = vld [vmem:[#allocation15 + $0x6d0] sm:$0xf]  ;;  %v9889_v43 = vld [vmem:[#allocation15 + $0xba0] sm:$0xf]  ;;  %v10908_v44 = vld [vmem:[#allocation15 + $0xbb8] sm:$0xf0] }
 0x35d   : > { %6359 = vmatpush.bf16.msrb.mxu3 %v9414_v28  ;;  %v9637_v28 = vld [vmem:[#allocation15 + $0x9a8] sm:$0xf]  ;;  %6371 = vmatpush.bf16.msra.mxu0 %v9666_v45  ;;  %v9554_v45 = vor.u32 %v10824_v54, %v9553_v33  ;;  %v10534_v47 = vld [vmem:[#allocation15 + $0xc] sm:$0xf] }
 0x35e   : > { %v9638_v14 = vor.u32 %v10845_v5, %v9637_v28  ;;  %v9525_v28 = vld [vmem:[#allocation15 + $0x8c8] sm:$0xf]  ;;  %v10817_v5 = vld [vmem:[#allocation15 + $0x8e0] sm:$0xf0] }
 0x35f   : > { %v9526_v38 = vor.u32 %v10817_v5, %v9525_v28  ;;  %v8407_v54 = vld [vmem:[#allocation15 + $0x24] sm:$0xf0]  ;;  %v9161_v5 = vld [vmem:[#allocation15 + $0x5f0] sm:$0xf] }
 0x360   : > { %v6131_v20 = vpop.f32.mrf.mxu1  ;;  %6294 = vmatpush.bf16.msra.mxu2 %v10082_v11  ;;  %6333 = vmatpush.bf16.msrb.mxu1 %v8966_v12  ;;  %v9945_v11 = vld [vmem:[#allocation15 + $0xc10] sm:$0xf]  ;;  %v10922_v12 = vld [vmem:[#allocation15 + $0xc28] sm:$0xf0] }
 0x361   : > { %6360 = vmatpush.bf16.msrb.mxu3 %v9386_v19  ;;  %v9609_v19 = vld [vmem:[#allocation15 + $0x970] sm:$0xf]  ;;  %v6132_v27 = vadd.f32 %v6131_v20, %v6119_v55  ;;  %6372 = vmatpush.bf16.msra.mxu0 %v9638_v14  ;;  %v10562_v55 = vld [vmem:[#allocation15 + $0xec] sm:$0xf]  ;;  %v10639_v14 = vld [vmem:[#allocation15 + $0x354] sm:$0xf]  ;;  %v9946_v20 = vor.u32 %v10922_v12, %v9945_v11 }
 0x362   : > { %v9610_v31 = vor.u32 %v10838_v24, %v9609_v19  ;;  %v10548_v24 = vld [vmem:[#allocation15 + $0x7c] sm:$0xf]  ;;  %v10894_v11 = vld [vmem:[#allocation15 + $0xb48] sm:$0xf0]  ;;  %v10611_v12 = vld [vmem:[#allocation15 + $0x274] sm:$0xf] }
 0x363   : > { %6247 = vmatmul.bf16.vlgmr.msrb.gmra.mxu2 %v11755_v53  ;;  %v8466_v41 = vor.u32 %v10548_v24, %v8463_v25  ;;  %v10719_v24 = vld [vmem:[#allocation15 + $0x5d0] sm:$0xf0] }
 0x364   : > { %6295 = vmatpush.bf16.msra.mxu2 %v10054_v21  ;;  %6334 = vmatpush.bf16.msrb.mxu1 %v8938_v18  ;;  %v10747_v21 = vld [vmem:[#allocation15 + $0x6b0] sm:$0xf0]  ;;  %v9917_v18 = vld [vmem:[#allocation15 + $0xbd8] sm:$0xf] }
 0x365   : > { %6361 = vmatpush.bf16.msrb.mxu3 %v9358_v16  ;;  %v10569_v16 = vld [vmem:[#allocation15 + $0x124] sm:$0xf]  ;;  %6373 = vmatpush.bf16.msra.mxu0 %v9610_v31  ;;  %v10632_v31 = vld [vmem:[#allocation15 + $0x31c] sm:$0xf]  ;;  %v9246_v36 = vor.u32 %v10747_v21, %v9245_v26  ;;  %v9918_v39 = vor.u32 %v10915_v29, %v9917_v18  ;;  %v10887_v21 = vld [vmem:[#allocation15 + $0xb10] sm:$0xf0] }
 0x366   : > { %v8550_v48 = vor.u32 %v10569_v16, %v8547_v63  ;;  %v8435_v16 = vld [vmem:[#allocation15 + $0x5c] sm:$0xf0]  ;;  %v10604_v18 = vld [vmem:[#allocation15 + $0x23c] sm:$0xf]  ;;  %v8687_v29 = vld [vmem:[#allocation15 + $0x254] sm:$0xf0] }
 0x367   : > { %v9217_v63 = vld [vmem:[#allocation15 + $0x660] sm:$0xf]  ;;  %v8438_v49 = vor.u32 %v10541_v30, %v8435_v16 }
 0x368   : > { %v6133_v51 = vpop.f32.mrf.mxu1  ;;  %6296 = vmatpush.bf16.msra.mxu2 %v10026_v40  ;;  %6335 = vmatpush.bf16.msrb.mxu1 %v8910_v37  ;;  %v10740_v37 = vld [vmem:[#allocation15 + $0x678] sm:$0xf0]  ;;  %v9777_v16 = vld [vmem:[#allocation15 + $0xac0] sm:$0xf] }
 0x369   : > { %6362 = vmatpush.bf16.msrb.mxu3 %v9330_v56  ;;  %v8519_v56 = vld [vmem:[#allocation15 + $0x104] sm:$0xf0]  ;;  %v6144_v57 = vpop.f32.mrf.mxu2  ;;  %6374 = vmatpush.bf16.msra.mxu0 %v9582_v46  ;;  %v10625_v46 = vld [vmem:[#allocation15 + $0x2e4] sm:$0xf]  ;;  %v9218_v33 = vor.u32 %v10740_v37, %v9217_v63  ;;  %v9890_v51 = vor.u32 %v10908_v44, %v9889_v43  ;;  %v10880_v63 = vld [vmem:[#allocation15 + $0xad8] sm:$0xf0] }
 0x36a   : > { %v11802_v2 = vadd.f32 %v6144_v57, %v6132_v27  ;;  %v8522_v3 = vor.u32 %v10562_v55, %v8519_v56  ;;  %v9189_v55 = vld [vmem:[#allocation15 + $0x628] sm:$0xf]  ;;  %v10733_v56 = vld [vmem:[#allocation15 + $0x640] sm:$0xf0]  ;;  %v8659_v43 = vld [vmem:[#allocation15 + $0x21c] sm:$0xf0] }
 0x36b   : > { %v9190_v42 = vor.u32 %v10733_v56, %v9189_v55  ;;  %v10786_v44 = vld [vmem:[#allocation15 + $0x7ec] sm:$0xf]  ;;  %v10873_v56 = vld [vmem:[#allocation15 + $0xaa0] sm:$0xf0] }
 0x36c   : > { %6297 = vmatpush.bf16.msra.mxu2 %v9998_v60  ;;  %6336 = vmatpush.bf16.msrb.mxu1 %v8882_v61  ;;  %v9861_v60 = vld [vmem:[#allocation15 + $0xb68] sm:$0xf]  ;;  %v10901_v61 = vld [vmem:[#allocation15 + $0xb80] sm:$0xf0] }
 0x36d   : > { %6363 = vmatpush.bf16.msrb.mxu3 %v9302_v10  ;;  %v10754_v10 = vld [vmem:[#allocation15 + $0x6e8] sm:$0xf0]  ;;  %6375 = vmatpush.bf16.msra.mxu0 %v9554_v45  ;;  %v9499_v45 = vld [vmem:[#allocation15 + $0x8ac] sm:$0xf0]  ;;  %v9862_v28 = vor.u32 %v10901_v61, %v9861_v60  ;;  %v8631_v60 = vld [vmem:[#allocation15 + $0x1e4] sm:$0xf0] }
 0x36e   : > { %v9274_v19 = vor.u32 %v10754_v10, %v9273_v50  ;;  %v9502_v50 = vor.u32 %v10807_v0, %v9499_v45  ;;  %v9833_v10 = vld [vmem:[#allocation15 + $0xb30] sm:$0xf]  ;;  %v10779_v61 = vld [vmem:[#allocation15 + $0x7b4] sm:$0xf]  ;;  %v10978_v0 = vld [vmem:[#allocation15 + $0xde8] sm:$0xf0] }
 0x36f   : > { %v10695_v45 = vld [vmem:[#allocation15 + $0x514] sm:$0xf] }
 0x370   : > { %6364 = vmatmul.bf16.vlgmr.msrb.gmra.mxu3 %v11762_v23  ;;  %6298 = vmatpush.bf16.msra.mxu2 %v9970_v13 }
 0x371   : > { %6408 = vmatpush.bf16.msra.mxu3 %v8606_v59  ;;  %v8827_v59 = vld [vmem:[#allocation15 + $0x36c] sm:$0xf0]  ;;  %v6146_v15 = vpop.f32.mrf.mxu2  ;;  %6337 = vmatpush.bf16.msrb.mxu1 %v8854_v35 }
 0x372   : > { %v8830_v27 = vor.u32 %v10639_v14, %v8827_v59  ;;  %6376 = vmatpush.bf16.msra.mxu0 %v9526_v38  ;;  %v8715_v35 = vld [vmem:[#allocation15 + $0x28c] sm:$0xf0]  ;;  %v10800_v14 = vld [vmem:[#allocation15 + $0x85c] sm:$0xf]  ;;  %v9471_v59 = vld [vmem:[#allocation15 + $0x874] sm:$0xf0] }
 0x373   : > { %6299 = vmatmul.bf16.vlgmr.msra.gmra.mxu2 %v11795_v9  ;;  %v8718_v25 = vor.u32 %v10611_v12, %v8715_v35  ;;  %v9474_v26 = vor.u32 %v10800_v14, %v9471_v59  ;;  %v10793_v15 = vld [vmem:[#allocation15 + $0x824] sm:$0xf]  ;;  %v10772_v12 = vld [vmem:[#allocation15 + $0x77c] sm:$0xf]  ;;  %v10141_v35 = vld [vmem:[#allocation15 + $0xd98] sm:$0xf] }
 0x374   : > { %6343 = vmatpush.bf16.msrb.mxu2 %v9274_v19  ;;  %6338 = vmatmul.bf16.vlgmr.msrb.gmra.mxu1 %v11752_v4  ;;  %v9834_v19 = vor.u32 %v10894_v11, %v9833_v10  ;;  %v10170_v10 = vor.u32 %v10978_v0, %v10169_v22  ;;  %v10971_v59 = vld [vmem:[#allocation15 + $0xdb0] sm:$0xf0]  ;;  %v10950_v22 = vld [vmem:[#allocation15 + $0xd08] sm:$0xf0] }
 0x375   : > { %6409 = vmatpush.bf16.msra.mxu3 %v8578_v34  ;;  %v8799_v34 = vld [vmem:[#allocation15 + $0x334] sm:$0xf0]  ;;  %6382 = vmatpush.bf16.msra.mxu1 %v9946_v20 }
 0x376   : > { %6421 = vmatpush.bf16.msrb.mxu0 %v8830_v27  ;;  %v8802_v40 = vor.u32 %v10632_v31, %v8799_v34  ;;  %v6157_v13 = vpop.f32.mrf.mxu3  ;;  %v9133_v20 = vld [vmem:[#allocation15 + $0x5b8] sm:$0xf]  ;;  %v9443_v31 = vld [vmem:[#allocation15 + $0x83c] sm:$0xf0] }
 0x377   : > { %6377 = vmatmul.bf16.vlgmr.msra.gmra.mxu0 %v11773_v58  ;;  %v11808_v38 = vadd.f32 %v6157_v13, %v11802_v2  ;;  %v9805_v27 = vld [vmem:[#allocation15 + $0xaf8] sm:$0xf]  ;;  %v9134_v2 = vor.u32 %v10719_v24, %v9133_v20  ;;  %v9446_v30 = vor.u32 %v10793_v15, %v9443_v31  ;;  %v10856_v24 = vld [vmem:[#allocation15 + $0xa1c] sm:$0xf]  ;;  %v10113_v15 = vld [vmem:[#allocation15 + $0xd60] sm:$0xf] }
 0x378   : > { %6344 = vmatpush.bf16.msrb.mxu2 %v9246_v36  ;;  %v9806_v34 = vor.u32 %v10887_v21, %v9805_v27  ;;  %v10712_v36 = vld [vmem:[#allocation15 + $0x598] sm:$0xf0]  ;;  %v9359_v13 = vld [vmem:[#allocation15 + $0x794] sm:$0xf0]  ;;  %v10142_v27 = vor.u32 %v10971_v59, %v10141_v35 }
 0x379   : > { %6410 = vmatpush.bf16.msra.mxu3 %v8550_v48  ;;  %v8771_v48 = vld [vmem:[#allocation15 + $0x2fc] sm:$0xf0]  ;;  %6383 = vmatpush.bf16.msra.mxu1 %v9918_v39  ;;  %v8690_v39 = vor.u32 %v10604_v18, %v8687_v29  ;;  %v10765_v18 = vld [vmem:[#allocation15 + $0x744] sm:$0xf]  ;;  %v10660_v59 = vld [vmem:[#allocation15 + $0x3fc] sm:$0xf] }
 0x37a   : > { %6422 = vmatpush.bf16.msrb.mxu0 %v8802_v40  ;;  %v8774_v57 = vor.u32 %v10625_v46, %v8771_v48  ;;  %v10597_v40 = vld [vmem:[#allocation15 + $0x204] sm:$0xf]  ;;  %v9415_v46 = vld [vmem:[#allocation15 + $0x804] sm:$0xf0]  ;;  %v9331_v29 = vld [vmem:[#allocation15 + $0x75c] sm:$0xf0] }
 0x37b   : > { %v9418_v55 = vor.u32 %v10786_v44, %v9415_v46  ;;  %v10085_v44 = vld [vmem:[#allocation15 + $0xd28] sm:$0xf]  ;;  %v10957_v46 = vld [vmem:[#allocation15 + $0xd40] sm:$0xf0] }
 0x37c   : > { %6345 = vmatpush.bf16.msrb.mxu2 %v9218_v33  ;;  %v10705_v33 = vld [vmem:[#allocation15 + $0x560] sm:$0xf0] }
 0x37d   : > { %6411 = vmatpush.bf16.msra.mxu3 %v8522_v3  ;;  %v8410_v3 = vor.u32 %v10534_v47, %v8407_v54  ;;  %6384 = vmatpush.bf16.msra.mxu1 %v9890_v51  ;;  %v9077_v47 = vld [vmem:[#allocation15 + $0x548] sm:$0xf]  ;;  %v8662_v54 = vor.u32 %v10597_v40, %v8659_v43 }
 0x37e   : > { %6423 = vmatpush.bf16.msrb.mxu0 %v8774_v57  ;;  %v6159_v37 = vpop.f32.mrf.mxu3  ;;  %v9749_v51 = vld [vmem:[#allocation15 + $0xa88] sm:$0xf]  ;;  %v10590_v57 = vld [vmem:[#allocation15 + $0x1cc] sm:$0xf] }
 0x37f   : > { %v9303_v43 = vld [vmem:[#allocation15 + $0x724] sm:$0xf0] }
 0x380   : > { %6346 = vmatpush.bf16.msrb.mxu2 %v9190_v42  ;;  %v9078_v42 = vor.u32 %v10705_v33, %v9077_v47  ;;  %v8967_v47 = vld [vmem:[#allocation15 + $0x484] sm:$0xf0]  ;;  %v10842_v33 = vld [vmem:[#allocation15 + $0x9ac] sm:$0xf] }
 0x381   : > { %6412 = vmatpush.bf16.msra.mxu3 %v8494_v32  ;;  %6385 = vmatpush.bf16.msra.mxu1 %v9862_v28  ;;  %v9162_v32 = vor.u32 %v10726_v6, %v9161_v5  ;;  %v9750_v28 = vor.u32 %v10873_v56, %v9749_v51  ;;  %v10863_v5 = vld [vmem:[#allocation15 + $0xa54] sm:$0xf]  ;;  %v9723_v6 = vld [vmem:[#allocation15 + $0xa6c] sm:$0xf0] }
 0x382   : > { %6424 = vmatpush.bf16.msrb.mxu0 %v8746_v7  ;;  %v8634_v7 = vor.u32 %v10590_v57, %v8631_v60  ;;  %v9726_v14 = vor.u32 %v10863_v5, %v9723_v6  ;;  %v10587_v56 = vld [vmem:[#allocation15 + $0x1b0] sm:$0xf0]  ;;  %v10086_v60 = vor.u32 %v10957_v46, %v10085_v44  ;;  %v9611_v5 = vld [vmem:[#allocation15 + $0x98c] sm:$0xf0]  ;;  %v8581_v6 = vld [vmem:[#allocation15 + $0x160] sm:$0xf] }
 0x383   : > { %v9973_v44 = vld [vmem:[#allocation15 + $0xc48] sm:$0xf]  ;;  %v10929_v46 = vld [vmem:[#allocation15 + $0xc60] sm:$0xf0] }
 0x384   : > { %6347 = vmatpush.bf16.msrb.mxu2 %v9162_v32  ;;  %v10688_v32 = vld [vmem:[#allocation15 + $0x4dc] sm:$0xf] }
 0x385   : > { %6413 = vmatpush.bf16.msra.mxu3 %v8466_v41  ;;  %6386 = vmatpush.bf16.msra.mxu1 %v9834_v19  ;;  %v9105_v41 = vld [vmem:[#allocation15 + $0x580] sm:$0xf]  ;;  %v9023_v19 = vld [vmem:[#allocation15 + $0x4f4] sm:$0xf0] }
 0x386   : > { %6425 = vmatpush.bf16.msrb.mxu0 %v8718_v25  ;;  %v9106_v48 = vor.u32 %v10712_v36, %v9105_v41  ;;  %v9695_v25 = vld [vmem:[#allocation15 + $0xa34] sm:$0xf0]  ;;  %v9026_v21 = vor.u32 %v10688_v32, %v9023_v19  ;;  %v8995_v41 = vld [vmem:[#allocation15 + $0x4bc] sm:$0xf0]  ;;  %v10849_v36 = vld [vmem:[#allocation15 + $0x9e4] sm:$0xf] }
 0x387   : > { %v9698_v31 = vor.u32 %v10856_v24, %v9695_v25  ;;  %v8911_v32 = vld [vmem:[#allocation15 + $0x414] sm:$0xf0]  ;;  %v10828_v19 = vld [vmem:[#allocation15 + $0x93c] sm:$0xf]  ;;  %v8553_v25 = vld [vmem:[#allocation15 + $0x128] sm:$0xf] }
 0x388   : > { %6348 = vmatpush.bf16.msrb.mxu2 %v9134_v2  ;;  %v10964_v2 = vld [vmem:[#allocation15 + $0xd78] sm:$0xf0]  ;;  %v9583_v24 = vld [vmem:[#allocation15 + $0x954] sm:$0xf0] }
 0x389   : > { %6414 = vmatpush.bf16.msra.mxu3 %v8438_v49  ;;  %6387 = vmatpush.bf16.msra.mxu1 %v9806_v34  ;;  %v9778_v49 = vor.u32 %v10880_v63, %v9777_v16  ;;  %v10681_v34 = vld [vmem:[#allocation15 + $0x4a4] sm:$0xf]  ;;  %v10758_v16 = vld [vmem:[#allocation15 + $0x70c] sm:$0xf]  ;;  %v10114_v63 = vor.u32 %v10964_v2, %v10113_v15  ;;  %v10936_v15 = vld [vmem:[#allocation15 + $0xc98] sm:$0xf0] }
 0x38a   : > { %6426 = vmatpush.bf16.msrb.mxu0 %v8690_v39  ;;  %v9667_v39 = vld [vmem:[#allocation15 + $0x9fc] sm:$0xf0]  ;;  %v8998_v40 = vor.u32 %v10681_v34, %v8995_v41  ;;  %v9306_v57 = vor.u32 %v10758_v16, %v9303_v43  ;;  %v10653_v34 = vld [vmem:[#allocation15 + $0x3c4] sm:$0xf]  ;;  %v10566_v16 = vld [vmem:[#allocation15 + $0x108] sm:$0xf0] }
 0x38b   : > { %v8883_v41 = vld [vmem:[#allocation15 + $0x3dc] sm:$0xf0] }
 0x38c   : > { %6349 = vmatpush.bf16.msrb.mxu2 %v9106_v48  ;;  %v9670_v48 = vor.u32 %v10849_v36, %v9667_v39  ;;  %v10821_v36 = vld [vmem:[#allocation15 + $0x904] sm:$0xf]  ;;  %v9555_v39 = vld [vmem:[#allocation15 + $0x91c] sm:$0xf0] }
 0x38d   : > { %6415 = vmatpush.bf16.msra.mxu3 %v8410_v3  ;;  %v9051_v3 = vld [vmem:[#allocation15 + $0x52c] sm:$0xf0]  ;;  %6388 = vmatpush.bf16.msra.mxu1 %v9778_v49  ;;  %v10674_v49 = vld [vmem:[#allocation15 + $0x46c] sm:$0xf] }
 0x38e   : > { %6427 = vmatpush.bf16.msrb.mxu0 %v8662_v54  ;;  %v9054_v11 = vor.u32 %v10695_v45, %v9051_v3  ;;  %v9639_v54 = vld [vmem:[#allocation15 + $0x9c4] sm:$0xf0]  ;;  %v10667_v3 = vld [vmem:[#allocation15 + $0x434] sm:$0xf] }
 0x38f   : > { %v9642_v0 = vor.u32 %v10842_v33, %v9639_v54  ;;  %v10814_v54 = vld [vmem:[#allocation15 + $0x8cc] sm:$0xf] }
 0x390   : > { %6416 = vmatmul.bf16.vlgmr.msra.gmra.mxu3 %v11738_v1  ;;  %6350 = vmatpush.bf16.msrb.mxu2 %v9078_v42  ;;  %v11816_v37 = vpop.f32.mrf.mxu0  ;;  %v8939_v42 = vld [vmem:[#allocation15 + $0x44c] sm:$0xf0] }
 0x391   : > { %6460 = vmatpush.bf16.msrb.mxu3 %v9502_v50  ;;  %v9390_v50 = vor.u32 %v10779_v61, %v9387_v62  ;;  %6389 = vmatpush.bf16.msra.mxu1 %v9750_v28  ;;  %v8970_v61 = vor.u32 %v10674_v49, %v8967_v47  ;;  %v10057_v62 = vld [vmem:[#allocation15 + $0xcf0] sm:$0xf]  ;;  %v10835_v28 = vld [vmem:[#allocation15 + $0x974] sm:$0xf]  ;;  %v9558_v49 = vor.u32 %v10821_v36, %v9555_v39 }
 0x392   : > { %6428 = vmatpush.bf16.msrb.mxu0 %v8634_v7  ;;  %v10580_v7 = vld [vmem:[#allocation15 + $0x178] sm:$0xf0]  ;;  %v9614_v35 = vor.u32 %v10835_v28, %v9611_v5  ;;  %v8413_v39 = vld [vmem:[#allocation15 + $0x10] sm:$0xf] }
 0x393   : > { %v11811_v20 = vpop.f32.mrf.mxu3  ;;  %6351 = vmatmul.bf16.vlgmr.msrb.gmra.mxu2 %v11755_v53 }
 0x394   : > { %6395 = vmatpush.bf16.msra.mxu2 %v10170_v10  ;;  %6390 = vmatmul.bf16.vlgmr.msra.gmra.mxu1 %v11782_v52  ;;  %v8942_v10 = vor.u32 %v10667_v3, %v8939_v42  ;;  %v10643_v3 = vld [vmem:[#allocation15 + $0x370] sm:$0xf0] }
 0x395   : > { %6461 = vmatpush.bf16.msrb.mxu3 %v9474_v26  ;;  %v9362_v26 = vor.u32 %v10772_v12, %v9359_v13  ;;  %6434 = vmatpush.bf16.msrb.mxu1 %v9054_v11  ;;  %v10029_v12 = vld [vmem:[#allocation15 + $0xcb8] sm:$0xf]  ;;  %v10943_v13 = vld [vmem:[#allocation15 + $0xcd0] sm:$0xf0] }
 0x396   : > { %6473 = vmatpush.bf16.msra.mxu0 %v9726_v14  ;;  %v8582_v14 = vor.u32 %v10580_v7, %v8581_v6  ;;  %v8469_v7 = vld [vmem:[#allocation15 + $0x80] sm:$0xf] }
 0x397   : > { %6429 = vmatmul.bf16.vlgmr.msrb.gmra.mxu0 %v11744_v17 }
 0x398   : > { %6396 = vmatpush.bf16.msra.mxu2 %v10142_v27  ;;  %v6172_v11 = vpop.f32.mrf.mxu0  ;;  %v3779_v27 = vperm.slane %v11792_v8, 1 }
 0x399   : > { %6462 = vmatpush.bf16.msrb.mxu3 %v9446_v30  ;;  %v9334_v30 = vor.u32 %v10765_v18, %v9331_v29  ;;  %6435 = vmatpush.bf16.msrb.mxu1 %v9026_v21  ;;  %v10030_v21 = vor.u32 %v10943_v13, %v10029_v12  ;;  %v8914_v18 = vor.u32 %v10660_v59, %v8911_v32  ;;  %v10001_v29 = vld [vmem:[#allocation15 + $0xc80] sm:$0xf]  ;;  %v9247_v13 = vld [vmem:[#allocation15 + $0x6b4] sm:$0xf0] }
 0x39a   : > { %6474 = vmatpush.bf16.msra.mxu0 %v9698_v31  ;;  %v9586_v31 = vor.u32 %v10828_v19, %v9583_v24  ;;  %v10002_v8 = vor.u32 %v10936_v15, %v10001_v29  ;;  %v8805_v32 = vld [vmem:[#allocation15 + $0x320] sm:$0xf]  ;;  %v10636_v19 = vld [vmem:[#allocation15 + $0x338] sm:$0xf0] }
 0x39b   : > { %v6211_v51 = vpop.f32.mrf.mxu3  ;;  %v8806_v29 = vor.u32 %v10636_v19, %v8805_v32  ;;  %v9219_v15 = vld [vmem:[#allocation15 + $0x67c] sm:$0xf0]  ;;  %v9807_v32 = vld [vmem:[#allocation15 + $0xb14] sm:$0xf0] }
 0x39c   : > { %6397 = vmatpush.bf16.msra.mxu2 %v10114_v63  ;;  %v6210_v63 = vadd.f32 %v11811_v20, %v3779_v27  ;;  %v8855_v51 = vld [vmem:[#allocation15 + $0x3a4] sm:$0xf0]  ;;  %v10751_v20 = vld [vmem:[#allocation15 + $0x6d4] sm:$0xf]  ;;  %v8693_v19 = vld [vmem:[#allocation15 + $0x240] sm:$0xf] }
 0x39d   : > { %6463 = vmatpush.bf16.msrb.mxu3 %v9418_v55  ;;  %v8609_v55 = vld [vmem:[#allocation15 + $0x198] sm:$0xf]  ;;  %6436 = vmatpush.bf16.msrb.mxu1 %v8998_v40  ;;  %v8886_v40 = vor.u32 %v10653_v34, %v8883_v41  ;;  %v8441_v27 = vld [vmem:[#allocation15 + $0x48] sm:$0xf]  ;;  %v10629_v41 = vld [vmem:[#allocation15 + $0x300] sm:$0xf0] }
 0x39e   : > { %6475 = vmatpush.bf16.msra.mxu0 %v9670_v48  ;;  %v8610_v45 = vor.u32 %v10587_v56, %v8609_v55  ;;  %v10646_v48 = vld [vmem:[#allocation15 + $0x38c] sm:$0xf]  ;;  %v9527_v55 = vld [vmem:[#allocation15 + $0x8e4] sm:$0xf0]  ;;  %v8497_v56 = vld [vmem:[#allocation15 + $0xb8] sm:$0xf] }
 0x39f   : > { %v9530_v42 = vor.u32 %v10814_v54, %v9527_v55  ;;  %v8777_v34 = vld [vmem:[#allocation15 + $0x2e8] sm:$0xf]  ;;  %v10622_v54 = vld [vmem:[#allocation15 + $0x2c8] sm:$0xf0]  ;;  %v9505_v55 = vld [vmem:[#allocation15 + $0x898] sm:$0xf] }
 0x3a0   : > { %6398 = vmatpush.bf16.msra.mxu2 %v10086_v60  ;;  %v6222_v43 = vpop.f32.mrf.mxu0  ;;  %v9275_v60 = vld [vmem:[#allocation15 + $0x6ec] sm:$0xf0] }
 0x3a1   : > { %6464 = vmatpush.bf16.msrb.mxu3 %v9390_v50  ;;  %6437 = vmatpush.bf16.msrb.mxu1 %v8970_v61  ;;  %v10058_v50 = vor.u32 %v10950_v22, %v10057_v62  ;;  %v11821_v33 = vadd.f32 %v6222_v43, %v6210_v63  ;;  %v10919_v61 = vld [vmem:[#allocation15 + $0xc14] sm:$0xf]  ;;  %v9947_v62 = vld [vmem:[#allocation15 + $0xc2c] sm:$0xf0]  ;;  %v9974_v22 = vor.u32 %v10929_v46, %v9973_v44  ;;  %v9191_v43 = vld [vmem:[#allocation15 + $0x644] sm:$0xf0] }
 0x3a2   : > { %6476 = vmatpush.bf16.msra.mxu0 %v9642_v0  ;;  %v8858_v0 = vor.u32 %v10646_v48, %v8855_v51  ;;  %v9278_v5 = vor.u32 %v10751_v20, %v9275_v60  ;;  %v9950_v6 = vor.u32 %v10919_v61, %v9947_v62  ;;  %v8778_v46 = vor.u32 %v10629_v41, %v8777_v34  ;;  %v10898_v48 = vld [vmem:[#allocation15 + $0xb6c] sm:$0xf]  ;;  %v10723_v61 = vld [vmem:[#allocation15 + $0x5f4] sm:$0xf]  ;;  %v9163_v62 = vld [vmem:[#allocation15 + $0x60c] sm:$0xf0] }
 0x3a3   : > { %v10877_v34 = vld [vmem:[#allocation15 + $0xac4] sm:$0xf]  ;;  %v9779_v41 = vld [vmem:[#allocation15 + $0xadc] sm:$0xf0] }
 0x3a4   : > { %6399 = vmatpush.bf16.msra.mxu2 %v10058_v50  ;;  %v10552_v50 = vld [vmem:[#allocation15 + $0x98] sm:$0xf0] }
 0x3a5   : > { %6465 = vmatpush.bf16.msrb.mxu3 %v9362_v26  ;;  %v10573_v26 = vld [vmem:[#allocation15 + $0x140] sm:$0xf0]  ;;  %6438 = vmatpush.bf16.msrb.mxu1 %v8942_v10  ;;  %v10744_v10 = vld [vmem:[#allocation15 + $0x69c] sm:$0xf]  ;;  %v8470_v24 = vor.u32 %v10552_v50, %v8469_v7  ;;  %v9166_v7 = vor.u32 %v10723_v61, %v9163_v62  ;;  %v10171_v61 = vld [vmem:[#allocation15 + $0xdec] sm:$0xf0] }
 0x3a6   : > { %6477 = vmatpush.bf16.msra.mxu0 %v9614_v35  ;;  %v8554_v2 = vor.u32 %v10573_v26, %v8553_v25  ;;  %v10912_v35 = vld [vmem:[#allocation15 + $0xbdc] sm:$0xf]  ;;  %v9250_v25 = vor.u32 %v10744_v10, %v9247_v13  ;;  %v9135_v13 = vld [vmem:[#allocation15 + $0x5d4] sm:$0xf0] }
 0x3a7   : > { %v9057_v62 = vld [vmem:[#allocation15 + $0x518] sm:$0xf] }
 0x3a8   : > { %6400 = vmatpush.bf16.msra.mxu2 %v10030_v21  ;;  %v6224_v59 = vpop.f32.mrf.mxu0  ;;  %v10545_v21 = vld [vmem:[#allocation15 + $0x60] sm:$0xf0] }
 0x3a9   : > { %6466 = vmatpush.bf16.msrb.mxu3 %v9334_v30  ;;  %v8525_v30 = vld [vmem:[#allocation15 + $0xf0] sm:$0xf]  ;;  %6439 = vmatpush.bf16.msrb.mxu1 %v8914_v18  ;;  %v10737_v18 = vld [vmem:[#allocation15 + $0x664] sm:$0xf]  ;;  %v8442_v36 = vor.u32 %v10545_v21, %v8441_v27  ;;  %v10884_v59 = vld [vmem:[#allocation15 + $0xafc] sm:$0xf] }
 0x3aa   : > { %6478 = vmatpush.bf16.msra.mxu0 %v9586_v31  ;;  %v8526_v47 = vor.u32 %v10566_v16, %v8525_v30  ;;  %v10905_v31 = vld [vmem:[#allocation15 + $0xba4] sm:$0xf]  ;;  %v9222_v30 = vor.u32 %v10737_v18, %v9219_v15  ;;  %v9810_v18 = vor.u32 %v10884_v59, %v9807_v32  ;;  %v9107_v15 = vld [vmem:[#allocation15 + $0x59c] sm:$0xf0]  ;;  %v10692_v32 = vld [vmem:[#allocation15 + $0x4f8] sm:$0xf0] }
 0x3ab   : > { %v10797_v27 = vld [vmem:[#allocation15 + $0x840] sm:$0xf0]  ;;  %v9029_v59 = vld [vmem:[#allocation15 + $0x4e0] sm:$0xf] }
 0x3ac   : > { %6401 = vmatpush.bf16.msra.mxu2 %v10002_v8  ;;  %v10538_v8 = vld [vmem:[#allocation15 + $0x28] sm:$0xf0] }
 0x3ad   : > { %6467 = vmatpush.bf16.msrb.mxu3 %v9306_v57  ;;  %v10559_v57 = vld [vmem:[#allocation15 + $0xd0] sm:$0xf0]  ;;  %6440 = vmatpush.bf16.msrb.mxu1 %v8886_v40  ;;  %v10730_v40 = vld [vmem:[#allocation15 + $0x62c] sm:$0xf] }
 0x3ae   : > { %6479 = vmatpush.bf16.msra.mxu0 %v9558_v49  ;;  %v8498_v28 = vor.u32 %v10559_v57, %v8497_v56  ;;  %v9863_v49 = vld [vmem:[#allocation15 + $0xb84] sm:$0xf0]  ;;  %v10811_v56 = vld [vmem:[#allocation15 + $0x8b0] sm:$0xf0]  ;;  %v8414_v57 = vor.u32 %v10538_v8, %v8413_v39  ;;  %v9194_v20 = vor.u32 %v10730_v40, %v9191_v43  ;;  %v10601_v39 = vld [vmem:[#allocation15 + $0x220] sm:$0xf0]  ;;  %v9782_v40 = vor.u32 %v10877_v34, %v9779_v41 }
 0x3af   : > { %v9866_v60 = vor.u32 %v10898_v48, %v9863_v49  ;;  %v10870_v48 = vld [vmem:[#allocation15 + $0xa8c] sm:$0xf]  ;;  %v9001_v34 = vld [vmem:[#allocation15 + $0x4a8] sm:$0xf]  ;;  %v10685_v41 = vld [vmem:[#allocation15 + $0x4c0] sm:$0xf0] }
 0x3b0   : > { %6468 = vmatmul.bf16.vlgmr.msrb.gmra.mxu3 %v11762_v23  ;;  %6402 = vmatpush.bf16.msra.mxu2 %v9974_v22  ;;  %v11828_v63 = vpop.f32.mrf.mxu1 }
 0x3b1   : > { %6512 = vmatpush.bf16.msra.mxu3 %v8610_v45  ;;  %v8833_v45 = vld [vmem:[#allocation15 + $0x358] sm:$0xf]  ;;  %6441 = vmatpush.bf16.msrb.mxu1 %v8858_v0  ;;  %v11830_v51 = vpop.f32.mrf.mxu0  ;;  %v9506_v0 = vor.u32 %v10811_v56, %v9505_v55  ;;  %v8637_v55 = vld [vmem:[#allocation15 + $0x1d0] sm:$0xf]  ;;  %v10594_v56 = vld [vmem:[#allocation15 + $0x1e8] sm:$0xf0] }
 0x3b2   : > { %v8834_v12 = vor.u32 %v10643_v3, %v8833_v45  ;;  %6480 = vmatpush.bf16.msra.mxu0 %v9530_v42  ;;  %v10891_v45 = vld [vmem:[#allocation15 + $0xb34] sm:$0xf]  ;;  %v9835_v3 = vld [vmem:[#allocation15 + $0xb4c] sm:$0xf0]  ;;  %v8721_v42 = vld [vmem:[#allocation15 + $0x278] sm:$0xf] }
 0x3b3   : > { %v11823_v11 = vpop.f32.mrf.mxu3  ;;  %6403 = vmatmul.bf16.vlgmr.msra.gmra.mxu2 %v11795_v9  ;;  %v9838_v50 = vor.u32 %v10891_v45, %v9835_v3  ;;  %v9729_v3 = vld [vmem:[#allocation15 + $0xa58] sm:$0xf] }
 0x3b4   : > { %6447 = vmatpush.bf16.msrb.mxu2 %v9278_v5  ;;  %6442 = vmatmul.bf16.vlgmr.msrb.gmra.mxu1 %v11752_v4  ;;  %v9477_v5 = vld [vmem:[#allocation15 + $0x860] sm:$0xf] }
 0x3b5   : > { %6513 = vmatpush.bf16.msra.mxu3 %v8582_v14  ;;  %v9919_v14 = vld [vmem:[#allocation15 + $0xbf4] sm:$0xf0]  ;;  %6486 = vmatpush.bf16.msra.mxu1 %v9950_v6  ;;  %v10804_v6 = vld [vmem:[#allocation15 + $0x878] sm:$0xf0] }
 0x3b6   : > { %v9922_v26 = vor.u32 %v10912_v35, %v9919_v14  ;;  %6525 = vmatpush.bf16.msrb.mxu0 %v8834_v12  ;;  %v10716_v12 = vld [vmem:[#allocation15 + $0x5bc] sm:$0xf]  ;;  %v9478_v14 = vor.u32 %v10804_v6, %v9477_v5 }
 0x3b7   : > { %6481 = vmatmul.bf16.vlgmr.msra.gmra.mxu0 %v11773_v58  ;;  %v9138_v21 = vor.u32 %v10716_v12, %v9135_v13  ;;  %v10776_v12 = vld [vmem:[#allocation15 + $0x798] sm:$0xf0] }
 0x3b8   : > { %6448 = vmatpush.bf16.msrb.mxu2 %v9250_v25  ;;  %v6185_v10 = vpop.f32.mrf.mxu1  ;;  %v10608_v25 = vld [vmem:[#allocation15 + $0x258] sm:$0xf0] }
 0x3b9   : > { %6514 = vmatpush.bf16.msra.mxu3 %v8554_v2  ;;  %v9891_v2 = vld [vmem:[#allocation15 + $0xbbc] sm:$0xf0]  ;;  %6487 = vmatpush.bf16.msra.mxu1 %v9922_v26  ;;  %v9449_v26 = vld [vmem:[#allocation15 + $0x828] sm:$0xf]  ;;  %v10968_v13 = vld [vmem:[#allocation15 + $0xd9c] sm:$0xf] }
 0x3ba   : > { %v9894_v16 = vor.u32 %v10905_v31, %v9891_v2  ;;  %6526 = vmatpush.bf16.msrb.mxu0 %v8806_v29  ;;  %v10709_v29 = vld [vmem:[#allocation15 + $0x584] sm:$0xf]  ;;  %v8694_v31 = vor.u32 %v10608_v25, %v8693_v19  ;;  %v9450_v2 = vor.u32 %v10797_v27, %v9449_v26  ;;  %v9365_v10 = vld [vmem:[#allocation15 + $0x780] sm:$0xf]  ;;  %v10860_v25 = vld [vmem:[#allocation15 + $0xa38] sm:$0xf0] }
 0x3bb   : > { %v6263_v44 = vpop.f32.mrf.mxu3  ;;  %v9110_v8 = vor.u32 %v10709_v29, %v9107_v15  ;;  %v9366_v26 = vor.u32 %v10776_v12, %v9365_v10  ;;  %v10769_v29 = vld [vmem:[#allocation15 + $0x760] sm:$0xf0] }
 0x3bc   : > { %6449 = vmatpush.bf16.msrb.mxu2 %v9222_v30  ;;  %v9421_v30 = vld [vmem:[#allocation15 + $0x7f0] sm:$0xf]  ;;  %v10702_v44 = vld [vmem:[#allocation15 + $0x54c] sm:$0xf]  ;;  %v10961_v15 = vld [vmem:[#allocation15 + $0xd64] sm:$0xf] }
 0x3bd   : > { %6515 = vmatpush.bf16.msra.mxu3 %v8526_v47  ;;  %v8749_v47 = vld [vmem:[#allocation15 + $0x2b0] sm:$0xf]  ;;  %6488 = vmatpush.bf16.msra.mxu1 %v9894_v16  ;;  %v10790_v16 = vld [vmem:[#allocation15 + $0x808] sm:$0xf0] }
 0x3be   : > { %6527 = vmatpush.bf16.msrb.mxu0 %v8778_v46  ;;  %v8750_v22 = vor.u32 %v10622_v54, %v8749_v47  ;;  %v9079_v46 = vld [vmem:[#allocation15 + $0x564] sm:$0xf0]  ;;  %v9422_v47 = vor.u32 %v10790_v16, %v9421_v30  ;;  %v10853_v16 = vld [vmem:[#allocation15 + $0xa00] sm:$0xf0] }
 0x3bf   : > { %v9751_v54 = vld [vmem:[#allocation15 + $0xaa4] sm:$0xf0] }
 0x3c0   : > { %6450 = vmatpush.bf16.msrb.mxu2 %v9194_v20  ;;  %v11833_v43 = vpop.f32.mrf.mxu1  ;;  %v10783_v20 = vld [vmem:[#allocation15 + $0x7d0] sm:$0xf0]  ;;  %v9754_v45 = vor.u32 %v10870_v48, %v9751_v54  ;;  %v9673_v30 = vld [vmem:[#allocation15 + $0x9e8] sm:$0xf]  ;;  %v9002_v48 = vor.u32 %v10685_v41, %v9001_v34  ;;  %v10832_v34 = vld [vmem:[#allocation15 + $0x958] sm:$0xf0] }
 0x3c1   : > { %6516 = vmatpush.bf16.msra.mxu3 %v8498_v28  ;;  %v10615_v28 = vld [vmem:[#allocation15 + $0x290] sm:$0xf0]  ;;  %6489 = vmatpush.bf16.msra.mxu1 %v9866_v60  ;;  %v10087_v54 = vld [vmem:[#allocation15 + $0xd44] sm:$0xf0]  ;;  %v10570_v41 = vld [vmem:[#allocation15 + $0x12c] sm:$0xf] }
 0x3c2   : > { %6528 = vmatpush.bf16.msrb.mxu0 %v8750_v22  ;;  %v8722_v35 = vor.u32 %v10615_v28, %v8721_v42  ;;  %v10975_v60 = vld [vmem:[#allocation15 + $0xdd4] sm:$0xf]  ;;  %v8638_v28 = vor.u32 %v10594_v56, %v8637_v55  ;;  %v9674_v55 = vor.u32 %v10853_v16, %v9673_v30  ;;  %v8973_v56 = vld [vmem:[#allocation15 + $0x470] sm:$0xf] }
 0x3c3   : > { %v10699_v22 = vld [vmem:[#allocation15 + $0x530] sm:$0xf0] }
 0x3c4   : > { %6451 = vmatpush.bf16.msrb.mxu2 %v9166_v7  ;;  %v10867_v42 = vld [vmem:[#allocation15 + $0xa70] sm:$0xf0]  ;;  %v10174_v7 = vor.u32 %v10975_v60, %v10171_v61 }
 0x3c5   : > { %6517 = vmatpush.bf16.msra.mxu3 %v8470_v24  ;;  %v6276_v24 = vpop.f32.mrf.mxu0  ;;  %6490 = vmatpush.bf16.msra.mxu1 %v9838_v50  ;;  %v9058_v50 = vor.u32 %v10699_v22, %v9057_v62  ;;  %v10846_v62 = vld [vmem:[#allocation15 + $0x9c8] sm:$0xf0]  ;;  %v10584_v22 = vld [vmem:[#allocation15 + $0x19c] sm:$0xf] }
 0x3c6   : > { %6529 = vmatpush.bf16.msrb.mxu0 %v8722_v35  ;;  %v9730_v35 = vor.u32 %v10867_v42, %v9729_v3  ;;  %v9701_v24 = vld [vmem:[#allocation15 + $0xa20] sm:$0xf] }
 0x3c8   : > { %6452 = vmatpush.bf16.msrb.mxu2 %v9138_v21  ;;  %v6237_v19 = vpop.f32.mrf.mxu1  ;;  %v9030_v21 = vor.u32 %v10692_v32, %v9029_v59  ;;  %v10839_v59 = vld [vmem:[#allocation15 + $0x990] sm:$0xf0]  ;;  %v10577_v32 = vld [vmem:[#allocation15 + $0x164] sm:$0xf] }
 0x3c9   : > { %6518 = vmatpush.bf16.msra.mxu3 %v8442_v36  ;;  %v8665_v36 = vld [vmem:[#allocation15 + $0x208] sm:$0xf]  ;;  %6491 = vmatpush.bf16.msra.mxu1 %v9810_v18  ;;  %v8583_v19 = vld [vmem:[#allocation15 + $0x17c] sm:$0xf0] }
 0x3ca   : > { %6530 = vmatpush.bf16.msrb.mxu0 %v8694_v31  ;;  %v8666_v49 = vor.u32 %v10601_v39, %v8665_v36  ;;  %v9337_v18 = vld [vmem:[#allocation15 + $0x748] sm:$0xf]  ;;  %v9702_v31 = vor.u32 %v10860_v25, %v9701_v24  ;;  %v11836_v36 = vld [vmem:[#allocation16] sm:$0xff] }
 0x3cb   : > { %v3780_v39 = vperm.slane %v11836_v36, 2 }
 0x3cc   : > { %6453 = vmatpush.bf16.msrb.mxu2 %v9110_v8  ;;  %v9338_v8 = vor.u32 %v10769_v29, %v9337_v18  ;;  %v8586_v18 = vor.u32 %v10577_v32, %v8583_v19  ;;  %v8917_v29 = vld [vmem:[#allocation15 + $0x400] sm:$0xf]  ;;  %v10640_v32 = vld [vmem:[#allocation15 + $0x35c] sm:$0xf]  ;;  %v8835_v19 = vld [vmem:[#allocation15 + $0x374] sm:$0xf0] }
 0x3cd   : > { %6519 = vmatpush.bf16.msra.mxu3 %v8414_v57  ;;  %v9393_v57 = vld [vmem:[#allocation15 + $0x7b8] sm:$0xf]  ;;  %6492 = vmatpush.bf16.msra.mxu1 %v9782_v40  ;;  %v9309_v40 = vld [vmem:[#allocation15 + $0x710] sm:$0xf] }
 0x3ce   : > { %6531 = vmatpush.bf16.msrb.mxu0 %v8666_v49  ;;  %v9394_v5 = vor.u32 %v10783_v20, %v9393_v57  ;;  %v10762_v49 = vld [vmem:[#allocation15 + $0x728] sm:$0xf0]  ;;  %v9645_v20 = vld [vmem:[#allocation15 + $0x9b0] sm:$0xf] }
 0x3cf   : > { %v10678_v57 = vld [vmem:[#allocation15 + $0x488] sm:$0xf0]  ;;  %v9310_v42 = vor.u32 %v10762_v49, %v9309_v40  ;;  %v9646_v12 = vor.u32 %v10846_v62, %v9645_v20  ;;  %v10933_v40 = vld [vmem:[#allocation15 + $0xc84] sm:$0xf]  ;;  %v8889_v49 = vld [vmem:[#allocation15 + $0x3c8] sm:$0xf] }
 0x3d0   : > { %6520 = vmatmul.bf16.vlgmr.msra.gmra.mxu3 %v11738_v1  ;;  %v11841_v61 = vpop.f32.mrf.mxu1  ;;  %v8527_v20 = vld [vmem:[#allocation15 + $0x10c] sm:$0xf0] }
 0x3d1   : > { %6564 = vmatpush.bf16.msrb.mxu3 %v9506_v0  ;;  %v9082_v0 = vor.u32 %v10702_v44, %v9079_v46  ;;  %6493 = vmatpush.bf16.msra.mxu1 %v9754_v45  ;;  %v6171_v45 = vadd.f32 %v11816_v37, %v11808_v38  ;;  %v9617_v38 = vld [vmem:[#allocation15 + $0x978] sm:$0xf] }
 0x3d2   : > { %6532 = vmatpush.bf16.msrb.mxu0 %v8638_v28 }
 0x3d3   : > { %v6313_v6 = vpop.f32.mrf.mxu3  ;;  %6454 = vmatpush.bf16.msrb.mxu2 %v9082_v0  ;;  %v8611_v0 = vld [vmem:[#allocation15 + $0x1b4] sm:$0xf0]  ;;  %v6326_v3 = vpop.f32.mrf.mxu0  ;;  %v6184_v10 = vadd.f32 %v11828_v63, %v6171_v45  ;;  %v9618_v63 = vor.u32 %v10839_v59, %v9617_v38  ;;  %v9975_v45 = vld [vmem:[#allocation15 + $0xc64] sm:$0xf0]  ;;  %v10923_v38 = vld [vmem:[#allocation15 + $0xc30] sm:$0xf0] }
 0x3d4   : > { %6494 = vmatmul.bf16.vlgmr.msra.gmra.mxu1 %v11782_v52  ;;  %v6314_v60 = vadd.f32 %v6313_v6, %v3780_v39  ;;  %v10059_v6 = vld [vmem:[#allocation15 + $0xd0c] sm:$0xf0]  ;;  %v8555_v39 = vld [vmem:[#allocation15 + $0x144] sm:$0xf0] }
 0x3d5   : > { %6565 = vmatpush.bf16.msrb.mxu3 %v9478_v14  ;;  %v10143_v14 = vld [vmem:[#allocation15 + $0xdb4] sm:$0xf0]  ;;  %6538 = vmatpush.bf16.msrb.mxu1 %v9058_v50  ;;  %v10947_v50 = vld [vmem:[#allocation15 + $0xcf4] sm:$0xf] }
 0x3d6   : > { %v10146_v27 = vor.u32 %v10968_v13, %v10143_v14  ;;  %6577 = vmatpush.bf16.msra.mxu0 %v9730_v35  ;;  %6455 = vmatmul.bf16.vlgmr.msrb.gmra.mxu2 %v11755_v53  ;;  %v11845_v28 = vadd.f32 %v6326_v3, %v6314_v60  ;;  %v8614_v13 = vor.u32 %v10584_v22, %v8611_v0  ;;  %v8945_v35 = vld [vmem:[#allocation15 + $0x438] sm:$0xf]  ;;  %v10671_v14 = vld [vmem:[#allocation15 + $0x450] sm:$0xf0]  ;;  %v6196_v37 = vpop.f32.mrf.mxu2  ;;  %v10926_v0 = vld [vmem:[#allocation15 + $0xc4c] sm:$0xf] }
 0x3d7   : > { %6499 = vmatpush.bf16.msra.mxu2 %v10174_v7  ;;  %6533 = vmatmul.bf16.vlgmr.msrb.gmra.mxu0 %v11744_v17  ;;  %v8974_v7 = vor.u32 %v10678_v57, %v8973_v56  ;;  %v6197_v24 = vadd.f32 %v6196_v37, %v6184_v10  ;;  %v10062_v25 = vor.u32 %v10947_v50, %v10059_v6  ;;  %v10825_v56 = vld [vmem:[#allocation15 + $0x920] sm:$0xf0]  ;;  %v10563_v57 = vld [vmem:[#allocation15 + $0xf4] sm:$0xf]  ;;  %v8861_v3 = vld [vmem:[#allocation15 + $0x390] sm:$0xf] }
 0x3d8   : > { %v9533_v50 = vld [vmem:[#allocation15 + $0x8d0] sm:$0xf]  ;;  %v10818_v6 = vld [vmem:[#allocation15 + $0x8e8] sm:$0xf0]  ;;  %v10556_v10 = vld [vmem:[#allocation15 + $0xbc] sm:$0xf]  ;;  %v9978_v37 = vor.u32 %v10926_v0, %v9975_v45 }
 0x3d9   : > { %6566 = vmatpush.bf16.msrb.mxu3 %v9450_v2  ;;  %v10115_v2 = vld [vmem:[#allocation15 + $0xd7c] sm:$0xf0]  ;;  %6539 = vmatpush.bf16.msrb.mxu1 %v9030_v21  ;;  %v10031_v21 = vld [vmem:[#allocation15 + $0xcd4] sm:$0xf0]  ;;  %11102 = vtanh.f32 %v6197_v24  ;;  %v6236_v24 = vadd.f32 %v11833_v43, %v11821_v33  ;;  %v10633_v33 = vld [vmem:[#allocation15 + $0x324] sm:$0xf] }
 0x3da   : > { %v10118_v46 = vor.u32 %v10961_v15, %v10115_v2  ;;  %6578 = vmatpush.bf16.msra.mxu0 %v9702_v31  ;;  %v10664_v15 = vld [vmem:[#allocation15 + $0x418] sm:$0xf0]  ;;  %v9589_v31 = vld [vmem:[#allocation15 + $0x940] sm:$0xf]  ;;  %v6289_v2 = vpop.f32.mrf.mxu1 }
 0x3db   : > { %6500 = vmatpush.bf16.msra.mxu2 %v10146_v27  ;;  %v6315_v44 = vpop.f32.mrf.mxu3  ;;  %v10940_v27 = vld [vmem:[#allocation15 + $0xcbc] sm:$0xf]  ;;  %v6328_v30 = vpop.f32.mrf.mxu0  ;;  %v8838_v2 = vor.u32 %v10640_v32, %v8835_v19  ;;  %v8807_v43 = vld [vmem:[#allocation15 + $0x33c] sm:$0xf0]  ;;  %v9169_v19 = vld [vmem:[#allocation15 + $0x5f8] sm:$0xf] }
 0x3dc   : > { %v10034_v16 = vor.u32 %v10940_v27, %v10031_v21  ;;  %v10003_v44 = vld [vmem:[#allocation15 + $0xc9c] sm:$0xf0]  ;;  %v10916_v30 = vld [vmem:[#allocation15 + $0xbf8] sm:$0xf0] }
 0x3dd   : > { %6567 = vmatpush.bf16.msrb.mxu3 %v9422_v47  ;;  %v10954_v47 = vld [vmem:[#allocation15 + $0xd2c] sm:$0xf]  ;;  %6540 = vmatpush.bf16.msrb.mxu1 %v9002_v48  ;;  %v8558_v48 = vor.u32 %v10570_v41, %v8555_v39  ;;  %v10006_v62 = vor.u32 %v10933_v40, %v10003_v44  ;;  %v10748_v41 = vld [vmem:[#allocation15 + $0x6b8] sm:$0xf0]  ;;  %v9925_v39 = vld [vmem:[#allocation15 + $0xbe0] sm:$0xf] }
 0x3de   : > { %6579 = vmatpush.bf16.msra.mxu0 %v9674_v55  ;;  %v6198_v55 = vpop.f32.mrf.mxu2  ;;  %v9926_v44 = vor.u32 %v10916_v30, %v9925_v39  ;;  %v9141_v30 = vld [vmem:[#allocation15 + $0x5c0] sm:$0xf] }
 0x3df   : > { %6501 = vmatpush.bf16.msra.mxu2 %v10118_v46  ;;  %v9590_v46 = vor.u32 %v10832_v34, %v9589_v31  ;;  %v11103_v60 = vpop.eup %11102  ;;  %v9253_v31 = vld [vmem:[#allocation15 + $0x6a0] sm:$0xf]  ;;  %v9897_v55 = vld [vmem:[#allocation15 + $0xba8] sm:$0xf] }
 0x3e0   : > { %6831 = vst [vmem:[%s11853_s29] sm:$0xff] %v11103_v60  ;;  %v9254_v40 = vor.u32 %v10748_v41, %v9253_v31  ;;  %v10801_v31 = vld [vmem:[#allocation15 + $0x864] sm:$0xf] }
 0x3e1   : > { %6568 = vmatpush.bf16.msrb.mxu3 %v9394_v5  ;;  %v10090_v5 = vor.u32 %v10954_v47, %v10087_v54  ;;  %6541 = vmatpush.bf16.msrb.mxu1 %v8974_v7  ;;  %v10657_v47 = vld [vmem:[#allocation15 + $0x3e0] sm:$0xf0]  ;;  %v9561_v54 = vld [vmem:[#allocation15 + $0x908] sm:$0xf]  ;;  %v10650_v7 = vld [vmem:[#allocation15 + $0x3a8] sm:$0xf0] }
 0x3e2   : > { %6580 = vmatpush.bf16.msra.mxu0 %v9646_v12  ;;  %v8890_v22 = vor.u32 %v10657_v47, %v8889_v49  ;;  %v8499_v12 = vld [vmem:[#allocation15 + $0xd4] sm:$0xf0]  ;;  %v8862_v59 = vor.u32 %v10650_v7, %v8861_v3  ;;  %v9225_v49 = vld [vmem:[#allocation15 + $0x668] sm:$0xf]  ;;  %v8810_v47 = vor.u32 %v10633_v33, %v8807_v43  ;;  %v8415_v3 = vld [vmem:[#allocation15 + $0x2c] sm:$0xf0] }
 0x3e3   : > { %6502 = vmatpush.bf16.msra.mxu2 %v10090_v5  ;;  %v8530_v5 = vor.u32 %v10563_v57, %v8527_v20  ;;  %v8779_v57 = vld [vmem:[#allocation15 + $0x304] sm:$0xf0]  ;;  %v10720_v33 = vld [vmem:[#allocation15 + $0x5d8] sm:$0xf0] }
 0x3e5   : > { %6569 = vmatpush.bf16.msrb.mxu3 %v9366_v26  ;;  %v8946_v26 = vor.u32 %v10671_v14, %v8945_v35  ;;  %v10755_v35 = vld [vmem:[#allocation15 + $0x6f0] sm:$0xf0]  ;;  %v9953_v14 = vld [vmem:[#allocation15 + $0xc18] sm:$0xf] }
 0x3e6   : > { %6581 = vmatpush.bf16.msra.mxu0 %v9618_v63  ;;  %v9954_v63 = vor.u32 %v10923_v38, %v9953_v14  ;;  %v9507_v14 = vld [vmem:[#allocation15 + $0x8b4] sm:$0xf0] }
 0x3e7   : > { %6503 = vmatpush.bf16.msra.mxu2 %v10062_v25  ;;  %6542 = vmatpush.bf16.msrb.mxu1 %v8946_v26  ;;  %v9534_v25 = vor.u32 %v10818_v6, %v9533_v50  ;;  %v8502_v26 = vor.u32 %v10556_v10, %v8499_v12  ;;  %v9869_v50 = vld [vmem:[#allocation15 + $0xb70] sm:$0xf]  ;;  %v10902_v6 = vld [vmem:[#allocation15 + $0xb88] sm:$0xf0]  ;;  %v10619_v10 = vld [vmem:[#allocation15 + $0x2b4] sm:$0xf] }
 0x3e8   : > { %v9870_v32 = vor.u32 %v10902_v6, %v9869_v50  ;;  %v10706_v6 = vld [vmem:[#allocation15 + $0x568] sm:$0xf0] }
 0x3e9   : > { %6570 = vmatpush.bf16.msrb.mxu3 %v9338_v8  ;;  %v8918_v8 = vor.u32 %v10664_v15, %v8917_v29  ;;  %v10549_v29 = vld [vmem:[#allocation15 + $0x84] sm:$0xf]  ;;  %v8471_v15 = vld [vmem:[#allocation15 + $0x9c] sm:$0xf0] }
 0x3ea   : > { %6582 = vmatpush.bf16.msra.mxu0 %v9590_v46  ;;  %v10542_v46 = vld [vmem:[#allocation15 + $0x4c] sm:$0xf] }
 0x3eb   : > { %6504 = vmatpush.bf16.msra.mxu2 %v10034_v16  ;;  %6543 = vmatpush.bf16.msrb.mxu1 %v8918_v8  ;;  %v8474_v8 = vor.u32 %v10549_v29, %v8471_v15  ;;  %v10612_v29 = vld [vmem:[#allocation15 + $0x27c] sm:$0xf]  ;;  %v8723_v15 = vld [vmem:[#allocation15 + $0x294] sm:$0xf0] }
 0x3ed   : > { %6571 = vmatpush.bf16.msrb.mxu3 %v9310_v42  ;;  %v9562_v42 = vor.u32 %v10825_v56, %v9561_v54  ;;  %v10741_v54 = vld [vmem:[#allocation15 + $0x680] sm:$0xf0] }
 0x3ee   : > { %v10909_v56 = vld [vmem:[#allocation15 + $0xbc0] sm:$0xf0] }
 0x3ef   : > { %6505 = vmatpush.bf16.msra.mxu2 %v10006_v62  ;;  %6544 = vmatpush.bf16.msrb.mxu1 %v8890_v22  ;;  %v10535_v62 = vld [vmem:[#allocation15 + $0x14] sm:$0xf]  ;;  %v9226_v22 = vor.u32 %v10741_v54, %v9225_v49  ;;  %v9898_v0 = vor.u32 %v10909_v56, %v9897_v55  ;;  %v8695_v49 = vld [vmem:[#allocation15 + $0x25c] sm:$0xf0]  ;;  %v9451_v54 = vld [vmem:[#allocation15 + $0x844] sm:$0xf0] }
 0x3f0   : > { %6572 = vmatmul.bf16.vlgmr.msrb.gmra.mxu3 %v11762_v23  ;;  %6583 = vmatpush.bf16.msra.mxu0 %v9562_v42  ;;  %v9197_v42 = vld [vmem:[#allocation15 + $0x630] sm:$0xf] }
 0x3f1   : > { %6616 = vmatpush.bf16.msra.mxu3 %v8614_v13  ;;  %v9281_v13 = vld [vmem:[#allocation15 + $0x6d8] sm:$0xf]  ;;  %v11864_v12 = vpop.f32.mrf.mxu1 }
 0x3f2   : > { %v9282_v21 = vor.u32 %v10755_v35, %v9281_v13  ;;  %v8751_v13 = vld [vmem:[#allocation15 + $0x2cc] sm:$0xf0]  ;;  %v10808_v35 = vld [vmem:[#allocation15 + $0x89c] sm:$0xf] }
 0x3f3   : > { %v11858_v27 = vpop.f32.mrf.mxu3  ;;  %6506 = vmatpush.bf16.msra.mxu2 %v9978_v37  ;;  %6545 = vmatpush.bf16.msrb.mxu1 %v8862_v59  ;;  %v8418_v37 = vor.u32 %v10535_v62, %v8415_v3  ;;  %v9785_v62 = vld [vmem:[#allocation15 + $0xac8] sm:$0xf]  ;;  %v10787_v3 = vld [vmem:[#allocation15 + $0x7f4] sm:$0xf] }
 0x3f4   : > { %6584 = vmatpush.bf16.msra.mxu0 %v9534_v25  ;;  %v11866_v38 = vpop.f32.mrf.mxu0 }
 0x3f5   : > { %6617 = vmatpush.bf16.msra.mxu3 %v8586_v18  ;;  %v6248_v18 = vpop.f32.mrf.mxu2 }
 0x3f6   : > { %v6249_v34 = vadd.f32 %v6248_v18, %v6236_v24  ;;  %6507 = vmatmul.bf16.vlgmr.msra.gmra.mxu2 %v11795_v9  ;;  %6546 = vmatmul.bf16.vlgmr.msrb.gmra.mxu1 %v11752_v4  ;;  %v10727_v24 = vld [vmem:[#allocation15 + $0x610] sm:$0xf0] }
 0x3f7   : > { %6551 = vmatpush.bf16.msrb.mxu2 %v9282_v21  ;;  %6590 = vmatpush.bf16.msra.mxu1 %v9954_v63  ;;  %v9510_v21 = vor.u32 %v10808_v35, %v9507_v14  ;;  %v9841_v63 = vld [vmem:[#allocation15 + $0xb38] sm:$0xf]  ;;  %v10895_v18 = vld [vmem:[#allocation15 + $0xb50] sm:$0xf0] }
 0x3f8   : > { %v6262_v16 = vadd.f32 %v11823_v11, %v6249_v34  ;;  %6629 = vmatpush.bf16.msrb.mxu0 %v8838_v2  ;;  %v10626_v11 = vld [vmem:[#allocation15 + $0x2ec] sm:$0xf]  ;;  %v9479_v2 = vld [vmem:[#allocation15 + $0x87c] sm:$0xf0]  ;;  %v9170_v34 = vor.u32 %v10727_v24, %v9169_v19  ;;  %v9842_v41 = vor.u32 %v10895_v18, %v9841_v63  ;;  %v10780_v19 = vld [vmem:[#allocation15 + $0x7bc] sm:$0xf] }
 0x3f9   : > { %6618 = vmatpush.bf16.msra.mxu3 %v8558_v48  ;;  %v8443_v48 = vld [vmem:[#allocation15 + $0x64] sm:$0xf0]  ;;  %6585 = vmatmul.bf16.vlgmr.msra.gmra.mxu0 %v11773_v58  ;;  %v8782_v7 = vor.u32 %v10626_v11, %v8779_v57  ;;  %v9482_v43 = vor.u32 %v10801_v31, %v9479_v2  ;;  %v10713_v57 = vld [vmem:[#allocation15 + $0x5a0] sm:$0xf0]  ;;  %v10696_v63 = vld [vmem:[#allocation15 + $0x51c] sm:$0xf] }
 0x3fa   : > { %v8446_v20 = vor.u32 %v10542_v46, %v8443_v48  ;;  %v6275_v25 = vadd.f32 %v11830_v51, %v6262_v16  ;;  %v8726_v51 = vor.u32 %v10612_v29, %v8723_v15  ;;  %v6341_v48 = vpop.f32.mrf.mxu1  ;;  %v9113_v11 = vld [vmem:[#allocation15 + $0x588] sm:$0xf]  ;;  %v9059_v18 = vld [vmem:[#allocation15 + $0x534] sm:$0xf0]  ;;  %v10864_v31 = vld [vmem:[#allocation15 + $0xa5c] sm:$0xf] }
 0x3fb   : > { %v6367_v60 = vpop.f32.mrf.mxu3  ;;  %6552 = vmatpush.bf16.msrb.mxu2 %v9254_v40  ;;  %6591 = vmatpush.bf16.msra.mxu1 %v9926_v44  ;;  %v10888_v40 = vld [vmem:[#allocation15 + $0xb18] sm:$0xf0]  ;;  %v10605_v44 = vld [vmem:[#allocation15 + $0x244] sm:$0xf]  ;;  %v9731_v2 = vld [vmem:[#allocation15 + $0xa74] sm:$0xf0] }
 0x3fc   : > { %6630 = vmatpush.bf16.msrb.mxu0 %v8810_v47  ;;  %v6288_v39 = vadd.f32 %v11841_v61, %v6275_v25  ;;  %v10794_v47 = vld [vmem:[#allocation15 + $0x82c] sm:$0xf]  ;;  %v6380_v55 = vpop.f32.mrf.mxu0  ;;  %v9142_v61 = vor.u32 %v10720_v33, %v9141_v30  ;;  %v9395_v25 = vld [vmem:[#allocation15 + $0x7d4] sm:$0xf0]  ;;  %v9062_v33 = vor.u32 %v10696_v63, %v9059_v18  ;;  %v10857_v48 = vld [vmem:[#allocation15 + $0xa24] sm:$0xf] }
 0x3fd   : > { %6619 = vmatpush.bf16.msra.mxu3 %v8530_v5  ;;  %v6250_v45 = vpop.f32.mrf.mxu2  ;;  %v10734_v5 = vld [vmem:[#allocation15 + $0x648] sm:$0xf0]  ;;  %v9454_v60 = vor.u32 %v10794_v47, %v9451_v54 }
 0x3fe   : > { %v9198_v59 = vor.u32 %v10734_v5, %v9197_v42  ;;  %v8667_v45 = vld [vmem:[#allocation15 + $0x224] sm:$0xf0]  ;;  %v9423_v42 = vld [vmem:[#allocation15 + $0x80c] sm:$0xf0] }
 0x3ff   : > { %6553 = vmatpush.bf16.msrb.mxu2 %v9226_v22  ;;  %6592 = vmatpush.bf16.msra.mxu1 %v9898_v0  ;;  %v10881_v22 = vld [vmem:[#allocation15 + $0xae0] sm:$0xf0]  ;;  %v10598_v0 = vld [vmem:[#allocation15 + $0x20c] sm:$0xf]  ;;  %v9085_v5 = vld [vmem:[#allocation15 + $0x550] sm:$0xf]  ;;  %v9426_v14 = vor.u32 %v10787_v3, %v9423_v42 }
 0x400   : > { %6631 = vmatpush.bf16.msrb.mxu0 %v8782_v7  ;;  %v9114_v7 = vor.u32 %v10713_v57, %v9113_v11  ;;  %v9786_v50 = vor.u32 %v10881_v22, %v9785_v62  ;;  %v8670_v35 = vor.u32 %v10598_v0, %v8667_v45  ;;  %v9086_v29 = vor.u32 %v10706_v6, %v9085_v5  ;;  %v10121_v11 = vld [vmem:[#allocation15 + $0xd68] sm:$0xf]  ;;  %v10850_v0 = vld [vmem:[#allocation15 + $0x9ec] sm:$0xf]  ;;  %v10759_v5 = vld [vmem:[#allocation15 + $0x714] sm:$0xf] }
 0x401   : > { %6620 = vmatpush.bf16.msra.mxu3 %v8502_v26  ;;  %v8754_v26 = vor.u32 %v10619_v10, %v8751_v13  ;;  %v9757_v10 = vld [vmem:[#allocation15 + $0xa90] sm:$0xf]  ;;  %v10874_v13 = vld [vmem:[#allocation15 + $0xaa8] sm:$0xf0]  ;;  %v9003_v62 = vld [vmem:[#allocation15 + $0x4c4] sm:$0xf0] }
 0x402   : > { %v9758_v15 = vor.u32 %v10874_v13, %v9757_v10  ;;  %v3781_v22 = vperm.slane %v11836_v36, 3  ;;  %v9675_v45 = vld [vmem:[#allocation15 + $0xa04] sm:$0xf0]  ;;  %v9311_v6 = vld [vmem:[#allocation15 + $0x72c] sm:$0xf0] }
 0x403   : > { %6554 = vmatpush.bf16.msrb.mxu2 %v9198_v59  ;;  %6593 = vmatpush.bf16.msra.mxu1 %v9870_v32  ;;  %v10591_v59 = vld [vmem:[#allocation15 + $0x1d4] sm:$0xf]  ;;  %v8639_v32 = vld [vmem:[#allocation15 + $0x1ec] sm:$0xf0]  ;;  %v10958_v13 = vld [vmem:[#allocation15 + $0xd48] sm:$0xf0] }
 0x404   : > { %6632 = vmatpush.bf16.msrb.mxu0 %v8754_v26  ;;  %v10177_v26 = vld [vmem:[#allocation15 + $0xdd8] sm:$0xf]  ;;  %v10093_v10 = vld [vmem:[#allocation15 + $0xd30] sm:$0xf]  ;;  %v10675_v36 = vld [vmem:[#allocation15 + $0x474] sm:$0xf] }
 0x405   : > { %6621 = vmatpush.bf16.msra.mxu3 %v8474_v8  ;;  %v6300_v16 = vpop.f32.mrf.mxu2  ;;  %v9813_v8 = vld [vmem:[#allocation15 + $0xb00] sm:$0xf]  ;;  %v10094_v18 = vor.u32 %v10958_v13, %v10093_v10  ;;  %v8533_v10 = vld [vmem:[#allocation15 + $0xf8] sm:$0xf]  ;;  %v10567_v13 = vld [vmem:[#allocation15 + $0x110] sm:$0xf0] }
 0x406   : > { %v6301_v46 = vadd.f32 %v6300_v16, %v6288_v39  ;;  %v9814_v56 = vor.u32 %v10888_v40, %v9813_v8  ;;  %v10149_v16 = vld [vmem:[#allocation15 + $0xda0] sm:$0xf]  ;;  %v9734_v8 = vor.u32 %v10864_v31, %v9731_v2  ;;  %v10972_v40 = vld [vmem:[#allocation15 + $0xdb8] sm:$0xf0]  ;;  %v10951_v31 = vld [vmem:[#allocation15 + $0xd10] sm:$0xf0] }
 0x407   : > { %6555 = vmatpush.bf16.msrb.mxu2 %v9170_v34  ;;  %6594 = vmatpush.bf16.msra.mxu1 %v9842_v41  ;;  %v8642_v34 = vor.u32 %v10591_v59, %v8639_v32  ;;  %v9398_v41 = vor.u32 %v10780_v19, %v9395_v25  ;;  %v10150_v54 = vor.u32 %v10972_v40, %v10149_v16  ;;  %v9647_v32 = vld [vmem:[#allocation15 + $0x9cc] sm:$0xf0]  ;;  %v8617_v19 = vld [vmem:[#allocation15 + $0x1a0] sm:$0xf] }
 0x408   : > { %11104 = vtanh.f32 %v6301_v46  ;;  %6633 = vmatpush.bf16.msrb.mxu0 %v8726_v51  ;;  %v10773_v51 = vld [vmem:[#allocation15 + $0x784] sm:$0xf]  ;;  %v9031_v46 = vld [vmem:[#allocation15 + $0x4fc] sm:$0xf0]  ;;  %v6340_v16 = vadd.f32 %v11864_v12, %v11845_v28  ;;  %v8561_v28 = vld [vmem:[#allocation15 + $0x130] sm:$0xf] }
 0x409   : > { %6622 = vmatpush.bf16.msra.mxu3 %v8446_v20  ;;  %v8698_v20 = vor.u32 %v10605_v44, %v8695_v49  ;;  %v10689_v44 = vld [vmem:[#allocation15 + $0x4e4] sm:$0xf]  ;;  %v9703_v49 = vld [vmem:[#allocation15 + $0xa3c] sm:$0xf0]  ;;  %v10574_v12 = vld [vmem:[#allocation15 + $0x148] sm:$0xf0] }
 0x40a   : > { %v9034_v55 = vor.u32 %v10689_v44, %v9031_v46  ;;  %v9706_v57 = vor.u32 %v10857_v48, %v9703_v49  ;;  %v10037_v46 = vld [vmem:[#allocation15 + $0xcc0] sm:$0xf]  ;;  %v10944_v48 = vld [vmem:[#allocation15 + $0xcd8] sm:$0xf0] }
 0x40b   : > { %6556 = vmatpush.bf16.msrb.mxu2 %v9142_v61  ;;  %6595 = vmatpush.bf16.msra.mxu1 %v9814_v56  ;;  %v10766_v61 = vld [vmem:[#allocation15 + $0x74c] sm:$0xf]  ;;  %v9339_v56 = vld [vmem:[#allocation15 + $0x764] sm:$0xf0] }
 0x40c   : > { %6634 = vmatpush.bf16.msrb.mxu0 %v8698_v20  ;;  %v10965_v20 = vld [vmem:[#allocation15 + $0xd80] sm:$0xf0]  ;;  %v9342_v3 = vor.u32 %v10766_v61, %v9339_v56  ;;  %v8919_v61 = vld [vmem:[#allocation15 + $0x41c] sm:$0xf0] }
 0x40d   : > { %6623 = vmatpush.bf16.msra.mxu3 %v8418_v37  ;;  %v6302_v37 = vpop.f32.mrf.mxu2  ;;  %v10829_v56 = vld [vmem:[#allocation15 + $0x944] sm:$0xf] }
 0x40e   : > { %v11105_v24 = vpop.eup %11104  ;;  %v10843_v37 = vld [vmem:[#allocation15 + $0x9b4] sm:$0xf] }
 0x40f   : > { %6832 = vst [vmem:[%s11853_s29 + $0x8] sm:$0xff] %v11105_v24  ;;  %6557 = vmatpush.bf16.msrb.mxu2 %v9114_v7  ;;  %6596 = vmatpush.bf16.msra.mxu1 %v9786_v50  ;;  %v10122_v7 = vor.u32 %v10965_v20, %v10121_v11  ;;  %v10588_v24 = vld [vmem:[#allocation15 + $0x1b8] sm:$0xf0]  ;;  %v9650_v2 = vor.u32 %v10843_v37, %v9647_v32  ;;  %v9591_v11 = vld [vmem:[#allocation15 + $0x95c] sm:$0xf0] }
 0x410   : > { %6624 = vmatmul.bf16.vlgmr.msra.gmra.mxu3 %v11738_v1  ;;  %6635 = vmatpush.bf16.msrb.mxu0 %v8670_v35  ;;  %v9678_v35 = vor.u32 %v10850_v0, %v9675_v45  ;;  %v10009_v0 = vld [vmem:[#allocation15 + $0xc88] sm:$0xf]  ;;  %v10937_v45 = vld [vmem:[#allocation15 + $0xca0] sm:$0xf0]  ;;  %v10930_v37 = vld [vmem:[#allocation15 + $0xc68] sm:$0xf0] }
 0x411   : > { %6668 = vmatpush.bf16.msrb.mxu3 %v9510_v21  ;;  %v10979_v21 = vld [vmem:[#allocation15 + $0xdf0] sm:$0xf0]  ;;  %v11876_v25 = vpop.f32.mrf.mxu1 }
 0x412   : > { %v10178_v30 = vor.u32 %v10979_v21, %v10177_v26  ;;  %v9314_v21 = vor.u32 %v10759_v5, %v9311_v6  ;;  %v10654_v5 = vld [vmem:[#allocation15 + $0x3cc] sm:$0xf]  ;;  %v9563_v6 = vld [vmem:[#allocation15 + $0x924] sm:$0xf0] }
 0x413   : > { %v6417_v39 = vpop.f32.mrf.mxu3  ;;  %6558 = vmatpush.bf16.msrb.mxu2 %v9086_v29  ;;  %6597 = vmatpush.bf16.msra.mxu1 %v9758_v15  ;;  %v10065_v15 = vld [vmem:[#allocation15 + $0xcf8] sm:$0xf] }
 0x414   : > { %6636 = vmatpush.bf16.msrb.mxu0 %v8642_v34  ;;  %v6418_v59 = vadd.f32 %v6417_v39, %v3781_v22  ;;  %v6430_v26 = vpop.f32.mrf.mxu0  ;;  %v8618_v34 = vor.u32 %v10588_v24, %v8617_v19  ;;  %v8947_v39 = vld [vmem:[#allocation15 + $0x454] sm:$0xf0]  ;;  %v8534_v19 = vor.u32 %v10567_v13, %v8533_v10  ;;  %v8863_v24 = vld [vmem:[#allocation15 + $0x3ac] sm:$0xf0] }
 0x415   : > { %6669 = vmatpush.bf16.msrb.mxu3 %v9482_v43  ;;  %v9367_v43 = vld [vmem:[#allocation15 + $0x79c] sm:$0xf0] }
 0x416   : > { %v9370_v47 = vor.u32 %v10773_v51, %v9367_v43  ;;  %6559 = vmatmul.bf16.vlgmr.msrb.gmra.mxu2 %v11755_v53  ;;  %6598 = vmatmul.bf16.vlgmr.msra.gmra.mxu1 %v11782_v52  ;;  %v11878_v63 = vadd.f32 %v6430_v26, %v6418_v59  ;;  %v8589_v51 = vld [vmem:[#allocation15 + $0x168] sm:$0xf]  ;;  %v10581_v43 = vld [vmem:[#allocation15 + $0x180] sm:$0xf0]  ;;  %v6352_v44 = vpop.f32.mrf.mxu2  ;;  %v10647_v59 = vld [vmem:[#allocation15 + $0x394] sm:$0xf] }
 0x417   : > { %6603 = vmatpush.bf16.msra.mxu2 %v10178_v30  ;;  %6642 = vmatpush.bf16.msrb.mxu1 %v9062_v33  ;;  %v10836_v30 = vld [vmem:[#allocation15 + $0x97c] sm:$0xf]  ;;  %v9619_v33 = vld [vmem:[#allocation15 + $0x994] sm:$0xf0]  ;;  %v10815_v26 = vld [vmem:[#allocation15 + $0x8d4] sm:$0xf] }
 0x418   : > { %6681 = vmatpush.bf16.msra.mxu0 %v9734_v8  ;;  %v10066_v8 = vor.u32 %v10951_v31, %v10065_v15  ;;  %v9622_v49 = vor.u32 %v10836_v30, %v9619_v33  ;;  %v10752_v15 = vld [vmem:[#allocation15 + $0x6dc] sm:$0xf]  ;;  %v9283_v31 = vld [vmem:[#allocation15 + $0x6f4] sm:$0xf0]  ;;  %v8841_v30 = vld [vmem:[#allocation15 + $0x360] sm:$0xf] }
 0x419   : > { %6670 = vmatpush.bf16.msrb.mxu3 %v9454_v60  ;;  %v10682_v60 = vld [vmem:[#allocation15 + $0x4ac] sm:$0xf]  ;;  %6637 = vmatmul.bf16.vlgmr.msrb.gmra.mxu0 %v11744_v17  ;;  %v6393_v20 = vpop.f32.mrf.mxu1  ;;  %v10644_v33 = vld [vmem:[#allocation15 + $0x378] sm:$0xf0] }
 0x41a   : > { %v9006_v50 = vor.u32 %v10682_v60, %v9003_v62  ;;  %v10038_v62 = vor.u32 %v10944_v48, %v10037_v46  ;;  %v10553_v46 = vld [vmem:[#allocation15 + $0xa0] sm:$0xf0]  ;;  %v8449_v20 = vld [vmem:[#allocation15 + $0x50] sm:$0xf] }
 0x41b   : > { %v6419_v42 = vpop.f32.mrf.mxu3  ;;  %6604 = vmatpush.bf16.msra.mxu2 %v10150_v54  ;;  %6643 = vmatpush.bf16.msrb.mxu1 %v9034_v55  ;;  %v6353_v54 = vadd.f32 %v6352_v44, %v6340_v16  ;;  %v10661_v55 = vld [vmem:[#allocation15 + $0x404] sm:$0xf]  ;;  %v8477_v44 = vld [vmem:[#allocation15 + $0x88] sm:$0xf] }
 0x41c   : > { %6682 = vmatpush.bf16.msra.mxu0 %v9706_v57  ;;  %v6432_v60 = vpop.f32.mrf.mxu0  ;;  %v8922_v22 = vor.u32 %v10661_v55, %v8919_v61  ;;  %v8562_v42 = vor.u32 %v10574_v12, %v8561_v28  ;;  %v10745_v48 = vld [vmem:[#allocation15 + $0x6a4] sm:$0xf]  ;;  %v9927_v55 = vld [vmem:[#allocation15 + $0xbfc] sm:$0xf0]  ;;  %v8813_v61 = vld [vmem:[#allocation15 + $0x328] sm:$0xf] }
 0x41d   : > { %6671 = vmatpush.bf16.msrb.mxu3 %v9426_v14  ;;  %v8975_v14 = vld [vmem:[#allocation15 + $0x48c] sm:$0xf0]  ;;  %v11884_v57 = vadd.f32 %v11858_v27, %v6353_v54  ;;  %v10010_v27 = vor.u32 %v10937_v45, %v10009_v0  ;;  %v10913_v54 = vld [vmem:[#allocation15 + $0xbe4] sm:$0xf]  ;;  %v10546_v60 = vld [vmem:[#allocation15 + $0x68] sm:$0xf0] }
 0x41e   : > { %v8978_v29 = vor.u32 %v10675_v36, %v8975_v14  ;;  %v6354_v36 = vpop.f32.mrf.mxu2  ;;  %v9981_v14 = vld [vmem:[#allocation15 + $0xc50] sm:$0xf]  ;;  %v9930_v12 = vor.u32 %v10913_v54, %v9927_v55  ;;  %v9227_v0 = vld [vmem:[#allocation15 + $0x684] sm:$0xf0]  ;;  %v10906_v45 = vld [vmem:[#allocation15 + $0xbac] sm:$0xf] }
 0x41f   : > { %6605 = vmatpush.bf16.msra.mxu2 %v10122_v7  ;;  %6644 = vmatpush.bf16.msrb.mxu1 %v9006_v50  ;;  %v8891_v7 = vld [vmem:[#allocation15 + $0x3e4] sm:$0xf0]  ;;  %v10822_v50 = vld [vmem:[#allocation15 + $0x90c] sm:$0xf]  ;;  %v9199_v36 = vld [vmem:[#allocation15 + $0x64c] sm:$0xf0] }
 0x420   : > { %6683 = vmatpush.bf16.msra.mxu0 %v9678_v35  ;;  %v8894_v35 = vor.u32 %v10654_v5, %v8891_v7  ;;  %v9566_v32 = vor.u32 %v10822_v50, %v9563_v6  ;;  %v10630_v5 = vld [vmem:[#allocation15 + $0x308] sm:$0xf0]  ;;  %v8450_v7 = vor.u32 %v10546_v60, %v8449_v20  ;;  %v8421_v6 = vld [vmem:[#allocation15 + $0x18] sm:$0xf]  ;;  %v9457_v20 = vld [vmem:[#allocation15 + $0x830] sm:$0xf] }
 0x421   : > { %6672 = vmatpush.bf16.msrb.mxu3 %v9398_v41  ;;  %v10668_v41 = vld [vmem:[#allocation15 + $0x43c] sm:$0xf] }
 0x422   : > { %v8950_v40 = vor.u32 %v10668_v41, %v8947_v39  ;;  %v9982_v41 = vor.u32 %v10930_v37, %v9981_v14  ;;  %v8866_v39 = vor.u32 %v10647_v59, %v8863_v24  ;;  %v10899_v37 = vld [vmem:[#allocation15 + $0xb74] sm:$0xf]  ;;  %v9871_v59 = vld [vmem:[#allocation15 + $0xb8c] sm:$0xf0]  ;;  %v9513_v24 = vld [vmem:[#allocation15 + $0x8a0] sm:$0xf] }
 0x423   : > { %6606 = vmatpush.bf16.msra.mxu2 %v10094_v18  ;;  %6645 = vmatpush.bf16.msrb.mxu1 %v8978_v29  ;;  %v8505_v18 = vld [vmem:[#allocation15 + $0xc0] sm:$0xf]  ;;  %v10560_v29 = vld [vmem:[#allocation15 + $0xd8] sm:$0xf0] }
 0x424   : > { %6684 = vmatpush.bf16.msra.mxu0 %v9650_v2  ;;  %v10920_v2 = vld [vmem:[#allocation15 + $0xc1c] sm:$0xf] }
 0x425   : > { %6673 = vmatpush.bf16.msrb.mxu3 %v9370_v47  ;;  %v8590_v47 = vor.u32 %v10581_v43, %v8589_v51  ;;  %v8506_v43 = vor.u32 %v10560_v29, %v8505_v18 }
 0x427   : > { %6607 = vmatpush.bf16.msra.mxu2 %v10066_v8  ;;  %6646 = vmatpush.bf16.msrb.mxu1 %v8950_v40  ;;  %v9286_v8 = vor.u32 %v10752_v15, %v9283_v31  ;;  %v6379_v15 = vadd.f32 %v11866_v38, %v11884_v57 }
 0x428   : > { %6685 = vmatpush.bf16.msra.mxu0 %v9622_v49  ;;  %v8842_v49 = vor.u32 %v10644_v33, %v8841_v30  ;;  %v10892_v33 = vld [vmem:[#allocation15 + $0xb3c] sm:$0xf] }
 0x429   : > { %6674 = vmatpush.bf16.msrb.mxu3 %v9342_v3  ;;  %v9594_v3 = vor.u32 %v10829_v56, %v9591_v11  ;;  %v10637_v56 = vld [vmem:[#allocation15 + $0x340] sm:$0xf0]  ;;  %v8478_v11 = vor.u32 %v10553_v46, %v8477_v44  ;;  %v6392_v46 = vadd.f32 %v11876_v25, %v6379_v15  ;;  %v10798_v25 = vld [vmem:[#allocation15 + $0x848] sm:$0xf0]  ;;  %v10595_v15 = vld [vmem:[#allocation15 + $0x1f0] sm:$0xf0] }
 0x42a   : > { %v10805_v44 = vld [vmem:[#allocation15 + $0x880] sm:$0xf0] }
 0x42b   : > { %6608 = vmatpush.bf16.msra.mxu2 %v10038_v62  ;;  %6647 = vmatpush.bf16.msrb.mxu1 %v8922_v22  ;;  %v10738_v62 = vld [vmem:[#allocation15 + $0x66c] sm:$0xf]  ;;  %v8814_v22 = vor.u32 %v10637_v56, %v8813_v61  ;;  %v10885_v56 = vld [vmem:[#allocation15 + $0xb04] sm:$0xf] }
 0x42c   : > { %6686 = vmatpush.bf16.msra.mxu0 %v9594_v3  ;;  %v9899_v3 = vld [vmem:[#allocation15 + $0xbc4] sm:$0xf0]  ;;  %v9230_v10 = vor.u32 %v10738_v62, %v9227_v0 }
 0x42d   : > { %6675 = vmatpush.bf16.msrb.mxu3 %v9314_v21  ;;  %v9535_v21 = vld [vmem:[#allocation15 + $0x8ec] sm:$0xf0]  ;;  %v9902_v13 = vor.u32 %v10906_v45, %v9899_v3  ;;  %v10710_v45 = vld [vmem:[#allocation15 + $0x58c] sm:$0xf]  ;;  %v9115_v3 = vld [vmem:[#allocation15 + $0x5a4] sm:$0xf0] }
 0x42e   : > { %v9538_v51 = vor.u32 %v10815_v26, %v9535_v21  ;;  %v10812_v26 = vld [vmem:[#allocation15 + $0x8b8] sm:$0xf0] }
 0x42f   : > { %6609 = vmatpush.bf16.msra.mxu2 %v10010_v27  ;;  %6648 = vmatpush.bf16.msrb.mxu1 %v8894_v35  ;;  %v10539_v27 = vld [vmem:[#allocation15 + $0x30] sm:$0xf0]  ;;  %v9514_v30 = vor.u32 %v10812_v26, %v9513_v24 }
 0x430   : > { %6676 = vmatmul.bf16.vlgmr.msrb.gmra.mxu3 %v11762_v23  ;;  %6687 = vmatpush.bf16.msra.mxu0 %v9566_v32  ;;  %v10731_v35 = vld [vmem:[#allocation15 + $0x634] sm:$0xf]  ;;  %v8757_v32 = vld [vmem:[#allocation15 + $0x2b8] sm:$0xf]  ;;  %v8422_v29 = vor.u32 %v10539_v27, %v8421_v6  ;;  %v8673_v6 = vld [vmem:[#allocation15 + $0x210] sm:$0xf] }
 0x431   : > { %6720 = vmatpush.bf16.msra.mxu3 %v8618_v34  ;;  %v9955_v34 = vld [vmem:[#allocation15 + $0xc34] sm:$0xf0]  ;;  %v11891_v21 = vpop.f32.mrf.mxu1  ;;  %v9202_v31 = vor.u32 %v10731_v35, %v9199_v36  ;;  %v10703_v27 = vld [vmem:[#allocation15 + $0x554] sm:$0xf]  ;;  %v9118_v35 = vor.u32 %v10710_v45, %v9115_v3  ;;  %v10123_v45 = vld [vmem:[#allocation15 + $0xd84] sm:$0xf0] }
 0x432   : > { %v9958_v40 = vor.u32 %v10920_v2, %v9955_v34  ;;  %v9874_v2 = vor.u32 %v10899_v37, %v9871_v59  ;;  %v10724_v34 = vld [vmem:[#allocation15 + $0x5fc] sm:$0xf]  ;;  %v9087_v37 = vld [vmem:[#allocation15 + $0x56c] sm:$0xf0]  ;;  %v10871_v59 = vld [vmem:[#allocation15 + $0xa94] sm:$0xf] }
 0x433   : > { %v11886_v16 = vpop.f32.mrf.mxu3  ;;  %6610 = vmatpush.bf16.msra.mxu2 %v9982_v41  ;;  %6649 = vmatpush.bf16.msrb.mxu1 %v8866_v39  ;;  %v9171_v41 = vld [vmem:[#allocation15 + $0x614] sm:$0xf0]  ;;  %v9009_v3 = vld [vmem:[#allocation15 + $0x4b0] sm:$0xf] }
 0x434   : > { %6688 = vmatpush.bf16.msra.mxu0 %v9538_v51  ;;  %v11893_v18 = vpop.f32.mrf.mxu0  ;;  %v9843_v51 = vld [vmem:[#allocation15 + $0xb54] sm:$0xf0]  ;;  %v9174_v38 = vor.u32 %v10724_v34, %v9171_v41  ;;  %v10976_v34 = vld [vmem:[#allocation15 + $0xddc] sm:$0xf] }
 0x435   : > { %6721 = vmatpush.bf16.msra.mxu3 %v8590_v47  ;;  %v9255_v47 = vld [vmem:[#allocation15 + $0x6bc] sm:$0xf0]  ;;  %v9846_v57 = vor.u32 %v10892_v33, %v9843_v51  ;;  %v10179_v41 = vld [vmem:[#allocation15 + $0xdf4] sm:$0xf0]  ;;  %v9090_v33 = vor.u32 %v10703_v27, %v9087_v37 }
 0x436   : > { %v9258_v28 = vor.u32 %v10745_v48, %v9255_v47  ;;  %6611 = vmatmul.bf16.vlgmr.msra.gmra.mxu2 %v11795_v9  ;;  %6650 = vmatmul.bf16.vlgmr.msrb.gmra.mxu1 %v11752_v4  ;;  %v6404_v48 = vpop.f32.mrf.mxu2  ;;  %v9143_v47 = vld [vmem:[#allocation15 + $0x5dc] sm:$0xf0] }
 0x437   : > { %6655 = vmatpush.bf16.msrb.mxu2 %v9286_v8  ;;  %6694 = vmatpush.bf16.msra.mxu1 %v9958_v40  ;;  %v10616_v8 = vld [vmem:[#allocation15 + $0x298] sm:$0xf0]  ;;  %v9485_v40 = vld [vmem:[#allocation15 + $0x868] sm:$0xf]  ;;  %v6405_v61 = vadd.f32 %v6404_v48, %v6392_v46 }
 0x438   : > { %6733 = vmatpush.bf16.msrb.mxu0 %v8842_v49  ;;  %v10717_v49 = vld [vmem:[#allocation15 + $0x5c4] sm:$0xf]  ;;  %v9486_v55 = vor.u32 %v10805_v44, %v9485_v40  ;;  %v9373_v48 = vld [vmem:[#allocation15 + $0x788] sm:$0xf] }
 0x439   : > { %6722 = vmatpush.bf16.msra.mxu3 %v8562_v42  ;;  %6689 = vmatmul.bf16.vlgmr.msra.gmra.mxu0 %v11773_v58  ;;  %v8785_v42 = vld [vmem:[#allocation15 + $0x2f0] sm:$0xf]  ;;  %11106 = vtanh.f32 %v6405_v61  ;;  %v6445_v60 = vpop.f32.mrf.mxu1  ;;  %v9037_v61 = vld [vmem:[#allocation15 + $0x4e8] sm:$0xf] }
 0x43a   : > { %v8786_v14 = vor.u32 %v10630_v5, %v8785_v42  ;;  %v9458_v5 = vor.u32 %v10798_v25, %v9457_v20  ;;  %v9345_v60 = vld [vmem:[#allocation15 + $0x750] sm:$0xf] }
 0x43b   : > { %v6471_v50 = vpop.f32.mrf.mxu3  ;;  %6656 = vmatpush.bf16.msrb.mxu2 %v9258_v28  ;;  %6695 = vmatpush.bf16.msra.mxu1 %v9930_v12  ;;  %v8701_v28 = vld [vmem:[#allocation15 + $0x248] sm:$0xf]  ;;  %v10609_v12 = vld [vmem:[#allocation15 + $0x260] sm:$0xf0] }
 0x43c   : > { %6734 = vmatpush.bf16.msrb.mxu0 %v8814_v22  ;;  %v6484_v62 = vpop.f32.mrf.mxu0  ;;  %v9146_v22 = vor.u32 %v10717_v49, %v9143_v47  ;;  %v8702_v42 = vor.u32 %v10609_v12, %v8701_v28  ;;  %v9787_v50 = vld [vmem:[#allocation15 + $0xae4] sm:$0xf0]  ;;  %v10777_v49 = vld [vmem:[#allocation15 + $0x7a0] sm:$0xf0] }
 0x43d   : > { %6723 = vmatpush.bf16.msra.mxu3 %v8534_v19  ;;  %v10623_v19 = vld [vmem:[#allocation15 + $0x2d0] sm:$0xf0]  ;;  %v10969_v47 = vld [vmem:[#allocation15 + $0xda4] sm:$0xf]  ;;  %v9374_v12 = vor.u32 %v10777_v49, %v9373_v48  ;;  %v10770_v62 = vld [vmem:[#allocation15 + $0x768] sm:$0xf0] }
 0x43e   : > { %v8758_v39 = vor.u32 %v10623_v19, %v8757_v32  ;;  %v9759_v32 = vld [vmem:[#allocation15 + $0xaac] sm:$0xf0]  ;;  %v10861_v28 = vld [vmem:[#allocation15 + $0xa40] sm:$0xf0] }
 0x43f   : > { %6657 = vmatpush.bf16.msrb.mxu2 %v9230_v10  ;;  %6696 = vmatpush.bf16.msra.mxu1 %v9902_v13  ;;  %v9429_v10 = vld [vmem:[#allocation15 + $0x7f8] sm:$0xf]  ;;  %v10791_v13 = vld [vmem:[#allocation15 + $0x810] sm:$0xf0]  ;;  %v11107_v19 = vpop.eup %11106  ;;  %v9762_v51 = vor.u32 %v10871_v59, %v9759_v32  ;;  %v10095_v59 = vld [vmem:[#allocation15 + $0xd4c] sm:$0xf0] }
 0x440   : > { %6735 = vmatpush.bf16.msrb.mxu0 %v8786_v14  ;;  %v6406_v14 = vpop.f32.mrf.mxu2  ;;  %v9430_v26 = vor.u32 %v10791_v13, %v9429_v10  ;;  %6833 = vst [vmem:[%s11853_s29 + $0x10] sm:$0xff] %v11107_v19  ;;  %v8981_v32 = vld [vmem:[#allocation15 + $0x478] sm:$0xf]  ;;  %v10679_v19 = vld [vmem:[#allocation15 + $0x490] sm:$0xf0] }
 0x441   : > { %6724 = vmatpush.bf16.msra.mxu3 %v8506_v43  ;;  %v8729_v43 = vld [vmem:[#allocation15 + $0x280] sm:$0xf]  ;;  %v10955_v14 = vld [vmem:[#allocation15 + $0xd34] sm:$0xf]  ;;  %v10941_v48 = vld [vmem:[#allocation15 + $0xcc4] sm:$0xf] }
 0x442   : > { %v8730_v54 = vor.u32 %v10616_v8, %v8729_v43  ;;  %v9737_v43 = vld [vmem:[#allocation15 + $0xa60] sm:$0xf]  ;;  %v10868_v8 = vld [vmem:[#allocation15 + $0xa78] sm:$0xf0] }
 0x443   : > { %6658 = vmatpush.bf16.msrb.mxu2 %v9202_v31  ;;  %6697 = vmatpush.bf16.msra.mxu1 %v9874_v2  ;;  %v9401_v31 = vld [vmem:[#allocation15 + $0x7c0] sm:$0xf]  ;;  %v10784_v2 = vld [vmem:[#allocation15 + $0x7d8] sm:$0xf0] }
 0x444   : > { %6736 = vmatpush.bf16.msrb.mxu0 %v8758_v39  ;;  %v9065_v39 = vld [vmem:[#allocation15 + $0x520] sm:$0xf]  ;;  %v9402_v44 = vor.u32 %v10784_v2, %v9401_v31 }
 0x445   : > { %6725 = vmatpush.bf16.msra.mxu3 %v8478_v11  ;;  %v9815_v11 = vld [vmem:[#allocation15 + $0xb1c] sm:$0xf0] }
 0x446   : > { %v9818_v0 = vor.u32 %v10885_v56, %v9815_v11  ;;  %v10693_v56 = vld [vmem:[#allocation15 + $0x500] sm:$0xf0]  ;;  %v9709_v11 = vld [vmem:[#allocation15 + $0xa28] sm:$0xf] }
 0x447   : > { %6659 = vmatpush.bf16.msrb.mxu2 %v9174_v38  ;;  %6698 = vmatpush.bf16.msra.mxu1 %v9846_v57  ;;  %v10182_v38 = vor.u32 %v10976_v34, %v10179_v41  ;;  %v9038_v25 = vor.u32 %v10693_v56, %v9037_v61  ;;  %v10098_v34 = vor.u32 %v10955_v14, %v10095_v59  ;;  %v10665_v61 = vld [vmem:[#allocation15 + $0x420] sm:$0xf0]  ;;  %v9597_v56 = vld [vmem:[#allocation15 + $0x948] sm:$0xf]  ;;  %v9961_v14 = vld [vmem:[#allocation15 + $0xc20] sm:$0xf] }
 0x448   : > { %6737 = vmatpush.bf16.msrb.mxu0 %v8730_v54  ;;  %v9738_v54 = vor.u32 %v10868_v8, %v9737_v43  ;;  %v8982_v41 = vor.u32 %v10679_v19, %v8981_v32  ;;  %v10672_v43 = vld [vmem:[#allocation15 + $0x458] sm:$0xf0]  ;;  %v9625_v8 = vld [vmem:[#allocation15 + $0x980] sm:$0xf] }
 0x449   : > { %6726 = vmatpush.bf16.msra.mxu3 %v8450_v7  ;;  %v10878_v7 = vld [vmem:[#allocation15 + $0xacc] sm:$0xf] }
 0x44a   : > { %v9790_v36 = vor.u32 %v10878_v7, %v9787_v50  ;;  %v9681_v50 = vld [vmem:[#allocation15 + $0x9f0] sm:$0xf] }
 0x44b   : > { %6660 = vmatpush.bf16.msrb.mxu2 %v9146_v22  ;;  %6699 = vmatpush.bf16.msra.mxu1 %v9818_v0  ;;  %v10962_v22 = vld [vmem:[#allocation15 + $0xd6c] sm:$0xf]  ;;  %v9710_v0 = vor.u32 %v10861_v28, %v9709_v11  ;;  %v10833_v11 = vld [vmem:[#allocation15 + $0x960] sm:$0xf0] }
 0x44c   : > { %6738 = vmatpush.bf16.msrb.mxu0 %v8702_v42  ;;  %v10686_v42 = vld [vmem:[#allocation15 + $0x4c8] sm:$0xf0]  ;;  %v10126_v13 = vor.u32 %v10962_v22, %v10123_v45  ;;  %v8897_v22 = vld [vmem:[#allocation15 + $0x3d0] sm:$0xf] }
 0x44d   : > { %6727 = vmatpush.bf16.msra.mxu3 %v8422_v29  ;;  %v8645_v29 = vld [vmem:[#allocation15 + $0x1d8] sm:$0xf]  ;;  %v9010_v27 = vor.u32 %v10686_v42, %v9009_v3  ;;  %v9569_v45 = vld [vmem:[#allocation15 + $0x910] sm:$0xf]  ;;  %v10826_v3 = vld [vmem:[#allocation15 + $0x928] sm:$0xf0] }
 0x44e   : > { %v8646_v40 = vor.u32 %v10595_v15, %v8645_v29 }
 0x44f   : > { %6661 = vmatpush.bf16.msrb.mxu2 %v9118_v35  ;;  %6700 = vmatpush.bf16.msra.mxu1 %v9790_v36  ;;  %v9317_v35 = vld [vmem:[#allocation15 + $0x718] sm:$0xf]  ;;  %v10763_v36 = vld [vmem:[#allocation15 + $0x730] sm:$0xf0] }
 0x450   : > { %6728 = vmatmul.bf16.vlgmr.msra.gmra.mxu3 %v11738_v1  ;;  %v10602_v1 = vld [vmem:[#allocation15 + $0x228] sm:$0xf0]  ;;  %v9318_v31 = vor.u32 %v10763_v36, %v9317_v35  ;;  %v9289_v35 = vld [vmem:[#allocation15 + $0x6e0] sm:$0xf]  ;;  %v10756_v36 = vld [vmem:[#allocation15 + $0x6f8] sm:$0xf0] }
 0x451   : > { %6772 = vmatpush.bf16.msrb.mxu3 %v9514_v30  ;;  %v8674_v24 = vor.u32 %v10602_v1, %v8673_v6  ;;  %v10700_v30 = vld [vmem:[#allocation15 + $0x538] sm:$0xf0]  ;;  %v10854_v6 = vld [vmem:[#allocation15 + $0xa08] sm:$0xf0]  ;;  %v9346_v1 = vor.u32 %v10770_v62, %v9345_v60  ;;  %v11906_v29 = vpop.f32.mrf.mxu1  ;;  %v9598_v60 = vor.u32 %v10833_v11, %v9597_v56  ;;  %v10011_v62 = vld [vmem:[#allocation15 + $0xca4] sm:$0xf0] }
 0x452   : > { %v9066_v57 = vor.u32 %v10700_v30, %v9065_v39  ;;  %v9682_v37 = vor.u32 %v10854_v6, %v9681_v50  ;;  %v10948_v39 = vld [vmem:[#allocation15 + $0xcfc] sm:$0xf]  ;;  %v9983_v50 = vld [vmem:[#allocation15 + $0xc6c] sm:$0xf0]  ;;  %v9570_v6 = vor.u32 %v10826_v3, %v9569_v45  ;;  %v9849_v11 = vld [vmem:[#allocation15 + $0xb40] sm:$0xf] }
 0x453   : > { %6739 = vmatpush.bf16.msrb.mxu0 %v8674_v24  ;;  %v6521_v46 = vpop.f32.mrf.mxu3  ;;  %6662 = vmatpush.bf16.msrb.mxu2 %v9090_v33  ;;  %v10067_v33 = vld [vmem:[#allocation15 + $0xd14] sm:$0xf0]  ;;  %v10728_v56 = vld [vmem:[#allocation15 + $0x618] sm:$0xf0]  ;;  %v10889_v45 = vld [vmem:[#allocation15 + $0xb20] sm:$0xf0] }
 0x454   : > { %6701 = vmatpush.bf16.msra.mxu1 %v9762_v51  ;;  %v6534_v15 = vpop.f32.mrf.mxu0  ;;  %v8953_v51 = vld [vmem:[#allocation15 + $0x440] sm:$0xf] }
 0x455   : > { %6773 = vmatpush.bf16.msrb.mxu3 %v9486_v55  ;;  %v10151_v55 = vld [vmem:[#allocation15 + $0xdbc] sm:$0xf0] }
 0x456   : > { %v10154_v20 = vor.u32 %v10969_v47, %v10151_v55  ;;  %6663 = vmatmul.bf16.vlgmr.msrb.gmra.mxu2 %v11755_v53  ;;  %v8925_v55 = vld [vmem:[#allocation15 + $0x408] sm:$0xf] }
 0x457   : > { %6740 = vmatpush.bf16.msrb.mxu0 %v8646_v40  ;;  %6707 = vmatpush.bf16.msra.mxu2 %v10182_v38  ;;  %v10840_v40 = vld [vmem:[#allocation15 + $0x998] sm:$0xf0]  ;;  %v8954_v38 = vor.u32 %v10672_v43, %v8953_v51  ;;  %v10742_v51 = vld [vmem:[#allocation15 + $0x688] sm:$0xf0]  ;;  %v9905_v43 = vld [vmem:[#allocation15 + $0xbb0] sm:$0xf] }
 0x458   : > { %6746 = vmatpush.bf16.msrb.mxu1 %v9066_v57  ;;  %v9626_v49 = vor.u32 %v10840_v40, %v9625_v8  ;;  %v10910_v8 = vld [vmem:[#allocation15 + $0xbc8] sm:$0xf0] }
 0x459   : > { %6774 = vmatpush.bf16.msrb.mxu3 %v9458_v5  ;;  %v11901_v5 = vld [vmem:[#allocation16] sm:$0xff]  ;;  %6702 = vmatmul.bf16.vlgmr.msra.gmra.mxu1 %v11782_v52  ;;  %v6456_v57 = vpop.f32.mrf.mxu2 }
 0x45a   : > { %v3782_v7 = vperm.slane %v11901_v5, 4  ;;  %6741 = vmatmul.bf16.vlgmr.msrb.gmra.mxu0 %v11744_v17  ;;  %v10847_v17 = vld [vmem:[#allocation15 + $0x9d0] sm:$0xf0] }
 0x45b   : > { %6785 = vmatpush.bf16.msra.mxu0 %v9738_v54  ;;  %v6523_v10 = vpop.f32.mrf.mxu3  ;;  %6708 = vmatpush.bf16.msra.mxu2 %v10154_v20  ;;  %v10039_v54 = vld [vmem:[#allocation15 + $0xcdc] sm:$0xf0]  ;;  %v8926_v20 = vor.u32 %v10665_v61, %v8925_v55 }
 0x45c   : > { %6747 = vmatpush.bf16.msrb.mxu1 %v9038_v25  ;;  %v6522_v24 = vadd.f32 %v6521_v46, %v3782_v7  ;;  %v10070_v46 = vor.u32 %v10948_v39, %v10067_v33  ;;  %v10934_v25 = vld [vmem:[#allocation15 + $0xc8c] sm:$0xf]  ;;  %v10927_v7 = vld [vmem:[#allocation15 + $0xc54] sm:$0xf]  ;;  %v9233_v33 = vld [vmem:[#allocation15 + $0x670] sm:$0xf] }
 0x45d   : > { %6775 = vmatpush.bf16.msrb.mxu3 %v9430_v26  ;;  %v9653_v26 = vld [vmem:[#allocation15 + $0x9b8] sm:$0xf]  ;;  %v10651_v10 = vld [vmem:[#allocation15 + $0x3b0] sm:$0xf0]  ;;  %v9986_v59 = vor.u32 %v10927_v7, %v9983_v50  ;;  %v9177_v61 = vld [vmem:[#allocation15 + $0x600] sm:$0xf] }
 0x45e   : > { %v11908_v2 = vadd.f32 %v6534_v15, %v6522_v24  ;;  %v9654_v30 = vor.u32 %v10847_v17, %v9653_v26  ;;  %v9290_v26 = vor.u32 %v10756_v36, %v9289_v35  ;;  %v9261_v15 = vld [vmem:[#allocation15 + $0x6a8] sm:$0xf]  ;;  %v9793_v7 = vld [vmem:[#allocation15 + $0xad0] sm:$0xf]  ;;  %v10875_v36 = vld [vmem:[#allocation15 + $0xab0] sm:$0xf0] }
 0x45f   : > { %6786 = vmatpush.bf16.msra.mxu0 %v9710_v0  ;;  %6709 = vmatpush.bf16.msra.mxu2 %v10126_v13  ;;  %v10658_v0 = vld [vmem:[#allocation15 + $0x3e8] sm:$0xf0]  ;;  %v9541_v13 = vld [vmem:[#allocation15 + $0x8d8] sm:$0xf] }
 0x460   : > { %6748 = vmatpush.bf16.msrb.mxu1 %v9010_v27  ;;  %v8898_v42 = vor.u32 %v10658_v0, %v8897_v22  ;;  %v10819_v27 = vld [vmem:[#allocation15 + $0x8f0] sm:$0xf0]  ;;  %v9821_v0 = vld [vmem:[#allocation15 + $0xb08] sm:$0xf] }
 0x461   : > { %6776 = vmatpush.bf16.msrb.mxu3 %v9402_v44  ;;  %v6444_v44 = vadd.f32 %v11891_v21, %v11878_v63  ;;  %v6497_v63 = vpop.f32.mrf.mxu1  ;;  %v6536_v21 = vpop.f32.mrf.mxu0  ;;  %v9542_v19 = vor.u32 %v10819_v27, %v9541_v13  ;;  %v10707_v13 = vld [vmem:[#allocation15 + $0x570] sm:$0xf0]  ;;  %v9765_v27 = vld [vmem:[#allocation15 + $0xa98] sm:$0xf] }
 0x462   : > { %v10896_v63 = vld [vmem:[#allocation15 + $0xb58] sm:$0xf0]  ;;  %v9178_v21 = vor.u32 %v10728_v56, %v9177_v61 }
 0x463   : > { %6787 = vmatpush.bf16.msra.mxu0 %v9682_v37  ;;  %6710 = vmatpush.bf16.msra.mxu2 %v10098_v34  ;;  %v6457_v47 = vadd.f32 %v6456_v57, %v6444_v44  ;;  %v10924_v37 = vld [vmem:[#allocation15 + $0xc38] sm:$0xf0]  ;;  %v9933_v34 = vld [vmem:[#allocation15 + $0xbe8] sm:$0xf]  ;;  %v9234_v44 = vor.u32 %v10742_v51, %v9233_v33  ;;  %v10735_v57 = vld [vmem:[#allocation15 + $0x650] sm:$0xf0] }
 0x464   : > { %6749 = vmatpush.bf16.msrb.mxu1 %v8982_v41  ;;  %v9962_v17 = vor.u32 %v10924_v37, %v9961_v14  ;;  %v10917_v41 = vld [vmem:[#allocation15 + $0xc00] sm:$0xf0]  ;;  %v10185_v14 = vld [vmem:[#allocation15 + $0xde0] sm:$0xf]  ;;  %v10980_v37 = vld [vmem:[#allocation15 + $0xdf8] sm:$0xf0] }
 0x465   : > { %6777 = vmatpush.bf16.msrb.mxu3 %v9374_v12  ;;  %v11914_v28 = vadd.f32 %v11886_v16, %v6457_v47  ;;  %v10042_v12 = vor.u32 %v10941_v48, %v10039_v54  ;;  %v6458_v16 = vpop.f32.mrf.mxu2  ;;  %v9877_v48 = vld [vmem:[#allocation15 + $0xb78] sm:$0xf] }
 0x466   : > { %v10714_v16 = vld [vmem:[#allocation15 + $0x5a8] sm:$0xf0]  ;;  %v10101_v51 = vld [vmem:[#allocation15 + $0xd38] sm:$0xf] }
 0x467   : > { %6788 = vmatpush.bf16.msra.mxu0 %v9654_v30  ;;  %6711 = vmatpush.bf16.msra.mxu2 %v10070_v46  ;;  %v9934_v30 = vor.u32 %v10917_v41, %v9933_v34  ;;  %v9906_v46 = vor.u32 %v10910_v8, %v9905_v43  ;;  %v10129_v34 = vld [vmem:[#allocation15 + $0xd70] sm:$0xf]  ;;  %v10966_v41 = vld [vmem:[#allocation15 + $0xd88] sm:$0xf0]  ;;  %v10959_v43 = vld [vmem:[#allocation15 + $0xd50] sm:$0xf0] }
 0x468   : > { %6750 = vmatpush.bf16.msrb.mxu1 %v8954_v38  ;;  %v9205_v38 = vld [vmem:[#allocation15 + $0x638] sm:$0xf] }
 0x469   : > { %6778 = vmatpush.bf16.msrb.mxu3 %v9346_v1  ;;  %v8869_v1 = vld [vmem:[#allocation15 + $0x398] sm:$0xf]  ;;  %v9206_v55 = vor.u32 %v10735_v57, %v9205_v38  ;;  %v10073_v38 = vld [vmem:[#allocation15 + $0xd00] sm:$0xf]  ;;  %v10952_v57 = vld [vmem:[#allocation15 + $0xd18] sm:$0xf0] }
 0x46a   : > { %v8870_v32 = vor.u32 %v10651_v10, %v8869_v1  ;;  %v9093_v10 = vld [vmem:[#allocation15 + $0x558] sm:$0xf] }
 0x46b   : > { %6789 = vmatpush.bf16.msra.mxu0 %v9626_v49  ;;  %6712 = vmatpush.bf16.msra.mxu2 %v10042_v12  ;;  %v10903_v49 = vld [vmem:[#allocation15 + $0xb90] sm:$0xf0] }
 0x46c   : > { %6751 = vmatpush.bf16.msrb.mxu1 %v8926_v20  ;;  %v9850_v20 = vor.u32 %v10896_v63, %v9849_v11 }
 0x46d   : > { %6779 = vmatpush.bf16.msrb.mxu3 %v9318_v31  ;;  %v10749_v31 = vld [vmem:[#allocation15 + $0x6c0] sm:$0xf0] }
 0x46e   : > { %v9262_v39 = vor.u32 %v10749_v31, %v9261_v15  ;;  %v10973_v15 = vld [vmem:[#allocation15 + $0xdc0] sm:$0xf0] }
 0x46f   : > { %6790 = vmatpush.bf16.msra.mxu0 %v9598_v60  ;;  %v9149_v60 = vld [vmem:[#allocation15 + $0x5c8] sm:$0xf] }
 0x470   : > { %6780 = vmatmul.bf16.vlgmr.msrb.gmra.mxu3 %v11762_v23  ;;  %v10014_v23 = vor.u32 %v10934_v25, %v10011_v62  ;;  %6752 = vmatpush.bf16.msrb.mxu1 %v8898_v42  ;;  %v10721_v62 = vld [vmem:[#allocation15 + $0x5e0] sm:$0xf0]  ;;  %v9121_v42 = vld [vmem:[#allocation15 + $0x590] sm:$0xf] }
 0x471   : > { %v9150_v3 = vor.u32 %v10721_v62, %v9149_v60  ;;  %v9122_v50 = vor.u32 %v10714_v16, %v9121_v42  ;;  %v10931_v60 = vld [vmem:[#allocation15 + $0xc70] sm:$0xf0] }
 0x472   : > { %6713 = vmatpush.bf16.msra.mxu2 %v10014_v23  ;;  %v9822_v23 = vor.u32 %v10889_v45, %v9821_v0 }
 0x473   : > { %6791 = vmatpush.bf16.msra.mxu0 %v9570_v6  ;;  %v11916_v24 = vpop.f32.mrf.mxu3  ;;  %v11921_v47 = vpop.f32.mrf.mxu1 }
 0x474   : > { %6753 = vmatpush.bf16.msrb.mxu1 %v8870_v32  ;;  %v9766_v32 = vor.u32 %v10875_v36, %v9765_v27 }
 0x476   : > { %6714 = vmatpush.bf16.msra.mxu2 %v9986_v59  ;;  %v11923_v54 = vpop.f32.mrf.mxu0  ;;  %v9094_v59 = vor.u32 %v10707_v13, %v9093_v10 }
 0x477   : > { %6792 = vmatpush.bf16.msra.mxu0 %v9542_v19  ;;  %6754 = vmatmul.bf16.vlgmr.msrb.gmra.mxu1 %v11752_v4  ;;  %v6483_v4 = vadd.f32 %v11893_v18, %v11914_v28  ;;  %v10186_v19 = vor.u32 %v10980_v37, %v10185_v14 }
 0x478   : > { %6798 = vmatpush.bf16.msra.mxu1 %v9962_v17  ;;  %v10157_v17 = vld [vmem:[#allocation15 + $0xda8] sm:$0xf] }
 0x479   : > { %6715 = vmatmul.bf16.vlgmr.msra.gmra.mxu2 %v11795_v9  ;;  %v6496_v12 = vadd.f32 %v11906_v29, %v6483_v4  ;;  %v6508_v25 = vpop.f32.mrf.mxu2  ;;  %v10882_v29 = vld [vmem:[#allocation15 + $0xae8] sm:$0xf0]  ;;  %v10158_v31 = vor.u32 %v10973_v15, %v10157_v17 }
 0x47a   : > { %6759 = vmatpush.bf16.msrb.mxu2 %v9290_v26  ;;  %6793 = vmatmul.bf16.vlgmr.msra.gmra.mxu0 %v11773_v58  ;;  %v9878_v58 = vor.u32 %v10903_v49, %v9877_v48  ;;  %v9794_v6 = vor.u32 %v10882_v29, %v9793_v7  ;;  %v10074_v49 = vor.u32 %v10952_v57, %v10073_v38 }
 0x47b   : > { %v6575_v40 = vpop.f32.mrf.mxu3  ;;  %v6509_v22 = vadd.f32 %v6508_v25, %v6496_v12  ;;  %v6549_v18 = vpop.f32.mrf.mxu1  ;;  %v10938_v12 = vld [vmem:[#allocation15 + $0xca8] sm:$0xf0]  ;;  %v9989_v25 = vld [vmem:[#allocation15 + $0xc58] sm:$0xf] }
 0x47c   : > { %6799 = vmatpush.bf16.msra.mxu1 %v9934_v30  ;;  %v10130_v30 = vor.u32 %v10966_v41, %v10129_v34  ;;  %v10102_v40 = vor.u32 %v10959_v43, %v10101_v51 }
 0x47d   : > { %11108 = vtanh.f32 %v6509_v22  ;;  %v9990_v22 = vor.u32 %v10931_v60, %v9989_v25 }
 0x47e   : > { %6760 = vmatpush.bf16.msrb.mxu2 %v9262_v39  ;;  %v6588_v28 = vpop.f32.mrf.mxu0  ;;  %v3783_v39 = vperm.slane %v11901_v5, 5 }
 0x480   : > { %6800 = vmatpush.bf16.msra.mxu1 %v9906_v46 }
 0x481   : > { %v6510_v1 = vpop.f32.mrf.mxu2 }
 0x482   : > { %6761 = vmatpush.bf16.msrb.mxu2 %v9234_v44 }
 0x483   : > { %v11109_v35 = vpop.eup %11108 }
 0x484   : > { %6801 = vmatpush.bf16.msra.mxu1 %v9878_v58  ;;  %6834 = vst [vmem:[%s11853_s29 + $0x18] sm:$0xff] %v11109_v35 }
 0x486   : > { %6762 = vmatpush.bf16.msrb.mxu2 %v9206_v55  ;;  %v10945_v55 = vld [vmem:[#allocation15 + $0xce0] sm:$0xf0] }
 0x488   : > { %6802 = vmatpush.bf16.msra.mxu1 %v9850_v20 }
 0x48a   : > { %6763 = vmatpush.bf16.msrb.mxu2 %v9178_v21  ;;  %v10017_v21 = vld [vmem:[#allocation15 + $0xc90] sm:$0xf] }
 0x48b   : > { %v10018_v20 = vor.u32 %v10938_v12, %v10017_v21 }
 0x48c   : > { %6803 = vmatpush.bf16.msra.mxu1 %v9822_v23 }
 0x48e   : > { %6764 = vmatpush.bf16.msrb.mxu2 %v9150_v3 }
 0x490   : > { %6804 = vmatpush.bf16.msra.mxu1 %v9794_v6 }
 0x492   : > { %6765 = vmatpush.bf16.msrb.mxu2 %v9122_v50  ;;  %v3784_v50 = vperm.slane %v11901_v5, 6 }
 0x493   : > { %v6625_v26 = vpop.f32.mrf.mxu3  ;;  %v6599_v44 = vpop.f32.mrf.mxu1 }
 0x494   : > { %6805 = vmatpush.bf16.msra.mxu1 %v9766_v32  ;;  %v6626_v8 = vadd.f32 %v6625_v26, %v3783_v39 }
 0x496   : > { %6766 = vmatpush.bf16.msrb.mxu2 %v9094_v59  ;;  %v6638_v46 = vpop.f32.mrf.mxu0 }
 0x497   : > { %6806 = vmatmul.bf16.vlgmr.msra.gmra.mxu1 %v11782_v52  ;;  %v6639_v48 = vadd.f32 %v6638_v46, %v6626_v8  ;;  %v10045_v52 = vld [vmem:[#allocation15 + $0xcc8] sm:$0xf] }
 0x498   : > { %v10046_v61 = vor.u32 %v10945_v55, %v10045_v52 }
 0x499   : > { %6767 = vmatmul.bf16.vlgmr.msrb.gmra.mxu2 %v11755_v53  ;;  %v6548_v53 = vadd.f32 %v11921_v47, %v11908_v2  ;;  %v6560_v4 = vpop.f32.mrf.mxu2 }
 0x49a   : > { %6811 = vmatpush.bf16.msra.mxu2 %v10186_v19 }
 0x49b   : > { %v6627_v33 = vpop.f32.mrf.mxu3  ;;  %v6561_v58 = vadd.f32 %v6560_v4, %v6548_v53  ;;  %v6601_v11 = vpop.f32.mrf.mxu1 }
 0x49d   : > { %v6574_v56 = vadd.f32 %v11916_v24, %v6561_v58 }
 0x49e   : > { %6812 = vmatpush.bf16.msra.mxu2 %v10158_v31  ;;  %v6640_v63 = vpop.f32.mrf.mxu0 }
 0x49f   : > { %v6587_v24 = vadd.f32 %v11923_v54, %v6574_v56 }
 0x4a1   : > { %v6562_v62 = vpop.f32.mrf.mxu2  ;;  %v6600_v18 = vadd.f32 %v6599_v44, %v6587_v24 }
 0x4a2   : > { %6813 = vmatpush.bf16.msra.mxu2 %v10130_v30 }
 0x4a6   : > { %6814 = vmatpush.bf16.msra.mxu2 %v10102_v40 }
 0x4aa   : > { %6815 = vmatpush.bf16.msra.mxu2 %v10074_v49 }
 0x4ae   : > { %6816 = vmatpush.bf16.msra.mxu2 %v10046_v61 }
 0x4b2   : > { %6817 = vmatpush.bf16.msra.mxu2 %v10018_v20 }
 0x4b3   : > { %v6677_v2 = vpop.f32.mrf.mxu3  ;;  %v6651_v0 = vpop.f32.mrf.mxu1 }
 0x4b4   : > { %v6652_v27 = vadd.f32 %v6651_v0, %v6639_v48 }
 0x4b6   : > { %6818 = vmatpush.bf16.msra.mxu2 %v9990_v22  ;;  %v6690_v45 = vpop.f32.mrf.mxu0 }
 0x4b9   : > { %6819 = vmatmul.bf16.vlgmr.msra.gmra.mxu2 %v11795_v9  ;;  %v6612_v28 = vpop.f32.mrf.mxu2 }
 0x4ba   : > { %v6613_v3 = vadd.f32 %v6612_v28, %v6600_v18 }
 0x4bb   : > { %v6679_v47 = vpop.f32.mrf.mxu3  ;;  %v6653_v23 = vpop.f32.mrf.mxu1 }
 0x4bc   : > { %11110 = vtanh.f32 %v6613_v3 }
 0x4be   : > { %v6692_v42 = vpop.f32.mrf.mxu0 }
 0x4c1   : > { %v6614_v16 = vpop.f32.mrf.mxu2 }
 0x4c2   : > { %v11111_v7 = vpop.eup %11110 }
 0x4c3   : > { %6835 = vst [vmem:[%s11853_s29 + $0x20] sm:$0xff] %v11111_v7 }
 0x4d3   : > { %v6729_v29 = vpop.f32.mrf.mxu3 }
 0x4d4   : > { %v6730_v1 = vadd.f32 %v6729_v29, %v3784_v50 }
 0x4d6   : > { %v6703_v9 = vpop.f32.mrf.mxu1 }
 0x4d7   : > { %v6742_v10 = vpop.f32.mrf.mxu0 }
 0x4d8   : > { %v6743_v13 = vadd.f32 %v6742_v10, %v6730_v1 }
 0x4d9   : > { %v6664_v35 = vpop.f32.mrf.mxu2 }
 0x4da   : > { %v6665_v54 = vadd.f32 %v6664_v35, %v6652_v27 }
 0x4db   : > { %v6731_v6 = vpop.f32.mrf.mxu3 }
 0x4dc   : > { %v6678_v36 = vadd.f32 %v6677_v2, %v6665_v54 }
 0x4de   : > { %v6705_v14 = vpop.f32.mrf.mxu1  ;;  %v6691_v15 = vadd.f32 %v6690_v45, %v6678_v36 }
 0x4df   : > { %v6744_v37 = vpop.f32.mrf.mxu0 }
 0x4e0   : > { %v6704_v31 = vadd.f32 %v6703_v9, %v6691_v15 }
 0x4e1   : > { %v6666_v59 = vpop.f32.mrf.mxu2 }
 0x4f3   : > { %v6781_v32 = vpop.f32.mrf.mxu3 }
 0x4f4   : > { %v6755_v26 = vpop.f32.mrf.mxu1 }
 0x4f5   : > { %v6756_v43 = vadd.f32 %v6755_v26, %v6743_v13 }
 0x4f7   : > { %v6794_v17 = vpop.f32.mrf.mxu0 }
 0x4fb   : > { %v6783_v19 = vpop.f32.mrf.mxu3 }
 0x4fc   : > { %v6716_v5 = vpop.f32.mrf.mxu2  ;;  %v6757_v41 = vpop.f32.mrf.mxu1 }
 0x4fd   : > { %v6717_v34 = vadd.f32 %v6716_v5, %v6704_v31 }
 0x4ff   : > { %11112 = vtanh.f32 %v6717_v34  ;;  %v6796_v39 = vpop.f32.mrf.mxu0 }
 0x504   : > { %v6718_v30 = vpop.f32.mrf.mxu2 }
 0x505   : > { %v11113_v33 = vpop.eup %11112 }
 0x506   : > { %6836 = vst [vmem:[%s11853_s29 + $0x28] sm:$0xff] %v11113_v33 }
 0x514   : > { %v6807_v51 = vpop.f32.mrf.mxu1 }
 0x51c   : > { %v6768_v8 = vpop.f32.mrf.mxu2  ;;  %v6809_v46 = vpop.f32.mrf.mxu1 }
 0x51d   : > { %v6769_v40 = vadd.f32 %v6768_v8, %v6756_v43 }
 0x51f   : > { %v6782_v44 = vadd.f32 %v6781_v32, %v6769_v40 }
 0x521   : > { %v6795_v57 = vadd.f32 %v6794_v17, %v6782_v44 }
 0x523   : > { %v6808_v48 = vadd.f32 %v6807_v51, %v6795_v57 }
 0x524   : > { %v6770_v38 = vpop.f32.mrf.mxu2 }
 0x53c   : > { %v6820_v49 = vpop.f32.mrf.mxu2 }
 0x53d   : > { %v6821_v53 = vadd.f32 %v6820_v49, %v6808_v48 }
 0x53f   : > { %11114 = vtanh.f32 %v6821_v53 }
 0x544   : > { %v6822_v52 = vpop.f32.mrf.mxu2 }
 0x545   : > { %v11115_v55 = vpop.eup %11114 }
 0x546   : > { %6838 = vst.msk [vmem:[%s11853_s29 + $0x30] sm:$0xff] %vm6837_vm0, %v11115_v55 }
 0x547 PF: > { %s27_s17 = sadd.s32 1, %s11449_s17  }
 0x548   : > { %p24_p7 = scmp.ge.s32.totalorder %s27_s17, 4  }
 0x54a   :  { %26 = sbr.rel (!%p24_p7) target bundleno = 6 (0x6), region = 135 }
 0x54f   :  { %6860 = vsyncpa [#allocation3], 1 }
 0x550   :  { %6862 = vsyncpa [#allocation3 + $0x1], 1 }
 0x551   :  { %6863 = vsyncpa [#allocation5], 1 }
 0x552   :  { %6864 = vsyncpa [#allocation8], 1 }
 0x553   :  { %6865 = vsyncpa [#allocation11], 1 }
 0x554   :  { %6866 = vsyncpa [#allocation14], 1 }
 0x555   :  { %6867 = vsyncpa [#allocation17], 1 }

</bundles_post_ra>
